<compile_context>
chip_gen: v7x
topology: tpu7x:2x2x1
jax: 0.10.0
libtpu: 0.0.40
codegen_flags: <defaults>
</compile_context>

<pallas_src>
import numpy as np
import jax
import jax.numpy as jnp
from jax.experimental import pallas as pl
from jax.experimental.pallas import tpu as pltpu


# ---------------------------------------------------------------------------
# FC stage: cat(z, y) (B,128 padded) -> Linear(1024)+ReLU -> Linear(2048)+ReLU
# ---------------------------------------------------------------------------
def _fc_kernel(x_ref, w1_ref, b1_ref, w2_ref, b2_ref, o_ref):
    # The tiny first matmul is recomputed per grid step (negligible next to the
    # w2 weight stream) so no cross-step / cross-core state is needed.
    h = jnp.dot(x_ref[...], w1_ref[...], preferred_element_type=jnp.float32)
    h = jnp.maximum(h + b1_ref[...], 0.0).astype(jnp.bfloat16)
    o = jnp.dot(h, w2_ref[...], preferred_element_type=jnp.float32)
    o_ref[...] = jnp.maximum(o + b2_ref[...], 0.0)


def fc_forward(x, w1, b1, w2, b2, *, nsplit=4):
    B = x.shape[0]
    K1, N1 = w1.shape
    N2 = w2.shape[1]
    bn = N2 // nsplit
    return pl.pallas_call(
        _fc_kernel,
        out_shape=jax.ShapeDtypeStruct((B, N2), jnp.float32),
        grid=(nsplit,),
        in_specs=[
            pl.BlockSpec((B, K1), lambda j: (0, 0)),
            pl.BlockSpec((K1, N1), lambda j: (0, 0)),
            pl.BlockSpec((1, N1), lambda j: (0, 0)),
            pl.BlockSpec((w2.shape[0], bn), lambda j: (0, j)),  # bf16 weight stream
            pl.BlockSpec((1, bn), lambda j: (0, j)),
        ],
        out_specs=pl.BlockSpec((B, bn), lambda j: (0, j)),
        compiler_params=pltpu.CompilerParams(dimension_semantics=("parallel",)),
    )(x, w1, b1, w2, b2)


# ---------------------------------------------------------------------------
# Fused deconv stack: 3 x (ConvTranspose2d + activation) in one kernel
# ---------------------------------------------------------------------------
def _deconv_mats(wt, b, H, W, *, stride=2, pad=1, out_cols_pad=None):
    """Build the P_ki / Q_ki / bias-row operands of one transposed-conv layer.

    wt: PyTorch ConvTranspose2d weight (Cin, Cout, kh, kw); b: (Cout,)
    Input spatial dims (H, W); returns (P, Q, bias_row, OH, OW).
    """
    Cin, Cout, kh, kw = wt.shape
    OH = (H - 1) * stride - 2 * pad + kh
    OW = (W - 1) * stride - 2 * pad + kw
    eh, ew = kh - 1 - pad, kw - 1 - pad

    # Row structure (trace-time constant): P[ki, r, h] = 1 iff r + ki - eh == stride*h
    ki_i = np.arange(kh)[:, None, None]
    r_i = np.arange(OH)[None, :, None]
    h_i = np.arange(H)[None, None, :]
    P = ((r_i + ki_i - eh) == stride * h_i).astype(np.float32)      # (kh, OH, H)

    # Column structure: T[w, c, j] = 1 iff j == ew + stride*w - c (0 <= j < kw)
    w_i = np.arange(W)[:, None, None]
    c_i = np.arange(OW)[None, :, None]
    j_i = np.arange(kw)[None, None, :]
    T = (j_i == (ew + stride * w_i - c_i)).astype(np.float32)       # (W, OW, kw)

    # Equivalent regular-conv taps: wflip[ki, kj, cin, cout]
    wflip = jnp.transpose(jnp.flip(wt, axis=(2, 3)), (2, 3, 0, 1))
    Q = jnp.einsum("wcj,kjno->kwnco", T, wflip).reshape(kh, W * Cin, OW * Cout)
    brow = jnp.tile(b, OW)[None, :]                                  # (1, OW*Cout)

    if out_cols_pad is not None and out_cols_pad > OW * Cout:
        extra = out_cols_pad - OW * Cout
        Q = jnp.pad(Q, ((0, 0), (0, 0), (0, extra)))
        brow = jnp.pad(brow, ((0, 0), (0, extra)))
    return jnp.asarray(P), Q, brow, OH, OW


def _deconv_stack_kernel(a_ref, p1_ref, q1_ref, c1_ref,
                         p2_ref, q2_ref, c2_ref,
                         p3_ref, q3_ref, c3_ref, o_ref):
    def layer(a, p_ref, q_ref, b_ref, act_fn):
        kh = p_ref.shape[0]
        acc = jnp.zeros((p_ref.shape[1], q_ref.shape[2]), jnp.float32)
        for ki in range(kh):                          # static 4-tap unroll
            t = jnp.dot(a, q_ref[ki], preferred_element_type=jnp.float32)
            acc = acc + jnp.dot(p_ref[ki], t, preferred_element_type=jnp.float32)
        return act_fn(acc + b_ref[...])

    relu = lambda v: jnp.maximum(v, 0.0)
    a = a_ref[...]                                    # (8, 256)
    a = layer(a, p1_ref, q1_ref, c1_ref, relu)        # (16, 192)
    a = layer(a, p2_ref, q2_ref, c2_ref, relu)        # (32, 176)
    a = layer(a, p3_ref, q3_ref, c3_ref, jnp.tanh)    # (64, 128)  lane-dense
    o_ref[...] = a


def _deconv_stack(a0, l1, l2, l3, *, batch):
    p1, q1, c1 = l1
    p2, q2, c2 = l2
    p3, q3, c3 = l3
    h_in, cols_in = a0.shape[0] // batch, a0.shape[1]
    oh_out, cols_out = p3.shape[1], q3.shape[2]

    def full(a):
        nd = a.ndim
        return pl.BlockSpec(a.shape, lambda b, _nd=nd: (0,) * _nd)

    return pl.pallas_call(
        _deconv_stack_kernel,
        out_shape=jax.ShapeDtypeStruct((batch * oh_out, cols_out), jnp.float32),
        grid=(batch,),
        in_specs=[pl.BlockSpec((h_in, cols_in), lambda b: (b, 0)),
                  full(p1), full(q1), full(c1),
                  full(p2), full(q2), full(c2),
                  full(p3), full(q3), full(c3)],
        out_specs=pl.BlockSpec((oh_out, cols_out), lambda b: (b, 0)),
        compiler_params=pltpu.CompilerParams(dimension_semantics=("parallel",)),
    )(a0, p1, q1, c1, p2, q2, c2, p3, q3, c3)


# ------------------------------- full generator -----------------------------
def generator_forward(params, z, label):
    B = z.shape[0]
    x = jnp.concatenate([z, label], axis=1)                      # (B, 110)
    kpad = 128 - x.shape[1]
    x = jnp.pad(x, ((0, 0), (0, kpad)))                          # K 110 -> 128
    w1 = jnp.pad(params["w1"], ((0, kpad), (0, 0)))
    w2 = params["w2"].astype(jnp.bfloat16)                       # bf16 weight stream
    h = fc_forward(x, w1, params["b1"].reshape(1, -1),
                   w2, params["b2"].reshape(1, -1))              # (B, 2048) f32

    # PyTorch .view(-1,64,8,4) (NCHW) -> per-image 2-D layout rows=H, cols=(w, cin)
    a0 = h.reshape(B, 64, 8, 4).transpose(0, 2, 3, 1).reshape(B * 8, 4 * 64)

    p1, q1, c1, oh1, ow1 = _deconv_mats(params["wd1"], params["bd1"], 8, 4)
    p2, q2, c2, oh2, ow2 = _deconv_mats(params["wd2"], params["bd2"], oh1, ow1)
    p3, q3, c3, oh3, ow3 = _deconv_mats(params["wd3"], params["bd3"], oh2, ow2,
                                        out_cols_pad=128)        # lane-dense store

    out2d = _deconv_stack(a0, (p1, q1, c1), (p2, q2, c2), (p3, q3, c3), batch=B)
    cout3 = params["wd3"].shape[1]                               # = 1
    out = out2d.reshape(B, oh3, 128)[:, :, :ow3 * cout3]         # (B, 64, 21)
    return out[:, None, :, :]                                    # (B, 1, 64, 21)


# plain-JAX NCHW reference (mirrors PyTorch semantics) for validation
def generator_reference(params, z, label):
    x = jnp.concatenate([z, label], axis=1)
    h = jax.nn.relu(x @ params["w1"] + params["b1"])
    h = jax.nn.relu(h @ params["w2"] + params["b2"])
    x = h.reshape(-1, 64, 8, 4)

    def deconv(x, wt, b, kh, kw, pad=1, stride=2):
        wf = jnp.transpose(jnp.flip(wt, axis=(2, 3)), (1, 0, 2, 3))  # (Cout,Cin,kh,kw)
        y = jax.lax.conv_general_dilated(
            x, wf, window_strides=(1, 1),
            padding=[(kh - 1 - pad,) * 2, (kw - 1 - pad,) * 2],
            lhs_dilation=(stride, stride),
            dimension_numbers=("NCHW", "OIHW", "NCHW"))
        return y + b.reshape(1, -1, 1, 1)

    x = jax.nn.relu(deconv(x, params["wd1"], params["bd1"], 4, 2))
    x = jax.nn.relu(deconv(x, params["wd2"], params["bd2"], 4, 3))
    x = jnp.tanh(deconv(x, params["wd3"], params["bd3"], 4, 3))
    return x


def init_params(key):
    ks = jax.random.split(key, 10)
    n = lambda k, shape, s: s * jax.random.normal(k, shape, jnp.float32)
    return {
        "w1": n(ks[0], (110, 1024), 0.10), "b1": n(ks[1], (1024,), 0.01),
        "w2": n(ks[2], (1024, 2048), 0.05), "b2": n(ks[3], (2048,), 0.01),
        "wd1": n(ks[4], (64, 32, 4, 2), 0.10), "bd1": n(ks[5], (32,), 0.01),
        "wd2": n(ks[6], (32, 16, 4, 3), 0.10), "bd2": n(ks[7], (16,), 0.01),
        "wd3": n(ks[8], (16, 1, 4, 3), 0.10), "bd3": n(ks[9], (1,), 0.01),
    }


if __name__ == "__main__":
    key = jax.random.PRNGKey(0)
    kp, kz, kl = jax.random.split(key, 3)
    params = init_params(kp)
    # store the big FC weight in bf16 once (both kernel and reference use it)
    params["w2"] = params["w2"].astype(jnp.bfloat16)

    B = 2
    z = jax.random.normal(kz, (B, 100), jnp.float32)             # noise
    label = jax.nn.one_hot(jax.random.randint(kl, (B,), 0, 10), 10,
                           dtype=jnp.float32)                    # class one-hot

    fwd = jax.jit(generator_forward)
    out = jax.block_until_ready(fwd(params, z, label))
    assert out.shape == (B, 1, 64, 21), out.shape

    ref = generator_reference(params, z, label)
    np.testing.assert_allclose(np.asarray(out), np.asarray(ref),
                               rtol=5e-2, atol=2e-2)
    print("KERNEL_OK")
</pallas_src>

<mosaic_0001>
module attributes {stable_mosaic.version = 11 : i64} {
  func.func @_fc_kernel(%arg0: i32, %arg1: memref<2x128xf32, #tpu.memory_space<vmem>>, %arg2: memref<128x1024xf32, #tpu.memory_space<vmem>>, %arg3: memref<1x1024xf32, #tpu.memory_space<vmem>>, %arg4: memref<1024x512xbf16, #tpu.memory_space<vmem>>, %arg5: memref<1x512xf32, #tpu.memory_space<vmem>>, %arg6: memref<2x512xf32, #tpu.memory_space<vmem>>) attributes {dimension_semantics = [#tpu.dimension_semantics<parallel>], iteration_bounds = array<i64: 4>, scalar_prefetch = 0 : i64, scratch_operands = 0 : i64, tpu.core_type = #tpu.core_type<tc>, window_params = [{pipeline_mode = #tpu.pipeline_mode<synchronous>, transform_indices = @transform_0, window_bounds = array<i64: 2, 128>}, {pipeline_mode = #tpu.pipeline_mode<synchronous>, transform_indices = @transform_1, window_bounds = array<i64: 128, 1024>}, {pipeline_mode = #tpu.pipeline_mode<synchronous>, transform_indices = @transform_2, window_bounds = array<i64: 1, 1024>}, {transform_indices = @transform_3, window_bounds = array<i64: 1024, 512>}, {transform_indices = @transform_4, window_bounds = array<i64: 1, 512>}, {transform_indices = @transform_5, window_bounds = array<i64: 2, 512>}]} {
    %c0 = arith.constant 0 : index
    %c0_0 = arith.constant 0 : index
    %0 = vector.load %arg1[%c0, %c0_0] : memref<2x128xf32, #tpu.memory_space<vmem>>, vector<2x128xf32>
    %c0_1 = arith.constant 0 : index
    %c0_2 = arith.constant 0 : index
    %1 = vector.load %arg2[%c0_1, %c0_2] : memref<128x1024xf32, #tpu.memory_space<vmem>>, vector<128x1024xf32>
    %cst = arith.constant dense<0.000000e+00> : vector<2x1024xf32>
    %2 = tpu.matmul %0, %1, %cst {dimension_numbers = #tpu.dot_dimension_numbers<[1], [0], [0], [1], [0, 0, 1, 1], [], []>} : vector<2x128xf32>, vector<128x1024xf32>, vector<2x1024xf32> -> vector<2x1024xf32>
    %c0_3 = arith.constant 0 : index
    %c0_4 = arith.constant 0 : index
    %3 = vector.load %arg3[%c0_3, %c0_4] : memref<1x1024xf32, #tpu.memory_space<vmem>>, vector<1x1024xf32>
    %4 = vector.broadcast %3 : vector<1x1024xf32> to vector<2x1024xf32>
    %5 = arith.addf %2, %4 : vector<2x1024xf32>
    %cst_5 = arith.constant 0.000000e+00 : f32
    %6 = vector.broadcast %cst_5 : f32 to vector<2x1024xf32>
    %7 = arith.maximumf %5, %6 : vector<2x1024xf32>
    %8 = arith.truncf %7 : vector<2x1024xf32> to vector<2x1024xbf16>
    %c0_6 = arith.constant 0 : index
    %c0_7 = arith.constant 0 : index
    %9 = vector.load %arg4[%c0_6, %c0_7] : memref<1024x512xbf16, #tpu.memory_space<vmem>>, vector<1024x512xbf16>
    %cst_8 = arith.constant dense<0.000000e+00> : vector<2x512xf32>
    %10 = tpu.matmul %8, %9, %cst_8 {dimension_numbers = #tpu.dot_dimension_numbers<[1], [0], [0], [1], [0, 0, 1, 1], [], []>} : vector<2x1024xbf16>, vector<1024x512xbf16>, vector<2x512xf32> -> vector<2x512xf32>
    %c0_9 = arith.constant 0 : index
    %c0_10 = arith.constant 0 : index
    %11 = vector.load %arg5[%c0_9, %c0_10] : memref<1x512xf32, #tpu.memory_space<vmem>>, vector<1x512xf32>
    %12 = vector.broadcast %11 : vector<1x512xf32> to vector<2x512xf32>
    %13 = arith.addf %10, %12 : vector<2x512xf32>
    %cst_11 = arith.constant 0.000000e+00 : f32
    %14 = vector.broadcast %cst_11 : f32 to vector<2x512xf32>
    %15 = arith.maximumf %13, %14 : vector<2x512xf32>
    %c0_12 = arith.constant 0 : index
    %c0_13 = arith.constant 0 : index
    %16 = vector.load %arg6[%c0_12, %c0_13] : memref<2x512xf32, #tpu.memory_space<vmem>>, vector<2x512xf32>
    tpu.vector_store %arg6[%c0_12, %c0_13], %15 {strides = array<i32>} : memref<2x512xf32, #tpu.memory_space<vmem>>, vector<2x512xf32>,
    return
  }
  func.func @transform_0(%arg0: i32) -> (i32, i32) {
    %c0_i32 = arith.constant 0 : i32
    %c0_i32_0 = arith.constant 0 : i32
    %c0_i32_1 = arith.constant 0 : i32
    return %c0_i32, %c0_i32_0 : i32, i32
  }
  func.func @transform_1(%arg0: i32) -> (i32, i32) {
    %c0_i32 = arith.constant 0 : i32
    %c0_i32_0 = arith.constant 0 : i32
    %c0_i32_1 = arith.constant 0 : i32
    return %c0_i32, %c0_i32_0 : i32, i32
  }
  func.func @transform_2(%arg0: i32) -> (i32, i32) {
    %c0_i32 = arith.constant 0 : i32
    %c0_i32_0 = arith.constant 0 : i32
    %c0_i32_1 = arith.constant 0 : i32
    return %c0_i32, %c0_i32_0 : i32, i32
  }
  func.func @transform_3(%arg0: i32) -> (i32, i32) {
    %c0_i32 = arith.constant 0 : i32
    %c0_i32_0 = arith.constant 0 : i32
    return %c0_i32, %arg0 : i32, i32
  }
  func.func @transform_4(%arg0: i32) -> (i32, i32) {
    %c0_i32 = arith.constant 0 : i32
    %c0_i32_0 = arith.constant 0 : i32
    return %c0_i32, %arg0 : i32, i32
  }
  func.func @transform_5(%arg0: i32) -> (i32, i32) {
    %c0_i32 = arith.constant 0 : i32
    %c0_i32_0 = arith.constant 0 : i32
    return %c0_i32, %arg0 : i32, i32
  }
}

module attributes {stable_mosaic.version = 11 : i64} {
  func.func @_deconv_stack_kernel(%arg0: i32, %arg1: memref<8x256xf32, #tpu.memory_space<vmem>>, %arg2: memref<4x16x8xf32, #tpu.memory_space<vmem>>, %arg3: memref<4x256x192xf32, #tpu.memory_space<vmem>>, %arg4: memref<1x192xf32, #tpu.memory_space<vmem>>, %arg5: memref<4x32x16xf32, #tpu.memory_space<vmem>>, %arg6: memref<4x192x176xf32, #tpu.memory_space<vmem>>, %arg7: memref<1x176xf32, #tpu.memory_space<vmem>>, %arg8: memref<4x64x32xf32, #tpu.memory_space<vmem>>, %arg9: memref<4x176x128xf32, #tpu.memory_space<vmem>>, %arg10: memref<1x128xf32, #tpu.memory_space<vmem>>, %arg11: memref<64x128xf32, #tpu.memory_space<vmem>>) attributes {dimension_semantics = [#tpu.dimension_semantics<parallel>], iteration_bounds = array<i64: 2>, scalar_prefetch = 0 : i64, scratch_operands = 0 : i64, tpu.core_type = #tpu.core_type<tc>, window_params = [{transform_indices = @transform_0, window_bounds = array<i64: 8, 256>}, {pipeline_mode = #tpu.pipeline_mode<synchronous>, transform_indices = @transform_1, window_bounds = array<i64: 4, 16, 8>}, {pipeline_mode = #tpu.pipeline_mode<synchronous>, transform_indices = @transform_2, window_bounds = array<i64: 4, 256, 192>}, {pipeline_mode = #tpu.pipeline_mode<synchronous>, transform_indices = @transform_3, window_bounds = array<i64: 1, 192>}, {pipeline_mode = #tpu.pipeline_mode<synchronous>, transform_indices = @transform_4, window_bounds = array<i64: 4, 32, 16>}, {pipeline_mode = #tpu.pipeline_mode<synchronous>, transform_indices = @transform_5, window_bounds = array<i64: 4, 192, 176>}, {pipeline_mode = #tpu.pipeline_mode<synchronous>, transform_indices = @transform_6, window_bounds = array<i64: 1, 176>}, {pipeline_mode = #tpu.pipeline_mode<synchronous>, transform_indices = @transform_7, window_bounds = array<i64: 4, 64, 32>}, {pipeline_mode = #tpu.pipeline_mode<synchronous>, transform_indices = @transform_8, window_bounds = array<i64: 4, 176, 128>}, {pipeline_mode = #tpu.pipeline_mode<synchronous>, transform_indices = @transform_9, window_bounds = array<i64: 1, 128>}, {transform_indices = @transform_10, window_bounds = array<i64: 64, 128>}]} {
    %c0 = arith.constant 0 : index
    %c0_0 = arith.constant 0 : index
    %0 = vector.load %arg1[%c0, %c0_0] : memref<8x256xf32, #tpu.memory_space<vmem>>, vector<8x256xf32>
    %cst = arith.constant 0.000000e+00 : f32
    %1 = vector.broadcast %cst : f32 to vector<16x192xf32>
    %c0_1 = arith.constant 0 : index
    %c0_2 = arith.constant 0 : index
    %c0_3 = arith.constant 0 : index
    %2 = vector.load %arg3[%c0_1, %c0_2, %c0_3] : memref<4x256x192xf32, #tpu.memory_space<vmem>>, vector<1x256x192xf32>
    %3 = vector.shape_cast %2 : vector<1x256x192xf32> to vector<256x192xf32>
    %cst_4 = arith.constant dense<0.000000e+00> : vector<8x192xf32>
    %4 = tpu.matmul %0, %3, %cst_4 {dimension_numbers = #tpu.dot_dimension_numbers<[1], [0], [0], [1], [0, 0, 1, 1], [], []>} : vector<8x256xf32>, vector<256x192xf32>, vector<8x192xf32> -> vector<8x192xf32>
    %c0_5 = arith.constant 0 : index
    %c0_6 = arith.constant 0 : index
    %c0_7 = arith.constant 0 : index
    %5 = vector.load %arg2[%c0_5, %c0_6, %c0_7] : memref<4x16x8xf32, #tpu.memory_space<vmem>>, vector<1x16x8xf32>
    %6 = vector.shape_cast %5 : vector<1x16x8xf32> to vector<16x8xf32>
    %cst_8 = arith.constant dense<0.000000e+00> : vector<16x192xf32>
    %7 = tpu.matmul %6, %4, %cst_8 {dimension_numbers = #tpu.dot_dimension_numbers<[1], [0], [0], [1], [0, 0, 1, 1], [], []>} : vector<16x8xf32>, vector<8x192xf32>, vector<16x192xf32> -> vector<16x192xf32>
    %8 = arith.addf %1, %7 : vector<16x192xf32>
    %c1 = arith.constant 1 : index
    %c0_9 = arith.constant 0 : index
    %c0_10 = arith.constant 0 : index
    %9 = vector.load %arg3[%c1, %c0_9, %c0_10] : memref<4x256x192xf32, #tpu.memory_space<vmem>>, vector<1x256x192xf32>
    %10 = vector.shape_cast %9 : vector<1x256x192xf32> to vector<256x192xf32>
    %cst_11 = arith.constant dense<0.000000e+00> : vector<8x192xf32>
    %11 = tpu.matmul %0, %10, %cst_11 {dimension_numbers = #tpu.dot_dimension_numbers<[1], [0], [0], [1], [0, 0, 1, 1], [], []>} : vector<8x256xf32>, vector<256x192xf32>, vector<8x192xf32> -> vector<8x192xf32>
    %c1_12 = arith.constant 1 : index
    %c0_13 = arith.constant 0 : index
    %c0_14 = arith.constant 0 : index
    %12 = vector.load %arg2[%c1_12, %c0_13, %c0_14] : memref<4x16x8xf32, #tpu.memory_space<vmem>>, vector<1x16x8xf32>
    %13 = vector.shape_cast %12 : vector<1x16x8xf32> to vector<16x8xf32>
    %cst_15 = arith.constant dense<0.000000e+00> : vector<16x192xf32>
    %14 = tpu.matmul %13, %11, %cst_15 {dimension_numbers = #tpu.dot_dimension_numbers<[1], [0], [0], [1], [0, 0, 1, 1], [], []>} : vector<16x8xf32>, vector<8x192xf32>, vector<16x192xf32> -> vector<16x192xf32>
    %15 = arith.addf %8, %14 : vector<16x192xf32>
    %c2 = arith.constant 2 : index
    %c0_16 = arith.constant 0 : index
    %c0_17 = arith.constant 0 : index
    %16 = vector.load %arg3[%c2, %c0_16, %c0_17] : memref<4x256x192xf32, #tpu.memory_space<vmem>>, vector<1x256x192xf32>
    %17 = vector.shape_cast %16 : vector<1x256x192xf32> to vector<256x192xf32>
    %cst_18 = arith.constant dense<0.000000e+00> : vector<8x192xf32>
    %18 = tpu.matmul %0, %17, %cst_18 {dimension_numbers = #tpu.dot_dimension_numbers<[1], [0], [0], [1], [0, 0, 1, 1], [], []>} : vector<8x256xf32>, vector<256x192xf32>, vector<8x192xf32> -> vector<8x192xf32>
    %c2_19 = arith.constant 2 : index
    %c0_20 = arith.constant 0 : index
    %c0_21 = arith.constant 0 : index
    %19 = vector.load %arg2[%c2_19, %c0_20, %c0_21] : memref<4x16x8xf32, #tpu.memory_space<vmem>>, vector<1x16x8xf32>
    %20 = vector.shape_cast %19 : vector<1x16x8xf32> to vector<16x8xf32>
    %cst_22 = arith.constant dense<0.000000e+00> : vector<16x192xf32>
    %21 = tpu.matmul %20, %18, %cst_22 {dimension_numbers = #tpu.dot_dimension_numbers<[1], [0], [0], [1], [0, 0, 1, 1], [], []>} : vector<16x8xf32>, vector<8x192xf32>, vector<16x192xf32> -> vector<16x192xf32>
    %22 = arith.addf %15, %21 : vector<16x192xf32>
    %c3 = arith.constant 3 : index
    %c0_23 = arith.constant 0 : index
    %c0_24 = arith.constant 0 : index
    %23 = vector.load %arg3[%c3, %c0_23, %c0_24] : memref<4x256x192xf32, #tpu.memory_space<vmem>>, vector<1x256x192xf32>
    %24 = vector.shape_cast %23 : vector<1x256x192xf32> to vector<256x192xf32>
    %cst_25 = arith.constant dense<0.000000e+00> : vector<8x192xf32>
    %25 = tpu.matmul %0, %24, %cst_25 {dimension_numbers = #tpu.dot_dimension_numbers<[1], [0], [0], [1], [0, 0, 1, 1], [], []>} : vector<8x256xf32>, vector<256x192xf32>, vector<8x192xf32> -> vector<8x192xf32>
    %c3_26 = arith.constant 3 : index
    %c0_27 = arith.constant 0 : index
    %c0_28 = arith.constant 0 : index
    %26 = vector.load %arg2[%c3_26, %c0_27, %c0_28] : memref<4x16x8xf32, #tpu.memory_space<vmem>>, vector<1x16x8xf32>
    %27 = vector.shape_cast %26 : vector<1x16x8xf32> to vector<16x8xf32>
    %cst_29 = arith.constant dense<0.000000e+00> : vector<16x192xf32>
    %28 = tpu.matmul %27, %25, %cst_29 {dimension_numbers = #tpu.dot_dimension_numbers<[1], [0], [0], [1], [0, 0, 1, 1], [], []>} : vector<16x8xf32>, vector<8x192xf32>, vector<16x192xf32> -> vector<16x192xf32>
    %29 = arith.addf %22, %28 : vector<16x192xf32>
    %c0_30 = arith.constant 0 : index
    %c0_31 = arith.constant 0 : index
    %30 = vector.load %arg4[%c0_30, %c0_31] : memref<1x192xf32, #tpu.memory_space<vmem>>, vector<1x192xf32>
    %31 = vector.broadcast %30 : vector<1x192xf32> to vector<16x192xf32>
    %32 = arith.addf %29, %31 : vector<16x192xf32>
    %cst_32 = arith.constant 0.000000e+00 : f32
    %33 = vector.broadcast %cst_32 : f32 to vector<16x192xf32>
    %34 = arith.maximumf %32, %33 : vector<16x192xf32>
    %cst_33 = arith.constant 0.000000e+00 : f32
    %35 = vector.broadcast %cst_33 : f32 to vector<32x176xf32>
    %c0_34 = arith.constant 0 : index
    %c0_35 = arith.constant 0 : index
    %c0_36 = arith.constant 0 : index
    %36 = vector.load %arg6[%c0_34, %c0_35, %c0_36] : memref<4x192x176xf32, #tpu.memory_space<vmem>>, vector<1x192x176xf32>
    %37 = vector.shape_cast %36 : vector<1x192x176xf32> to vector<192x176xf32>
    %cst_37 = arith.constant dense<0.000000e+00> : vector<16x176xf32>
    %38 = tpu.matmul %34, %37, %cst_37 {dimension_numbers = #tpu.dot_dimension_numbers<[1], [0], [0], [1], [0, 0, 1, 1], [], []>} : vector<16x192xf32>, vector<192x176xf32>, vector<16x176xf32> -> vector<16x176xf32>
    %c0_38 = arith.constant 0 : index
    %c0_39 = arith.constant 0 : index
    %c0_40 = arith.constant 0 : index
    %39 = vector.load %arg5[%c0_38, %c0_39, %c0_40] : memref<4x32x16xf32, #tpu.memory_space<vmem>>, vector<1x32x16xf32>
    %40 = vector.shape_cast %39 : vector<1x32x16xf32> to vector<32x16xf32>
    %cst_41 = arith.constant dense<0.000000e+00> : vector<32x176xf32>
    %41 = tpu.matmul %40, %38, %cst_41 {dimension_numbers = #tpu.dot_dimension_numbers<[1], [0], [0], [1], [0, 0, 1, 1], [], []>} : vector<32x16xf32>, vector<16x176xf32>, vector<32x176xf32> -> vector<32x176xf32>
    %42 = arith.addf %35, %41 : vector<32x176xf32>
    %c1_42 = arith.constant 1 : index
    %c0_43 = arith.constant 0 : index
    %c0_44 = arith.constant 0 : index
    %43 = vector.load %arg6[%c1_42, %c0_43, %c0_44] : memref<4x192x176xf32, #tpu.memory_space<vmem>>, vector<1x192x176xf32>
    %44 = vector.shape_cast %43 : vector<1x192x176xf32> to vector<192x176xf32>
    %cst_45 = arith.constant dense<0.000000e+00> : vector<16x176xf32>
    %45 = tpu.matmul %34, %44, %cst_45 {dimension_numbers = #tpu.dot_dimension_numbers<[1], [0], [0], [1], [0, 0, 1, 1], [], []>} : vector<16x192xf32>, vector<192x176xf32>, vector<16x176xf32> -> vector<16x176xf32>
    %c1_46 = arith.constant 1 : index
    %c0_47 = arith.constant 0 : index
    %c0_48 = arith.constant 0 : index
    %46 = vector.load %arg5[%c1_46, %c0_47, %c0_48] : memref<4x32x16xf32, #tpu.memory_space<vmem>>, vector<1x32x16xf32>
    %47 = vector.shape_cast %46 : vector<1x32x16xf32> to vector<32x16xf32>
    %cst_49 = arith.constant dense<0.000000e+00> : vector<32x176xf32>
    %48 = tpu.matmul %47, %45, %cst_49 {dimension_numbers = #tpu.dot_dimension_numbers<[1], [0], [0], [1], [0, 0, 1, 1], [], []>} : vector<32x16xf32>, vector<16x176xf32>, vector<32x176xf32> -> vector<32x176xf32>
    %49 = arith.addf %42, %48 : vector<32x176xf32>
    %c2_50 = arith.constant 2 : index
    %c0_51 = arith.constant 0 : index
    %c0_52 = arith.constant 0 : index
    %50 = vector.load %arg6[%c2_50, %c0_51, %c0_52] : memref<4x192x176xf32, #tpu.memory_space<vmem>>, vector<1x192x176xf32>
    %51 = vector.shape_cast %50 : vector<1x192x176xf32> to vector<192x176xf32>
    %cst_53 = arith.constant dense<0.000000e+00> : vector<16x176xf32>
    %52 = tpu.matmul %34, %51, %cst_53 {dimension_numbers = #tpu.dot_dimension_numbers<[1], [0], [0], [1], [0, 0, 1, 1], [], []>} : vector<16x192xf32>, vector<192x176xf32>, vector<16x176xf32> -> vector<16x176xf32>
    %c2_54 = arith.constant 2 : index
    %c0_55 = arith.constant 0 : index
    %c0_56 = arith.constant 0 : index
    %53 = vector.load %arg5[%c2_54, %c0_55, %c0_56] : memref<4x32x16xf32, #tpu.memory_space<vmem>>, vector<1x32x16xf32>
    %54 = vector.shape_cast %53 : vector<1x32x16xf32> to vector<32x16xf32>
    %cst_57 = arith.constant dense<0.000000e+00> : vector<32x176xf32>
    %55 = tpu.matmul %54, %52, %cst_57 {dimension_numbers = #tpu.dot_dimension_numbers<[1], [0], [0], [1], [0, 0, 1, 1], [], []>} : vector<32x16xf32>, vector<16x176xf32>, vector<32x176xf32> -> vector<32x176xf32>
    %56 = arith.addf %49, %55 : vector<32x176xf32>
    %c3_58 = arith.constant 3 : index
    %c0_59 = arith.constant 0 : index
    %c0_60 = arith.constant 0 : index
    %57 = vector.load %arg6[%c3_58, %c0_59, %c0_60] : memref<4x192x176xf32, #tpu.memory_space<vmem>>, vector<1x192x176xf32>
    %58 = vector.shape_cast %57 : vector<1x192x176xf32> to vector<192x176xf32>
    %cst_61 = arith.constant dense<0.000000e+00> : vector<16x176xf32>
    %59 = tpu.matmul %34, %58, %cst_61 {dimension_numbers = #tpu.dot_dimension_numbers<[1], [0], [0], [1], [0, 0, 1, 1], [], []>} : vector<16x192xf32>, vector<192x176xf32>, vector<16x176xf32> -> vector<16x176xf32>
    %c3_62 = arith.constant 3 : index
    %c0_63 = arith.constant 0 : index
    %c0_64 = arith.constant 0 : index
    %60 = vector.load %arg5[%c3_62, %c0_63, %c0_64] : memref<4x32x16xf32, #tpu.memory_space<vmem>>, vector<1x32x16xf32>
    %61 = vector.shape_cast %60 : vector<1x32x16xf32> to vector<32x16xf32>
    %cst_65 = arith.constant dense<0.000000e+00> : vector<32x176xf32>
    %62 = tpu.matmul %61, %59, %cst_65 {dimension_numbers = #tpu.dot_dimension_numbers<[1], [0], [0], [1], [0, 0, 1, 1], [], []>} : vector<32x16xf32>, vector<16x176xf32>, vector<32x176xf32> -> vector<32x176xf32>
    %63 = arith.addf %56, %62 : vector<32x176xf32>
    %c0_66 = arith.constant 0 : index
    %c0_67 = arith.constant 0 : index
    %64 = vector.load %arg7[%c0_66, %c0_67] : memref<1x176xf32, #tpu.memory_space<vmem>>, vector<1x176xf32>
    %65 = vector.broadcast %64 : vector<1x176xf32> to vector<32x176xf32>
    %66 = arith.addf %63, %65 : vector<32x176xf32>
    %cst_68 = arith.constant 0.000000e+00 : f32
    %67 = vector.broadcast %cst_68 : f32 to vector<32x176xf32>
    %68 = arith.maximumf %66, %67 : vector<32x176xf32>
    %cst_69 = arith.constant 0.000000e+00 : f32
    %69 = vector.broadcast %cst_69 : f32 to vector<64x128xf32>
    %c0_70 = arith.constant 0 : index
    %c0_71 = arith.constant 0 : index
    %c0_72 = arith.constant 0 : index
    %70 = vector.load %arg9[%c0_70, %c0_71, %c0_72] : memref<4x176x128xf32, #tpu.memory_space<vmem>>, vector<1x176x128xf32>
    %71 = vector.shape_cast %70 : vector<1x176x128xf32> to vector<176x128xf32>
    %cst_73 = arith.constant dense<0.000000e+00> : vector<32x128xf32>
    %72 = tpu.matmul %68, %71, %cst_73 {dimension_numbers = #tpu.dot_dimension_numbers<[1], [0], [0], [1], [0, 0, 1, 1], [], []>} : vector<32x176xf32>, vector<176x128xf32>, vector<32x128xf32> -> vector<32x128xf32>
    %c0_74 = arith.constant 0 : index
    %c0_75 = arith.constant 0 : index
    %c0_76 = arith.constant 0 : index
    %73 = vector.load %arg8[%c0_74, %c0_75, %c0_76] : memref<4x64x32xf32, #tpu.memory_space<vmem>>, vector<1x64x32xf32>
    %74 = vector.shape_cast %73 : vector<1x64x32xf32> to vector<64x32xf32>
    %cst_77 = arith.constant dense<0.000000e+00> : vector<64x128xf32>
    %75 = tpu.matmul %74, %72, %cst_77 {dimension_numbers = #tpu.dot_dimension_numbers<[1], [0], [0], [1], [0, 0, 1, 1], [], []>} : vector<64x32xf32>, vector<32x128xf32>, vector<64x128xf32> -> vector<64x128xf32>
    %76 = arith.addf %69, %75 : vector<64x128xf32>
    %c1_78 = arith.constant 1 : index
    %c0_79 = arith.constant 0 : index
    %c0_80 = arith.constant 0 : index
    %77 = vector.load %arg9[%c1_78, %c0_79, %c0_80] : memref<4x176x128xf32, #tpu.memory_space<vmem>>, vector<1x176x128xf32>
    %78 = vector.shape_cast %77 : vector<1x176x128xf32> to vector<176x128xf32>
    %cst_81 = arith.constant dense<0.000000e+00> : vector<32x128xf32>
    %79 = tpu.matmul %68, %78, %cst_81 {dimension_numbers = #tpu.dot_dimension_numbers<[1], [0], [0], [1], [0, 0, 1, 1], [], []>} : vector<32x176xf32>, vector<176x128xf32>, vector<32x128xf32> -> vector<32x128xf32>
    %c1_82 = arith.constant 1 : index
    %c0_83 = arith.constant 0 : index
    %c0_84 = arith.constant 0 : index
    %80 = vector.load %arg8[%c1_82, %c0_83, %c0_84] : memref<4x64x32xf32, #tpu.memory_space<vmem>>, vector<1x64x32xf32>
    %81 = vector.shape_cast %80 : vector<1x64x32xf32> to vector<64x32xf32>
    %cst_85 = arith.constant dense<0.000000e+00> : vector<64x128xf32>
    %82 = tpu.matmul %81, %79, %cst_85 {dimension_numbers = #tpu.dot_dimension_numbers<[1], [0], [0], [1], [0, 0, 1, 1], [], []>} : vector<64x32xf32>, vector<32x128xf32>, vector<64x128xf32> -> vector<64x128xf32>
    %83 = arith.addf %76, %82 : vector<64x128xf32>
    %c2_86 = arith.constant 2 : index
    %c0_87 = arith.constant 0 : index
    %c0_88 = arith.constant 0 : index
    %84 = vector.load %arg9[%c2_86, %c0_87, %c0_88] : memref<4x176x128xf32, #tpu.memory_space<vmem>>, vector<1x176x128xf32>
    %85 = vector.shape_cast %84 : vector<1x176x128xf32> to vector<176x128xf32>
    %cst_89 = arith.constant dense<0.000000e+00> : vector<32x128xf32>
    %86 = tpu.matmul %68, %85, %cst_89 {dimension_numbers = #tpu.dot_dimension_numbers<[1], [0], [0], [1], [0, 0, 1, 1], [], []>} : vector<32x176xf32>, vector<176x128xf32>, vector<32x128xf32> -> vector<32x128xf32>
    %c2_90 = arith.constant 2 : index
    %c0_91 = arith.constant 0 : index
    %c0_92 = arith.constant 0 : index
    %87 = vector.load %arg8[%c2_90, %c0_91, %c0_92] : memref<4x64x32xf32, #tpu.memory_space<vmem>>, vector<1x64x32xf32>
    %88 = vector.shape_cast %87 : vector<1x64x32xf32> to vector<64x32xf32>
    %cst_93 = arith.constant dense<0.000000e+00> : vector<64x128xf32>
    %89 = tpu.matmul %88, %86, %cst_93 {dimension_numbers = #tpu.dot_dimension_numbers<[1], [0], [0], [1], [0, 0, 1, 1], [], []>} : vector<64x32xf32>, vector<32x128xf32>, vector<64x128xf32> -> vector<64x128xf32>
    %90 = arith.addf %83, %89 : vector<64x128xf32>
    %c3_94 = arith.constant 3 : index
    %c0_95 = arith.constant 0 : index
    %c0_96 = arith.constant 0 : index
    %91 = vector.load %arg9[%c3_94, %c0_95, %c0_96] : memref<4x176x128xf32, #tpu.memory_space<vmem>>, vector<1x176x128xf32>
    %92 = vector.shape_cast %91 : vector<1x176x128xf32> to vector<176x128xf32>
    %cst_97 = arith.constant dense<0.000000e+00> : vector<32x128xf32>
    %93 = tpu.matmul %68, %92, %cst_97 {dimension_numbers = #tpu.dot_dimension_numbers<[1], [0], [0], [1], [0, 0, 1, 1], [], []>} : vector<32x176xf32>, vector<176x128xf32>, vector<32x128xf32> -> vector<32x128xf32>
    %c3_98 = arith.constant 3 : index
    %c0_99 = arith.constant 0 : index
    %c0_100 = arith.constant 0 : index
    %94 = vector.load %arg8[%c3_98, %c0_99, %c0_100] : memref<4x64x32xf32, #tpu.memory_space<vmem>>, vector<1x64x32xf32>
    %95 = vector.shape_cast %94 : vector<1x64x32xf32> to vector<64x32xf32>
    %cst_101 = arith.constant dense<0.000000e+00> : vector<64x128xf32>
    %96 = tpu.matmul %95, %93, %cst_101 {dimension_numbers = #tpu.dot_dimension_numbers<[1], [0], [0], [1], [0, 0, 1, 1], [], []>} : vector<64x32xf32>, vector<32x128xf32>, vector<64x128xf32> -> vector<64x128xf32>
    %97 = arith.addf %90, %96 : vector<64x128xf32>
    %c0_102 = arith.constant 0 : index
    %c0_103 = arith.constant 0 : index
    %98 = vector.load %arg10[%c0_102, %c0_103] : memref<1x128xf32, #tpu.memory_space<vmem>>, vector<1x128xf32>
    %99 = vector.broadcast %98 : vector<1x128xf32> to vector<64x128xf32>
    %100 = arith.addf %97, %99 : vector<64x128xf32>
    %101 = math.tanh %100 : vector<64x128xf32>
    %c0_104 = arith.constant 0 : index
    %c0_105 = arith.constant 0 : index
    %102 = vector.load %arg11[%c0_104, %c0_105] : memref<64x128xf32, #tpu.memory_space<vmem>>, vector<64x128xf32>
    tpu.vector_store %arg11[%c0_104, %c0_105], %101 {strides = array<i32>} : memref<64x128xf32, #tpu.memory_space<vmem>>, vector<64x128xf32>,
    return
  }
  func.func @transform_0(%arg0: i32) -> (i32, i32) {
    %c0_i32 = arith.constant 0 : i32
    %c0_i32_0 = arith.constant 0 : i32
    return %arg0, %c0_i32 : i32, i32
  }
  func.func @transform_1(%arg0: i32) -> (i32, i32, i32) {
    %c0_i32 = arith.constant 0 : i32
    %c0_i32_0 = arith.constant 0 : i32
    %c0_i32_1 = arith.constant 0 : i32
    %c0_i32_2 = arith.constant 0 : i32
    return %c0_i32, %c0_i32_0, %c0_i32_1 : i32, i32, i32
  }
  func.func @transform_2(%arg0: i32) -> (i32, i32, i32) {
    %c0_i32 = arith.constant 0 : i32
    %c0_i32_0 = arith.constant 0 : i32
    %c0_i32_1 = arith.constant 0 : i32
    %c0_i32_2 = arith.constant 0 : i32
    return %c0_i32, %c0_i32_0, %c0_i32_1 : i32, i32, i32
  }
  func.func @transform_3(%arg0: i32) -> (i32, i32) {
    %c0_i32 = arith.constant 0 : i32
    %c0_i32_0 = arith.constant 0 : i32
    %c0_i32_1 = arith.constant 0 : i32
    return %c0_i32, %c0_i32_0 : i32, i32
  }
  func.func @transform_4(%arg0: i32) -> (i32, i32, i32) {
    %c0_i32 = arith.constant 0 : i32
    %c0_i32_0 = arith.constant 0 : i32
    %c0_i32_1 = arith.constant 0 : i32
    %c0_i32_2 = arith.constant 0 : i32
    return %c0_i32, %c0_i32_0, %c0_i32_1 : i32, i32, i32
  }
  func.func @transform_5(%arg0: i32) -> (i32, i32, i32) {
    %c0_i32 = arith.constant 0 : i32
    %c0_i32_0 = arith.constant 0 : i32
    %c0_i32_1 = arith.constant 0 : i32
    %c0_i32_2 = arith.constant 0 : i32
    return %c0_i32, %c0_i32_0, %c0_i32_1 : i32, i32, i32
  }
  func.func @transform_6(%arg0: i32) -> (i32, i32) {
    %c0_i32 = arith.constant 0 : i32
    %c0_i32_0 = arith.constant 0 : i32
    %c0_i32_1 = arith.constant 0 : i32
    return %c0_i32, %c0_i32_0 : i32, i32
  }
  func.func @transform_7(%arg0: i32) -> (i32, i32, i32) {
    %c0_i32 = arith.constant 0 : i32
    %c0_i32_0 = arith.constant 0 : i32
    %c0_i32_1 = arith.constant 0 : i32
    %c0_i32_2 = arith.constant 0 : i32
    return %c0_i32, %c0_i32_0, %c0_i32_1 : i32, i32, i32
  }
  func.func @transform_8(%arg0: i32) -> (i32, i32, i32) {
    %c0_i32 = arith.constant 0 : i32
    %c0_i32_0 = arith.constant 0 : i32
    %c0_i32_1 = arith.constant 0 : i32
    %c0_i32_2 = arith.constant 0 : i32
    return %c0_i32, %c0_i32_0, %c0_i32_1 : i32, i32, i32
  }
  func.func @transform_9(%arg0: i32) -> (i32, i32) {
    %c0_i32 = arith.constant 0 : i32
    %c0_i32_0 = arith.constant 0 : i32
    %c0_i32_1 = arith.constant 0 : i32
    return %c0_i32, %c0_i32_0 : i32, i32
  }
  func.func @transform_10(%arg0: i32) -> (i32, i32) {
    %c0_i32 = arith.constant 0 : i32
    %c0_i32_0 = arith.constant 0 : i32
    return %arg0, %c0_i32 : i32, i32
  }
}

</mosaic_0001>

<bundles_post_ra>
// kernel: generator_forward.2
= control target key start
LH: loop header
LB: loop body
LE: loop exit
PB: predicated region body
PF: predicated region fallthrough
CT: control target
= control target key end

     0   :  { %s4124_s18 = smov 0   ;;  %s4126_s19 = smov 0   ;;  %s5409_s0 = inlined_call_operand.vmem [shape: f32[2,128], index: 0, kind: input, shape index: {}]   ;;  %s5410_s1 = inlined_call_operand.vmem [shape: f32[128,1024], index: 1, kind: input, shape index: {}]   ;;  %s5411_s2 = inlined_call_operand.vmem [shape: f32[1,1024], index: 2, kind: input, shape index: {}]   ;;  %s5412_s3 = inlined_call_operand.vmem [shape: bf16[1024,2048], index: 3, kind: input, shape index: {}]   ;;  %s5413_s4 = inlined_call_operand.vmem [shape: f32[1,2048], index: 4, kind: input, shape index: {}]   ;;  %s5414_s5 = inlined_call_operand.vmem [shape: f32[2,2048], index: 5, kind: output, shape index: {}]  }
   0x1   :  { %s4128_s20 = smov 0  }
   0x2 LB: > { %s3231_s21 = sadd.s32 4294967295, %s4090_s20   ;;  %s4141_s22 = sadd.s32 1, %s4090_s20   ;;  %s4090_s20 = sphi %s4128_s20, %s5417_s20   ;;  %s4086_s19 = sphi %s4126_s19, %s5416_s19   ;;  %s4082_s18 = sphi %s4124_s18, %s5415_s18  }
   0x3   : > { %s82_s23 = ssub.s32 %s4090_s20, %s4141_s22  ;;  %s85_s24 = sadd.s32 1, %s4086_s19 }
   0x4   : > { %p83_p0 = scmp.eq.s32.totalorder %s82_s23, 0  ;;  %p92_p1 = scmp.ne.s32.totalorder %s4086_s19, %s4082_s18 }
   0x5   : > { %p93_p2 = scmp.eq.s32.totalorder %s4090_s20, 0  ;;  %p3234_p4 = scmp.ge.s32.totalorder %s4090_s20, 4 }
   0x6   : > { %s4150_s25 = scalar_select %p83_p0, %s4086_s19, %s85_s24  }
   0x7   : > { %p94_p3 = por %p93_p2, %p92_p1  ;;  %179 = sbr.rel (%p3234_p4) target bundleno = 146 (0x92), region = 28 }
   0xe   : > { %182 = sbr.rel (!%p94_p3) target bundleno = 146 (0x92), region = 32  ;;  %s184_s26 = sand.u32 (%p94_p3), 1, %s4086_s19  }
   0xf   : > { %s3501_s27 = sshll.u32 (%p94_p3), %s4090_s20, 4  ;;  %s3235_s28 = sshll.u32 (%p94_p3), %s184_s26, 11 }
  0x10   : > { %s4158_s6 = scalar_lea.vmem (%p94_p3), %s5412_s3, %s3501_s27  ;;  %s4163_s7 = scalar_lea.vmem (%p94_p3), [#allocation2], %s3235_s28 }
  0x11   : > { %v202_v0 = vld [vmem:[%s4158_s6] sm:$0xff] (%p94_p3)  ;;  %v204_v1 = vld [vmem:[%s4158_s6 + $0x8] sm:$0xff] (%p94_p3) }
  0x12   : > { %v206_v2 = vld [vmem:[%s4158_s6 + $0x40] sm:$0xff] (%p94_p3)  ;;  %203 = vst [vmem:[%s4163_s7] sm:$0xff] (%p94_p3), %v202_v0  ;;  %205 = vst [vmem:[%s4163_s7 + $0x8] sm:$0xff] (%p94_p3), %v204_v1  ;;  %v208_v3 = vld [vmem:[%s4158_s6 + $0x48] sm:$0xff] (%p94_p3) }
  0x13   : > { %207 = vst [vmem:[%s4163_s7 + $0x10] sm:$0xff] (%p94_p3), %v206_v2  ;;  %v210_v4 = vld [vmem:[%s4158_s6 + $0x80] sm:$0xff] (%p94_p3)  ;;  %v212_v5 = vld [vmem:[%s4158_s6 + $0x88] sm:$0xff] (%p94_p3)  ;;  %209 = vst [vmem:[%s4163_s7 + $0x18] sm:$0xff] (%p94_p3), %v208_v3 }
  0x14   : > { %211 = vst [vmem:[%s4163_s7 + $0x20] sm:$0xff] (%p94_p3), %v210_v4  ;;  %213 = vst [vmem:[%s4163_s7 + $0x28] sm:$0xff] (%p94_p3), %v212_v5  ;;  %v214_v6 = vld [vmem:[%s4158_s6 + $0xc0] sm:$0xff] (%p94_p3)  ;;  %v216_v7 = vld [vmem:[%s4158_s6 + $0xc8] sm:$0xff] (%p94_p3) }
  0x15   : > { %v218_v8 = vld [vmem:[%s4158_s6 + $0x100] sm:$0xff]  ;;  %215 = vst [vmem:[%s4163_s7 + $0x30] sm:$0xff] %v214_v6  ;;  %217 = vst [vmem:[%s4163_s7 + $0x38] sm:$0xff] %v216_v7  ;;  %v220_v9 = vld [vmem:[%s4158_s6 + $0x108] sm:$0xff] }
  0x16   : > { %219 = vst [vmem:[%s4163_s7 + $0x40] sm:$0xff] %v218_v8  ;;  %v222_v10 = vld [vmem:[%s4158_s6 + $0x140] sm:$0xff]  ;;  %v224_v11 = vld [vmem:[%s4158_s6 + $0x148] sm:$0xff]  ;;  %221 = vst [vmem:[%s4163_s7 + $0x48] sm:$0xff] %v220_v9 }
  0x17   : > { %223 = vst [vmem:[%s4163_s7 + $0x50] sm:$0xff] %v222_v10  ;;  %225 = vst [vmem:[%s4163_s7 + $0x58] sm:$0xff] %v224_v11  ;;  %v226_v12 = vld [vmem:[%s4158_s6 + $0x180] sm:$0xff]  ;;  %v228_v13 = vld [vmem:[%s4158_s6 + $0x188] sm:$0xff] }
  0x18   : > { %v230_v14 = vld [vmem:[%s4158_s6 + $0x1c0] sm:$0xff]  ;;  %227 = vst [vmem:[%s4163_s7 + $0x60] sm:$0xff] %v226_v12  ;;  %229 = vst [vmem:[%s4163_s7 + $0x68] sm:$0xff] %v228_v13  ;;  %v232_v15 = vld [vmem:[%s4158_s6 + $0x1c8] sm:$0xff] }
  0x19   : > { %231 = vst [vmem:[%s4163_s7 + $0x70] sm:$0xff] %v230_v14  ;;  %v234_v16 = vld [vmem:[%s4158_s6 + $0x200] sm:$0xff]  ;;  %v236_v17 = vld [vmem:[%s4158_s6 + $0x208] sm:$0xff]  ;;  %233 = vst [vmem:[%s4163_s7 + $0x78] sm:$0xff] %v232_v15 }
  0x1a   : > { %235 = vst [vmem:[%s4163_s7 + $0x80] sm:$0xff] %v234_v16  ;;  %237 = vst [vmem:[%s4163_s7 + $0x88] sm:$0xff] %v236_v17  ;;  %v238_v18 = vld [vmem:[%s4158_s6 + $0x240] sm:$0xff]  ;;  %v240_v19 = vld [vmem:[%s4158_s6 + $0x248] sm:$0xff] }
  0x1b   : > { %v242_v20 = vld [vmem:[%s4158_s6 + $0x280] sm:$0xff]  ;;  %239 = vst [vmem:[%s4163_s7 + $0x90] sm:$0xff] %v238_v18  ;;  %241 = vst [vmem:[%s4163_s7 + $0x98] sm:$0xff] %v240_v19  ;;  %v244_v21 = vld [vmem:[%s4158_s6 + $0x288] sm:$0xff] }
  0x1c   : > { %243 = vst [vmem:[%s4163_s7 + $0xa0] sm:$0xff] %v242_v20  ;;  %v246_v22 = vld [vmem:[%s4158_s6 + $0x2c0] sm:$0xff]  ;;  %v248_v23 = vld [vmem:[%s4158_s6 + $0x2c8] sm:$0xff]  ;;  %245 = vst [vmem:[%s4163_s7 + $0xa8] sm:$0xff] %v244_v21 }
  0x1d   : > { %247 = vst [vmem:[%s4163_s7 + $0xb0] sm:$0xff] %v246_v22  ;;  %249 = vst [vmem:[%s4163_s7 + $0xb8] sm:$0xff] %v248_v23  ;;  %v250_v24 = vld [vmem:[%s4158_s6 + $0x300] sm:$0xff]  ;;  %v252_v25 = vld [vmem:[%s4158_s6 + $0x308] sm:$0xff] }
  0x1e   : > { %v254_v26 = vld [vmem:[%s4158_s6 + $0x340] sm:$0xff]  ;;  %251 = vst [vmem:[%s4163_s7 + $0xc0] sm:$0xff] %v250_v24  ;;  %253 = vst [vmem:[%s4163_s7 + $0xc8] sm:$0xff] %v252_v25  ;;  %v256_v27 = vld [vmem:[%s4158_s6 + $0x348] sm:$0xff] }
  0x1f   : > { %255 = vst [vmem:[%s4163_s7 + $0xd0] sm:$0xff] %v254_v26  ;;  %v258_v28 = vld [vmem:[%s4158_s6 + $0x380] sm:$0xff]  ;;  %v260_v29 = vld [vmem:[%s4158_s6 + $0x388] sm:$0xff]  ;;  %257 = vst [vmem:[%s4163_s7 + $0xd8] sm:$0xff] %v256_v27 }
  0x20   : > { %259 = vst [vmem:[%s4163_s7 + $0xe0] sm:$0xff] %v258_v28  ;;  %261 = vst [vmem:[%s4163_s7 + $0xe8] sm:$0xff] %v260_v29  ;;  %v262_v30 = vld [vmem:[%s4158_s6 + $0x3c0] sm:$0xff]  ;;  %v264_v31 = vld [vmem:[%s4158_s6 + $0x3c8] sm:$0xff] }
  0x21   : > { %v266_v32 = vld [vmem:[%s4158_s6 + $0x400] sm:$0xff]  ;;  %263 = vst [vmem:[%s4163_s7 + $0xf0] sm:$0xff] %v262_v30  ;;  %265 = vst [vmem:[%s4163_s7 + $0xf8] sm:$0xff] %v264_v31  ;;  %v268_v33 = vld [vmem:[%s4158_s6 + $0x408] sm:$0xff] }
  0x22   : > { %267 = vst [vmem:[%s4163_s7 + $0x100] sm:$0xff] %v266_v32  ;;  %v270_v34 = vld [vmem:[%s4158_s6 + $0x440] sm:$0xff]  ;;  %v272_v35 = vld [vmem:[%s4158_s6 + $0x448] sm:$0xff]  ;;  %269 = vst [vmem:[%s4163_s7 + $0x108] sm:$0xff] %v268_v33 }
  0x23   : > { %271 = vst [vmem:[%s4163_s7 + $0x110] sm:$0xff] %v270_v34  ;;  %273 = vst [vmem:[%s4163_s7 + $0x118] sm:$0xff] %v272_v35  ;;  %v274_v36 = vld [vmem:[%s4158_s6 + $0x480] sm:$0xff]  ;;  %v276_v37 = vld [vmem:[%s4158_s6 + $0x488] sm:$0xff] }
  0x24   : > { %v278_v38 = vld [vmem:[%s4158_s6 + $0x4c0] sm:$0xff]  ;;  %275 = vst [vmem:[%s4163_s7 + $0x120] sm:$0xff] %v274_v36  ;;  %277 = vst [vmem:[%s4163_s7 + $0x128] sm:$0xff] %v276_v37  ;;  %v280_v39 = vld [vmem:[%s4158_s6 + $0x4c8] sm:$0xff] }
  0x25   : > { %279 = vst [vmem:[%s4163_s7 + $0x130] sm:$0xff] %v278_v38  ;;  %v282_v40 = vld [vmem:[%s4158_s6 + $0x500] sm:$0xff]  ;;  %v284_v41 = vld [vmem:[%s4158_s6 + $0x508] sm:$0xff]  ;;  %281 = vst [vmem:[%s4163_s7 + $0x138] sm:$0xff] %v280_v39 }
  0x26   : > { %283 = vst [vmem:[%s4163_s7 + $0x140] sm:$0xff] %v282_v40  ;;  %285 = vst [vmem:[%s4163_s7 + $0x148] sm:$0xff] %v284_v41  ;;  %v286_v42 = vld [vmem:[%s4158_s6 + $0x540] sm:$0xff]  ;;  %v288_v43 = vld [vmem:[%s4158_s6 + $0x548] sm:$0xff] }
  0x27   : > { %v290_v44 = vld [vmem:[%s4158_s6 + $0x580] sm:$0xff]  ;;  %287 = vst [vmem:[%s4163_s7 + $0x150] sm:$0xff] %v286_v42  ;;  %289 = vst [vmem:[%s4163_s7 + $0x158] sm:$0xff] %v288_v43  ;;  %v292_v45 = vld [vmem:[%s4158_s6 + $0x588] sm:$0xff] }
  0x28   : > { %291 = vst [vmem:[%s4163_s7 + $0x160] sm:$0xff] %v290_v44  ;;  %v294_v46 = vld [vmem:[%s4158_s6 + $0x5c0] sm:$0xff]  ;;  %v296_v47 = vld [vmem:[%s4158_s6 + $0x5c8] sm:$0xff]  ;;  %293 = vst [vmem:[%s4163_s7 + $0x168] sm:$0xff] %v292_v45 }
  0x29   : > { %295 = vst [vmem:[%s4163_s7 + $0x170] sm:$0xff] %v294_v46  ;;  %297 = vst [vmem:[%s4163_s7 + $0x178] sm:$0xff] %v296_v47  ;;  %v298_v48 = vld [vmem:[%s4158_s6 + $0x600] sm:$0xff]  ;;  %v300_v49 = vld [vmem:[%s4158_s6 + $0x608] sm:$0xff] }
  0x2a   : > { %v302_v50 = vld [vmem:[%s4158_s6 + $0x640] sm:$0xff]  ;;  %299 = vst [vmem:[%s4163_s7 + $0x180] sm:$0xff] %v298_v48  ;;  %301 = vst [vmem:[%s4163_s7 + $0x188] sm:$0xff] %v300_v49  ;;  %v304_v51 = vld [vmem:[%s4158_s6 + $0x648] sm:$0xff] }
  0x2b   : > { %303 = vst [vmem:[%s4163_s7 + $0x190] sm:$0xff] %v302_v50  ;;  %v306_v52 = vld [vmem:[%s4158_s6 + $0x680] sm:$0xff]  ;;  %v308_v53 = vld [vmem:[%s4158_s6 + $0x688] sm:$0xff]  ;;  %305 = vst [vmem:[%s4163_s7 + $0x198] sm:$0xff] %v304_v51 }
  0x2c   : > { %307 = vst [vmem:[%s4163_s7 + $0x1a0] sm:$0xff] %v306_v52  ;;  %309 = vst [vmem:[%s4163_s7 + $0x1a8] sm:$0xff] %v308_v53  ;;  %v310_v54 = vld [vmem:[%s4158_s6 + $0x6c0] sm:$0xff]  ;;  %v312_v55 = vld [vmem:[%s4158_s6 + $0x6c8] sm:$0xff] }
  0x2d   : > { %v314_v56 = vld [vmem:[%s4158_s6 + $0x700] sm:$0xff]  ;;  %311 = vst [vmem:[%s4163_s7 + $0x1b0] sm:$0xff] %v310_v54  ;;  %313 = vst [vmem:[%s4163_s7 + $0x1b8] sm:$0xff] %v312_v55  ;;  %v316_v57 = vld [vmem:[%s4158_s6 + $0x708] sm:$0xff] }
  0x2e   : > { %315 = vst [vmem:[%s4163_s7 + $0x1c0] sm:$0xff] %v314_v56  ;;  %v318_v58 = vld [vmem:[%s4158_s6 + $0x740] sm:$0xff]  ;;  %v320_v59 = vld [vmem:[%s4158_s6 + $0x748] sm:$0xff]  ;;  %317 = vst [vmem:[%s4163_s7 + $0x1c8] sm:$0xff] %v316_v57 }
  0x2f   : > { %319 = vst [vmem:[%s4163_s7 + $0x1d0] sm:$0xff] %v318_v58  ;;  %321 = vst [vmem:[%s4163_s7 + $0x1d8] sm:$0xff] %v320_v59  ;;  %v322_v60 = vld [vmem:[%s4158_s6 + $0x780] sm:$0xff]  ;;  %v324_v61 = vld [vmem:[%s4158_s6 + $0x788] sm:$0xff] }
  0x30   : > { %v326_v62 = vld [vmem:[%s4158_s6 + $0x7c0] sm:$0xff]  ;;  %323 = vst [vmem:[%s4163_s7 + $0x1e0] sm:$0xff] %v322_v60  ;;  %325 = vst [vmem:[%s4163_s7 + $0x1e8] sm:$0xff] %v324_v61  ;;  %v328_v63 = vld [vmem:[%s4158_s6 + $0x7c8] sm:$0xff] }
  0x31   : > { %327 = vst [vmem:[%s4163_s7 + $0x1f0] sm:$0xff] %v326_v62  ;;  %v330_v0 = vld [vmem:[%s4158_s6 + $0x800] sm:$0xff]  ;;  %v332_v1 = vld [vmem:[%s4158_s6 + $0x808] sm:$0xff]  ;;  %329 = vst [vmem:[%s4163_s7 + $0x1f8] sm:$0xff] %v328_v63 }
  0x32   : > { %331 = vst [vmem:[%s4163_s7 + $0x200] sm:$0xff] %v330_v0  ;;  %333 = vst [vmem:[%s4163_s7 + $0x208] sm:$0xff] %v332_v1  ;;  %v334_v2 = vld [vmem:[%s4158_s6 + $0x840] sm:$0xff]  ;;  %v336_v3 = vld [vmem:[%s4158_s6 + $0x848] sm:$0xff] }
  0x33   : > { %v338_v4 = vld [vmem:[%s4158_s6 + $0x880] sm:$0xff]  ;;  %335 = vst [vmem:[%s4163_s7 + $0x210] sm:$0xff] %v334_v2  ;;  %337 = vst [vmem:[%s4163_s7 + $0x218] sm:$0xff] %v336_v3  ;;  %v340_v5 = vld [vmem:[%s4158_s6 + $0x888] sm:$0xff] }
  0x34   : > { %339 = vst [vmem:[%s4163_s7 + $0x220] sm:$0xff] %v338_v4  ;;  %v342_v6 = vld [vmem:[%s4158_s6 + $0x8c0] sm:$0xff]  ;;  %v344_v7 = vld [vmem:[%s4158_s6 + $0x8c8] sm:$0xff]  ;;  %341 = vst [vmem:[%s4163_s7 + $0x228] sm:$0xff] %v340_v5 }
  0x35   : > { %343 = vst [vmem:[%s4163_s7 + $0x230] sm:$0xff] %v342_v6  ;;  %345 = vst [vmem:[%s4163_s7 + $0x238] sm:$0xff] %v344_v7  ;;  %v346_v8 = vld [vmem:[%s4158_s6 + $0x900] sm:$0xff]  ;;  %v348_v9 = vld [vmem:[%s4158_s6 + $0x908] sm:$0xff] }
  0x36   : > { %v350_v10 = vld [vmem:[%s4158_s6 + $0x940] sm:$0xff]  ;;  %347 = vst [vmem:[%s4163_s7 + $0x240] sm:$0xff] %v346_v8  ;;  %349 = vst [vmem:[%s4163_s7 + $0x248] sm:$0xff] %v348_v9  ;;  %v352_v11 = vld [vmem:[%s4158_s6 + $0x948] sm:$0xff] }
  0x37   : > { %351 = vst [vmem:[%s4163_s7 + $0x250] sm:$0xff] %v350_v10  ;;  %v354_v12 = vld [vmem:[%s4158_s6 + $0x980] sm:$0xff]  ;;  %v356_v13 = vld [vmem:[%s4158_s6 + $0x988] sm:$0xff]  ;;  %353 = vst [vmem:[%s4163_s7 + $0x258] sm:$0xff] %v352_v11 }
  0x38   : > { %355 = vst [vmem:[%s4163_s7 + $0x260] sm:$0xff] %v354_v12  ;;  %357 = vst [vmem:[%s4163_s7 + $0x268] sm:$0xff] %v356_v13  ;;  %v358_v14 = vld [vmem:[%s4158_s6 + $0x9c0] sm:$0xff]  ;;  %v360_v15 = vld [vmem:[%s4158_s6 + $0x9c8] sm:$0xff] }
  0x39   : > { %v362_v16 = vld [vmem:[%s4158_s6 + $0xa00] sm:$0xff]  ;;  %359 = vst [vmem:[%s4163_s7 + $0x270] sm:$0xff] %v358_v14  ;;  %361 = vst [vmem:[%s4163_s7 + $0x278] sm:$0xff] %v360_v15  ;;  %v364_v17 = vld [vmem:[%s4158_s6 + $0xa08] sm:$0xff] }
  0x3a   : > { %363 = vst [vmem:[%s4163_s7 + $0x280] sm:$0xff] %v362_v16  ;;  %v366_v18 = vld [vmem:[%s4158_s6 + $0xa40] sm:$0xff]  ;;  %v368_v19 = vld [vmem:[%s4158_s6 + $0xa48] sm:$0xff]  ;;  %365 = vst [vmem:[%s4163_s7 + $0x288] sm:$0xff] %v364_v17 }
  0x3b   : > { %367 = vst [vmem:[%s4163_s7 + $0x290] sm:$0xff] %v366_v18  ;;  %369 = vst [vmem:[%s4163_s7 + $0x298] sm:$0xff] %v368_v19  ;;  %v370_v20 = vld [vmem:[%s4158_s6 + $0xa80] sm:$0xff]  ;;  %v372_v21 = vld [vmem:[%s4158_s6 + $0xa88] sm:$0xff] }
  0x3c   : > { %v374_v22 = vld [vmem:[%s4158_s6 + $0xac0] sm:$0xff]  ;;  %371 = vst [vmem:[%s4163_s7 + $0x2a0] sm:$0xff] %v370_v20  ;;  %373 = vst [vmem:[%s4163_s7 + $0x2a8] sm:$0xff] %v372_v21  ;;  %v376_v23 = vld [vmem:[%s4158_s6 + $0xac8] sm:$0xff] }
  0x3d   : > { %375 = vst [vmem:[%s4163_s7 + $0x2b0] sm:$0xff] %v374_v22  ;;  %v378_v24 = vld [vmem:[%s4158_s6 + $0xb00] sm:$0xff]  ;;  %v380_v25 = vld [vmem:[%s4158_s6 + $0xb08] sm:$0xff]  ;;  %377 = vst [vmem:[%s4163_s7 + $0x2b8] sm:$0xff] %v376_v23 }
  0x3e   : > { %379 = vst [vmem:[%s4163_s7 + $0x2c0] sm:$0xff] %v378_v24  ;;  %381 = vst [vmem:[%s4163_s7 + $0x2c8] sm:$0xff] %v380_v25  ;;  %v382_v26 = vld [vmem:[%s4158_s6 + $0xb40] sm:$0xff]  ;;  %v384_v27 = vld [vmem:[%s4158_s6 + $0xb48] sm:$0xff] }
  0x3f   : > { %v386_v28 = vld [vmem:[%s4158_s6 + $0xb80] sm:$0xff]  ;;  %383 = vst [vmem:[%s4163_s7 + $0x2d0] sm:$0xff] %v382_v26  ;;  %385 = vst [vmem:[%s4163_s7 + $0x2d8] sm:$0xff] %v384_v27  ;;  %v388_v29 = vld [vmem:[%s4158_s6 + $0xb88] sm:$0xff] }
  0x40   : > { %387 = vst [vmem:[%s4163_s7 + $0x2e0] sm:$0xff] %v386_v28  ;;  %v390_v30 = vld [vmem:[%s4158_s6 + $0xbc0] sm:$0xff]  ;;  %v392_v31 = vld [vmem:[%s4158_s6 + $0xbc8] sm:$0xff]  ;;  %389 = vst [vmem:[%s4163_s7 + $0x2e8] sm:$0xff] %v388_v29 }
  0x41   : > { %391 = vst [vmem:[%s4163_s7 + $0x2f0] sm:$0xff] %v390_v30  ;;  %393 = vst [vmem:[%s4163_s7 + $0x2f8] sm:$0xff] %v392_v31  ;;  %v394_v32 = vld [vmem:[%s4158_s6 + $0xc00] sm:$0xff]  ;;  %v396_v33 = vld [vmem:[%s4158_s6 + $0xc08] sm:$0xff] }
  0x42   : > { %v398_v34 = vld [vmem:[%s4158_s6 + $0xc40] sm:$0xff]  ;;  %395 = vst [vmem:[%s4163_s7 + $0x300] sm:$0xff] %v394_v32  ;;  %397 = vst [vmem:[%s4163_s7 + $0x308] sm:$0xff] %v396_v33  ;;  %v400_v35 = vld [vmem:[%s4158_s6 + $0xc48] sm:$0xff] }
  0x43   : > { %399 = vst [vmem:[%s4163_s7 + $0x310] sm:$0xff] %v398_v34  ;;  %v402_v36 = vld [vmem:[%s4158_s6 + $0xc80] sm:$0xff]  ;;  %v404_v37 = vld [vmem:[%s4158_s6 + $0xc88] sm:$0xff]  ;;  %401 = vst [vmem:[%s4163_s7 + $0x318] sm:$0xff] %v400_v35 }
  0x44   : > { %403 = vst [vmem:[%s4163_s7 + $0x320] sm:$0xff] %v402_v36  ;;  %405 = vst [vmem:[%s4163_s7 + $0x328] sm:$0xff] %v404_v37  ;;  %v406_v38 = vld [vmem:[%s4158_s6 + $0xcc0] sm:$0xff]  ;;  %v408_v39 = vld [vmem:[%s4158_s6 + $0xcc8] sm:$0xff] }
  0x45   : > { %v410_v40 = vld [vmem:[%s4158_s6 + $0xd00] sm:$0xff]  ;;  %407 = vst [vmem:[%s4163_s7 + $0x330] sm:$0xff] %v406_v38  ;;  %409 = vst [vmem:[%s4163_s7 + $0x338] sm:$0xff] %v408_v39  ;;  %v412_v41 = vld [vmem:[%s4158_s6 + $0xd08] sm:$0xff] }
  0x46   : > { %411 = vst [vmem:[%s4163_s7 + $0x340] sm:$0xff] %v410_v40  ;;  %v414_v42 = vld [vmem:[%s4158_s6 + $0xd40] sm:$0xff]  ;;  %v416_v43 = vld [vmem:[%s4158_s6 + $0xd48] sm:$0xff]  ;;  %413 = vst [vmem:[%s4163_s7 + $0x348] sm:$0xff] %v412_v41 }
  0x47   : > { %415 = vst [vmem:[%s4163_s7 + $0x350] sm:$0xff] %v414_v42  ;;  %417 = vst [vmem:[%s4163_s7 + $0x358] sm:$0xff] %v416_v43  ;;  %v418_v44 = vld [vmem:[%s4158_s6 + $0xd80] sm:$0xff]  ;;  %v420_v45 = vld [vmem:[%s4158_s6 + $0xd88] sm:$0xff] }
  0x48   : > { %v422_v46 = vld [vmem:[%s4158_s6 + $0xdc0] sm:$0xff]  ;;  %419 = vst [vmem:[%s4163_s7 + $0x360] sm:$0xff] %v418_v44  ;;  %421 = vst [vmem:[%s4163_s7 + $0x368] sm:$0xff] %v420_v45  ;;  %v424_v47 = vld [vmem:[%s4158_s6 + $0xdc8] sm:$0xff] }
  0x49   : > { %423 = vst [vmem:[%s4163_s7 + $0x370] sm:$0xff] %v422_v46  ;;  %v426_v48 = vld [vmem:[%s4158_s6 + $0xe00] sm:$0xff]  ;;  %v428_v49 = vld [vmem:[%s4158_s6 + $0xe08] sm:$0xff]  ;;  %425 = vst [vmem:[%s4163_s7 + $0x378] sm:$0xff] %v424_v47 }
  0x4a   : > { %427 = vst [vmem:[%s4163_s7 + $0x380] sm:$0xff] %v426_v48  ;;  %429 = vst [vmem:[%s4163_s7 + $0x388] sm:$0xff] %v428_v49  ;;  %v430_v50 = vld [vmem:[%s4158_s6 + $0xe40] sm:$0xff]  ;;  %v432_v51 = vld [vmem:[%s4158_s6 + $0xe48] sm:$0xff] }
  0x4b   : > { %v434_v52 = vld [vmem:[%s4158_s6 + $0xe80] sm:$0xff]  ;;  %431 = vst [vmem:[%s4163_s7 + $0x390] sm:$0xff] %v430_v50  ;;  %433 = vst [vmem:[%s4163_s7 + $0x398] sm:$0xff] %v432_v51  ;;  %v436_v53 = vld [vmem:[%s4158_s6 + $0xe88] sm:$0xff] }
  0x4c   : > { %435 = vst [vmem:[%s4163_s7 + $0x3a0] sm:$0xff] %v434_v52  ;;  %v438_v54 = vld [vmem:[%s4158_s6 + $0xec0] sm:$0xff]  ;;  %v440_v55 = vld [vmem:[%s4158_s6 + $0xec8] sm:$0xff]  ;;  %437 = vst [vmem:[%s4163_s7 + $0x3a8] sm:$0xff] %v436_v53 }
  0x4d   : > { %439 = vst [vmem:[%s4163_s7 + $0x3b0] sm:$0xff] %v438_v54  ;;  %441 = vst [vmem:[%s4163_s7 + $0x3b8] sm:$0xff] %v440_v55  ;;  %v442_v56 = vld [vmem:[%s4158_s6 + $0xf00] sm:$0xff]  ;;  %v444_v57 = vld [vmem:[%s4158_s6 + $0xf08] sm:$0xff] }
  0x4e   : > { %v446_v58 = vld [vmem:[%s4158_s6 + $0xf40] sm:$0xff]  ;;  %443 = vst [vmem:[%s4163_s7 + $0x3c0] sm:$0xff] %v442_v56  ;;  %445 = vst [vmem:[%s4163_s7 + $0x3c8] sm:$0xff] %v444_v57  ;;  %v448_v59 = vld [vmem:[%s4158_s6 + $0xf48] sm:$0xff] }
  0x4f   : > { %447 = vst [vmem:[%s4163_s7 + $0x3d0] sm:$0xff] %v446_v58  ;;  %v450_v60 = vld [vmem:[%s4158_s6 + $0xf80] sm:$0xff]  ;;  %v452_v61 = vld [vmem:[%s4158_s6 + $0xf88] sm:$0xff]  ;;  %449 = vst [vmem:[%s4163_s7 + $0x3d8] sm:$0xff] %v448_v59 }
  0x50   : > { %451 = vst [vmem:[%s4163_s7 + $0x3e0] sm:$0xff] %v450_v60  ;;  %453 = vst [vmem:[%s4163_s7 + $0x3e8] sm:$0xff] %v452_v61  ;;  %v454_v62 = vld [vmem:[%s4158_s6 + $0xfc0] sm:$0xff]  ;;  %v456_v63 = vld [vmem:[%s4158_s6 + $0xfc8] sm:$0xff] }
  0x51   : > { %v458_v0 = vld [vmem:[%s4158_s6 + $0x1000] sm:$0xff]  ;;  %455 = vst [vmem:[%s4163_s7 + $0x3f0] sm:$0xff] %v454_v62  ;;  %457 = vst [vmem:[%s4163_s7 + $0x3f8] sm:$0xff] %v456_v63  ;;  %v460_v1 = vld [vmem:[%s4158_s6 + $0x1008] sm:$0xff] }
  0x52   : > { %459 = vst [vmem:[%s4163_s7 + $0x400] sm:$0xff] %v458_v0  ;;  %v462_v2 = vld [vmem:[%s4158_s6 + $0x1040] sm:$0xff]  ;;  %v464_v3 = vld [vmem:[%s4158_s6 + $0x1048] sm:$0xff]  ;;  %461 = vst [vmem:[%s4163_s7 + $0x408] sm:$0xff] %v460_v1 }
  0x53   : > { %463 = vst [vmem:[%s4163_s7 + $0x410] sm:$0xff] %v462_v2  ;;  %465 = vst [vmem:[%s4163_s7 + $0x418] sm:$0xff] %v464_v3  ;;  %v466_v4 = vld [vmem:[%s4158_s6 + $0x1080] sm:$0xff]  ;;  %v468_v5 = vld [vmem:[%s4158_s6 + $0x1088] sm:$0xff] }
  0x54   : > { %v470_v6 = vld [vmem:[%s4158_s6 + $0x10c0] sm:$0xff]  ;;  %467 = vst [vmem:[%s4163_s7 + $0x420] sm:$0xff] %v466_v4  ;;  %469 = vst [vmem:[%s4163_s7 + $0x428] sm:$0xff] %v468_v5  ;;  %v472_v7 = vld [vmem:[%s4158_s6 + $0x10c8] sm:$0xff] }
  0x55   : > { %471 = vst [vmem:[%s4163_s7 + $0x430] sm:$0xff] %v470_v6  ;;  %v474_v8 = vld [vmem:[%s4158_s6 + $0x1100] sm:$0xff]  ;;  %v476_v9 = vld [vmem:[%s4158_s6 + $0x1108] sm:$0xff]  ;;  %473 = vst [vmem:[%s4163_s7 + $0x438] sm:$0xff] %v472_v7 }
  0x56   : > { %475 = vst [vmem:[%s4163_s7 + $0x440] sm:$0xff] %v474_v8  ;;  %477 = vst [vmem:[%s4163_s7 + $0x448] sm:$0xff] %v476_v9  ;;  %v478_v10 = vld [vmem:[%s4158_s6 + $0x1140] sm:$0xff]  ;;  %v480_v11 = vld [vmem:[%s4158_s6 + $0x1148] sm:$0xff] }
  0x57   : > { %v482_v12 = vld [vmem:[%s4158_s6 + $0x1180] sm:$0xff]  ;;  %479 = vst [vmem:[%s4163_s7 + $0x450] sm:$0xff] %v478_v10  ;;  %481 = vst [vmem:[%s4163_s7 + $0x458] sm:$0xff] %v480_v11  ;;  %v484_v13 = vld [vmem:[%s4158_s6 + $0x1188] sm:$0xff] }
  0x58   : > { %483 = vst [vmem:[%s4163_s7 + $0x460] sm:$0xff] %v482_v12  ;;  %v486_v14 = vld [vmem:[%s4158_s6 + $0x11c0] sm:$0xff]  ;;  %v488_v15 = vld [vmem:[%s4158_s6 + $0x11c8] sm:$0xff]  ;;  %485 = vst [vmem:[%s4163_s7 + $0x468] sm:$0xff] %v484_v13 }
  0x59   : > { %487 = vst [vmem:[%s4163_s7 + $0x470] sm:$0xff] %v486_v14  ;;  %489 = vst [vmem:[%s4163_s7 + $0x478] sm:$0xff] %v488_v15  ;;  %v490_v16 = vld [vmem:[%s4158_s6 + $0x1200] sm:$0xff]  ;;  %v492_v17 = vld [vmem:[%s4158_s6 + $0x1208] sm:$0xff] }
  0x5a   : > { %v494_v18 = vld [vmem:[%s4158_s6 + $0x1240] sm:$0xff]  ;;  %491 = vst [vmem:[%s4163_s7 + $0x480] sm:$0xff] %v490_v16  ;;  %493 = vst [vmem:[%s4163_s7 + $0x488] sm:$0xff] %v492_v17  ;;  %v496_v19 = vld [vmem:[%s4158_s6 + $0x1248] sm:$0xff] }
  0x5b   : > { %495 = vst [vmem:[%s4163_s7 + $0x490] sm:$0xff] %v494_v18  ;;  %v498_v20 = vld [vmem:[%s4158_s6 + $0x1280] sm:$0xff]  ;;  %v500_v21 = vld [vmem:[%s4158_s6 + $0x1288] sm:$0xff]  ;;  %497 = vst [vmem:[%s4163_s7 + $0x498] sm:$0xff] %v496_v19 }
  0x5c   : > { %499 = vst [vmem:[%s4163_s7 + $0x4a0] sm:$0xff] %v498_v20  ;;  %501 = vst [vmem:[%s4163_s7 + $0x4a8] sm:$0xff] %v500_v21  ;;  %v502_v22 = vld [vmem:[%s4158_s6 + $0x12c0] sm:$0xff]  ;;  %v504_v23 = vld [vmem:[%s4158_s6 + $0x12c8] sm:$0xff] }
  0x5d   : > { %v506_v24 = vld [vmem:[%s4158_s6 + $0x1300] sm:$0xff]  ;;  %503 = vst [vmem:[%s4163_s7 + $0x4b0] sm:$0xff] %v502_v22  ;;  %505 = vst [vmem:[%s4163_s7 + $0x4b8] sm:$0xff] %v504_v23  ;;  %v508_v25 = vld [vmem:[%s4158_s6 + $0x1308] sm:$0xff] }
  0x5e   : > { %507 = vst [vmem:[%s4163_s7 + $0x4c0] sm:$0xff] %v506_v24  ;;  %v510_v26 = vld [vmem:[%s4158_s6 + $0x1340] sm:$0xff]  ;;  %v512_v27 = vld [vmem:[%s4158_s6 + $0x1348] sm:$0xff]  ;;  %509 = vst [vmem:[%s4163_s7 + $0x4c8] sm:$0xff] %v508_v25 }
  0x5f   : > { %511 = vst [vmem:[%s4163_s7 + $0x4d0] sm:$0xff] %v510_v26  ;;  %513 = vst [vmem:[%s4163_s7 + $0x4d8] sm:$0xff] %v512_v27  ;;  %v514_v28 = vld [vmem:[%s4158_s6 + $0x1380] sm:$0xff]  ;;  %v516_v29 = vld [vmem:[%s4158_s6 + $0x1388] sm:$0xff] }
  0x60   : > { %v518_v30 = vld [vmem:[%s4158_s6 + $0x13c0] sm:$0xff]  ;;  %515 = vst [vmem:[%s4163_s7 + $0x4e0] sm:$0xff] %v514_v28  ;;  %517 = vst [vmem:[%s4163_s7 + $0x4e8] sm:$0xff] %v516_v29  ;;  %v520_v31 = vld [vmem:[%s4158_s6 + $0x13c8] sm:$0xff] }
  0x61   : > { %519 = vst [vmem:[%s4163_s7 + $0x4f0] sm:$0xff] %v518_v30  ;;  %v522_v32 = vld [vmem:[%s4158_s6 + $0x1400] sm:$0xff]  ;;  %v524_v33 = vld [vmem:[%s4158_s6 + $0x1408] sm:$0xff]  ;;  %521 = vst [vmem:[%s4163_s7 + $0x4f8] sm:$0xff] %v520_v31 }
  0x62   : > { %523 = vst [vmem:[%s4163_s7 + $0x500] sm:$0xff] %v522_v32  ;;  %525 = vst [vmem:[%s4163_s7 + $0x508] sm:$0xff] %v524_v33  ;;  %v526_v34 = vld [vmem:[%s4158_s6 + $0x1440] sm:$0xff]  ;;  %v528_v35 = vld [vmem:[%s4158_s6 + $0x1448] sm:$0xff] }
  0x63   : > { %v530_v36 = vld [vmem:[%s4158_s6 + $0x1480] sm:$0xff]  ;;  %527 = vst [vmem:[%s4163_s7 + $0x510] sm:$0xff] %v526_v34  ;;  %529 = vst [vmem:[%s4163_s7 + $0x518] sm:$0xff] %v528_v35  ;;  %v532_v37 = vld [vmem:[%s4158_s6 + $0x1488] sm:$0xff] }
  0x64   : > { %531 = vst [vmem:[%s4163_s7 + $0x520] sm:$0xff] %v530_v36  ;;  %v534_v38 = vld [vmem:[%s4158_s6 + $0x14c0] sm:$0xff]  ;;  %v536_v39 = vld [vmem:[%s4158_s6 + $0x14c8] sm:$0xff]  ;;  %533 = vst [vmem:[%s4163_s7 + $0x528] sm:$0xff] %v532_v37 }
  0x65   : > { %535 = vst [vmem:[%s4163_s7 + $0x530] sm:$0xff] %v534_v38  ;;  %537 = vst [vmem:[%s4163_s7 + $0x538] sm:$0xff] %v536_v39  ;;  %v538_v40 = vld [vmem:[%s4158_s6 + $0x1500] sm:$0xff]  ;;  %v540_v41 = vld [vmem:[%s4158_s6 + $0x1508] sm:$0xff] }
  0x66   : > { %v542_v42 = vld [vmem:[%s4158_s6 + $0x1540] sm:$0xff]  ;;  %539 = vst [vmem:[%s4163_s7 + $0x540] sm:$0xff] %v538_v40  ;;  %541 = vst [vmem:[%s4163_s7 + $0x548] sm:$0xff] %v540_v41  ;;  %v544_v43 = vld [vmem:[%s4158_s6 + $0x1548] sm:$0xff] }
  0x67   : > { %543 = vst [vmem:[%s4163_s7 + $0x550] sm:$0xff] %v542_v42  ;;  %v546_v44 = vld [vmem:[%s4158_s6 + $0x1580] sm:$0xff]  ;;  %v548_v45 = vld [vmem:[%s4158_s6 + $0x1588] sm:$0xff]  ;;  %545 = vst [vmem:[%s4163_s7 + $0x558] sm:$0xff] %v544_v43 }
  0x68   : > { %547 = vst [vmem:[%s4163_s7 + $0x560] sm:$0xff] %v546_v44  ;;  %549 = vst [vmem:[%s4163_s7 + $0x568] sm:$0xff] %v548_v45  ;;  %v550_v46 = vld [vmem:[%s4158_s6 + $0x15c0] sm:$0xff]  ;;  %v552_v47 = vld [vmem:[%s4158_s6 + $0x15c8] sm:$0xff] }
  0x69   : > { %v554_v48 = vld [vmem:[%s4158_s6 + $0x1600] sm:$0xff]  ;;  %551 = vst [vmem:[%s4163_s7 + $0x570] sm:$0xff] %v550_v46  ;;  %553 = vst [vmem:[%s4163_s7 + $0x578] sm:$0xff] %v552_v47  ;;  %v556_v49 = vld [vmem:[%s4158_s6 + $0x1608] sm:$0xff] }
  0x6a   : > { %555 = vst [vmem:[%s4163_s7 + $0x580] sm:$0xff] %v554_v48  ;;  %v558_v50 = vld [vmem:[%s4158_s6 + $0x1640] sm:$0xff]  ;;  %v560_v51 = vld [vmem:[%s4158_s6 + $0x1648] sm:$0xff]  ;;  %557 = vst [vmem:[%s4163_s7 + $0x588] sm:$0xff] %v556_v49 }
  0x6b   : > { %559 = vst [vmem:[%s4163_s7 + $0x590] sm:$0xff] %v558_v50  ;;  %561 = vst [vmem:[%s4163_s7 + $0x598] sm:$0xff] %v560_v51  ;;  %v562_v52 = vld [vmem:[%s4158_s6 + $0x1680] sm:$0xff]  ;;  %v564_v53 = vld [vmem:[%s4158_s6 + $0x1688] sm:$0xff] }
  0x6c   : > { %v566_v54 = vld [vmem:[%s4158_s6 + $0x16c0] sm:$0xff]  ;;  %563 = vst [vmem:[%s4163_s7 + $0x5a0] sm:$0xff] %v562_v52  ;;  %565 = vst [vmem:[%s4163_s7 + $0x5a8] sm:$0xff] %v564_v53  ;;  %v568_v55 = vld [vmem:[%s4158_s6 + $0x16c8] sm:$0xff] }
  0x6d   : > { %567 = vst [vmem:[%s4163_s7 + $0x5b0] sm:$0xff] %v566_v54  ;;  %v570_v56 = vld [vmem:[%s4158_s6 + $0x1700] sm:$0xff]  ;;  %v572_v57 = vld [vmem:[%s4158_s6 + $0x1708] sm:$0xff]  ;;  %569 = vst [vmem:[%s4163_s7 + $0x5b8] sm:$0xff] %v568_v55 }
  0x6e   : > { %571 = vst [vmem:[%s4163_s7 + $0x5c0] sm:$0xff] %v570_v56  ;;  %573 = vst [vmem:[%s4163_s7 + $0x5c8] sm:$0xff] %v572_v57  ;;  %v574_v58 = vld [vmem:[%s4158_s6 + $0x1740] sm:$0xff]  ;;  %v576_v59 = vld [vmem:[%s4158_s6 + $0x1748] sm:$0xff] }
  0x6f   : > { %v578_v60 = vld [vmem:[%s4158_s6 + $0x1780] sm:$0xff]  ;;  %575 = vst [vmem:[%s4163_s7 + $0x5d0] sm:$0xff] %v574_v58  ;;  %577 = vst [vmem:[%s4163_s7 + $0x5d8] sm:$0xff] %v576_v59  ;;  %v580_v61 = vld [vmem:[%s4158_s6 + $0x1788] sm:$0xff] }
  0x70   : > { %579 = vst [vmem:[%s4163_s7 + $0x5e0] sm:$0xff] %v578_v60  ;;  %v582_v62 = vld [vmem:[%s4158_s6 + $0x17c0] sm:$0xff]  ;;  %v584_v63 = vld [vmem:[%s4158_s6 + $0x17c8] sm:$0xff]  ;;  %581 = vst [vmem:[%s4163_s7 + $0x5e8] sm:$0xff] %v580_v61 }
  0x71   : > { %583 = vst [vmem:[%s4163_s7 + $0x5f0] sm:$0xff] %v582_v62  ;;  %585 = vst [vmem:[%s4163_s7 + $0x5f8] sm:$0xff] %v584_v63  ;;  %v586_v0 = vld [vmem:[%s4158_s6 + $0x1800] sm:$0xff]  ;;  %v588_v1 = vld [vmem:[%s4158_s6 + $0x1808] sm:$0xff] }
  0x72   : > { %v590_v2 = vld [vmem:[%s4158_s6 + $0x1840] sm:$0xff]  ;;  %587 = vst [vmem:[%s4163_s7 + $0x600] sm:$0xff] %v586_v0  ;;  %589 = vst [vmem:[%s4163_s7 + $0x608] sm:$0xff] %v588_v1  ;;  %v592_v3 = vld [vmem:[%s4158_s6 + $0x1848] sm:$0xff] }
  0x73   : > { %591 = vst [vmem:[%s4163_s7 + $0x610] sm:$0xff] %v590_v2  ;;  %v594_v4 = vld [vmem:[%s4158_s6 + $0x1880] sm:$0xff]  ;;  %v596_v5 = vld [vmem:[%s4158_s6 + $0x1888] sm:$0xff]  ;;  %593 = vst [vmem:[%s4163_s7 + $0x618] sm:$0xff] %v592_v3 }
  0x74   : > { %595 = vst [vmem:[%s4163_s7 + $0x620] sm:$0xff] %v594_v4  ;;  %597 = vst [vmem:[%s4163_s7 + $0x628] sm:$0xff] %v596_v5  ;;  %v598_v6 = vld [vmem:[%s4158_s6 + $0x18c0] sm:$0xff]  ;;  %v600_v7 = vld [vmem:[%s4158_s6 + $0x18c8] sm:$0xff] }
  0x75   : > { %v602_v8 = vld [vmem:[%s4158_s6 + $0x1900] sm:$0xff]  ;;  %599 = vst [vmem:[%s4163_s7 + $0x630] sm:$0xff] %v598_v6  ;;  %601 = vst [vmem:[%s4163_s7 + $0x638] sm:$0xff] %v600_v7  ;;  %v604_v9 = vld [vmem:[%s4158_s6 + $0x1908] sm:$0xff] }
  0x76   : > { %603 = vst [vmem:[%s4163_s7 + $0x640] sm:$0xff] %v602_v8  ;;  %v606_v10 = vld [vmem:[%s4158_s6 + $0x1940] sm:$0xff]  ;;  %v608_v11 = vld [vmem:[%s4158_s6 + $0x1948] sm:$0xff]  ;;  %605 = vst [vmem:[%s4163_s7 + $0x648] sm:$0xff] %v604_v9 }
  0x77   : > { %607 = vst [vmem:[%s4163_s7 + $0x650] sm:$0xff] %v606_v10  ;;  %609 = vst [vmem:[%s4163_s7 + $0x658] sm:$0xff] %v608_v11  ;;  %v610_v12 = vld [vmem:[%s4158_s6 + $0x1980] sm:$0xff]  ;;  %v612_v13 = vld [vmem:[%s4158_s6 + $0x1988] sm:$0xff] }
  0x78   : > { %v614_v14 = vld [vmem:[%s4158_s6 + $0x19c0] sm:$0xff]  ;;  %611 = vst [vmem:[%s4163_s7 + $0x660] sm:$0xff] %v610_v12  ;;  %613 = vst [vmem:[%s4163_s7 + $0x668] sm:$0xff] %v612_v13  ;;  %v616_v15 = vld [vmem:[%s4158_s6 + $0x19c8] sm:$0xff] }
  0x79   : > { %615 = vst [vmem:[%s4163_s7 + $0x670] sm:$0xff] %v614_v14  ;;  %v618_v16 = vld [vmem:[%s4158_s6 + $0x1a00] sm:$0xff]  ;;  %v620_v17 = vld [vmem:[%s4158_s6 + $0x1a08] sm:$0xff]  ;;  %617 = vst [vmem:[%s4163_s7 + $0x678] sm:$0xff] %v616_v15 }
  0x7a   : > { %619 = vst [vmem:[%s4163_s7 + $0x680] sm:$0xff] %v618_v16  ;;  %621 = vst [vmem:[%s4163_s7 + $0x688] sm:$0xff] %v620_v17  ;;  %v622_v18 = vld [vmem:[%s4158_s6 + $0x1a40] sm:$0xff]  ;;  %v624_v19 = vld [vmem:[%s4158_s6 + $0x1a48] sm:$0xff] }
  0x7b   : > { %v626_v20 = vld [vmem:[%s4158_s6 + $0x1a80] sm:$0xff]  ;;  %623 = vst [vmem:[%s4163_s7 + $0x690] sm:$0xff] %v622_v18  ;;  %625 = vst [vmem:[%s4163_s7 + $0x698] sm:$0xff] %v624_v19  ;;  %v628_v21 = vld [vmem:[%s4158_s6 + $0x1a88] sm:$0xff] }
  0x7c   : > { %627 = vst [vmem:[%s4163_s7 + $0x6a0] sm:$0xff] %v626_v20  ;;  %v630_v22 = vld [vmem:[%s4158_s6 + $0x1ac0] sm:$0xff]  ;;  %v632_v23 = vld [vmem:[%s4158_s6 + $0x1ac8] sm:$0xff]  ;;  %629 = vst [vmem:[%s4163_s7 + $0x6a8] sm:$0xff] %v628_v21 }
  0x7d   : > { %631 = vst [vmem:[%s4163_s7 + $0x6b0] sm:$0xff] %v630_v22  ;;  %633 = vst [vmem:[%s4163_s7 + $0x6b8] sm:$0xff] %v632_v23  ;;  %v634_v24 = vld [vmem:[%s4158_s6 + $0x1b00] sm:$0xff]  ;;  %v636_v25 = vld [vmem:[%s4158_s6 + $0x1b08] sm:$0xff] }
  0x7e   : > { %v638_v26 = vld [vmem:[%s4158_s6 + $0x1b40] sm:$0xff]  ;;  %635 = vst [vmem:[%s4163_s7 + $0x6c0] sm:$0xff] %v634_v24  ;;  %637 = vst [vmem:[%s4163_s7 + $0x6c8] sm:$0xff] %v636_v25  ;;  %v640_v27 = vld [vmem:[%s4158_s6 + $0x1b48] sm:$0xff] }
  0x7f   : > { %639 = vst [vmem:[%s4163_s7 + $0x6d0] sm:$0xff] %v638_v26  ;;  %v642_v28 = vld [vmem:[%s4158_s6 + $0x1b80] sm:$0xff]  ;;  %v644_v29 = vld [vmem:[%s4158_s6 + $0x1b88] sm:$0xff]  ;;  %641 = vst [vmem:[%s4163_s7 + $0x6d8] sm:$0xff] %v640_v27 }
  0x80   : > { %643 = vst [vmem:[%s4163_s7 + $0x6e0] sm:$0xff] %v642_v28  ;;  %645 = vst [vmem:[%s4163_s7 + $0x6e8] sm:$0xff] %v644_v29  ;;  %v646_v30 = vld [vmem:[%s4158_s6 + $0x1bc0] sm:$0xff]  ;;  %v648_v31 = vld [vmem:[%s4158_s6 + $0x1bc8] sm:$0xff] }
  0x81   : > { %v650_v32 = vld [vmem:[%s4158_s6 + $0x1c00] sm:$0xff]  ;;  %647 = vst [vmem:[%s4163_s7 + $0x6f0] sm:$0xff] %v646_v30  ;;  %649 = vst [vmem:[%s4163_s7 + $0x6f8] sm:$0xff] %v648_v31  ;;  %v652_v33 = vld [vmem:[%s4158_s6 + $0x1c08] sm:$0xff] }
  0x82   : > { %651 = vst [vmem:[%s4163_s7 + $0x700] sm:$0xff] %v650_v32  ;;  %v654_v34 = vld [vmem:[%s4158_s6 + $0x1c40] sm:$0xff]  ;;  %v656_v35 = vld [vmem:[%s4158_s6 + $0x1c48] sm:$0xff]  ;;  %653 = vst [vmem:[%s4163_s7 + $0x708] sm:$0xff] %v652_v33 }
  0x83   : > { %655 = vst [vmem:[%s4163_s7 + $0x710] sm:$0xff] %v654_v34  ;;  %657 = vst [vmem:[%s4163_s7 + $0x718] sm:$0xff] %v656_v35  ;;  %v658_v36 = vld [vmem:[%s4158_s6 + $0x1c80] sm:$0xff]  ;;  %v660_v37 = vld [vmem:[%s4158_s6 + $0x1c88] sm:$0xff] }
  0x84   : > { %v662_v38 = vld [vmem:[%s4158_s6 + $0x1cc0] sm:$0xff]  ;;  %659 = vst [vmem:[%s4163_s7 + $0x720] sm:$0xff] %v658_v36  ;;  %661 = vst [vmem:[%s4163_s7 + $0x728] sm:$0xff] %v660_v37  ;;  %v664_v39 = vld [vmem:[%s4158_s6 + $0x1cc8] sm:$0xff] }
  0x85   : > { %663 = vst [vmem:[%s4163_s7 + $0x730] sm:$0xff] %v662_v38  ;;  %v666_v40 = vld [vmem:[%s4158_s6 + $0x1d00] sm:$0xff]  ;;  %v668_v41 = vld [vmem:[%s4158_s6 + $0x1d08] sm:$0xff]  ;;  %665 = vst [vmem:[%s4163_s7 + $0x738] sm:$0xff] %v664_v39 }
  0x86   : > { %667 = vst [vmem:[%s4163_s7 + $0x740] sm:$0xff] %v666_v40  ;;  %669 = vst [vmem:[%s4163_s7 + $0x748] sm:$0xff] %v668_v41  ;;  %v670_v42 = vld [vmem:[%s4158_s6 + $0x1d40] sm:$0xff]  ;;  %v672_v43 = vld [vmem:[%s4158_s6 + $0x1d48] sm:$0xff] }
  0x87   : > { %v674_v44 = vld [vmem:[%s4158_s6 + $0x1d80] sm:$0xff]  ;;  %671 = vst [vmem:[%s4163_s7 + $0x750] sm:$0xff] %v670_v42  ;;  %673 = vst [vmem:[%s4163_s7 + $0x758] sm:$0xff] %v672_v43  ;;  %v676_v45 = vld [vmem:[%s4158_s6 + $0x1d88] sm:$0xff] }
  0x88   : > { %675 = vst [vmem:[%s4163_s7 + $0x760] sm:$0xff] %v674_v44  ;;  %v678_v46 = vld [vmem:[%s4158_s6 + $0x1dc0] sm:$0xff]  ;;  %v680_v47 = vld [vmem:[%s4158_s6 + $0x1dc8] sm:$0xff]  ;;  %677 = vst [vmem:[%s4163_s7 + $0x768] sm:$0xff] %v676_v45 }
  0x89   : > { %679 = vst [vmem:[%s4163_s7 + $0x770] sm:$0xff] %v678_v46  ;;  %681 = vst [vmem:[%s4163_s7 + $0x778] sm:$0xff] %v680_v47  ;;  %v682_v48 = vld [vmem:[%s4158_s6 + $0x1e00] sm:$0xff]  ;;  %v684_v49 = vld [vmem:[%s4158_s6 + $0x1e08] sm:$0xff] }
  0x8a   : > { %v686_v50 = vld [vmem:[%s4158_s6 + $0x1e40] sm:$0xff]  ;;  %683 = vst [vmem:[%s4163_s7 + $0x780] sm:$0xff] %v682_v48  ;;  %685 = vst [vmem:[%s4163_s7 + $0x788] sm:$0xff] %v684_v49  ;;  %v688_v51 = vld [vmem:[%s4158_s6 + $0x1e48] sm:$0xff] }
  0x8b   : > { %687 = vst [vmem:[%s4163_s7 + $0x790] sm:$0xff] %v686_v50  ;;  %v690_v52 = vld [vmem:[%s4158_s6 + $0x1e80] sm:$0xff]  ;;  %v692_v53 = vld [vmem:[%s4158_s6 + $0x1e88] sm:$0xff]  ;;  %689 = vst [vmem:[%s4163_s7 + $0x798] sm:$0xff] %v688_v51 }
  0x8c   : > { %691 = vst [vmem:[%s4163_s7 + $0x7a0] sm:$0xff] %v690_v52  ;;  %693 = vst [vmem:[%s4163_s7 + $0x7a8] sm:$0xff] %v692_v53  ;;  %v694_v54 = vld [vmem:[%s4158_s6 + $0x1ec0] sm:$0xff]  ;;  %v696_v55 = vld [vmem:[%s4158_s6 + $0x1ec8] sm:$0xff] }
  0x8d   : > { %v698_v56 = vld [vmem:[%s4158_s6 + $0x1f00] sm:$0xff]  ;;  %695 = vst [vmem:[%s4163_s7 + $0x7b0] sm:$0xff] %v694_v54  ;;  %697 = vst [vmem:[%s4163_s7 + $0x7b8] sm:$0xff] %v696_v55  ;;  %v700_v57 = vld [vmem:[%s4158_s6 + $0x1f08] sm:$0xff] }
  0x8e   : > { %699 = vst [vmem:[%s4163_s7 + $0x7c0] sm:$0xff] %v698_v56  ;;  %v702_v58 = vld [vmem:[%s4158_s6 + $0x1f40] sm:$0xff]  ;;  %v704_v59 = vld [vmem:[%s4158_s6 + $0x1f48] sm:$0xff]  ;;  %701 = vst [vmem:[%s4163_s7 + $0x7c8] sm:$0xff] %v700_v57 }
  0x8f   : > { %703 = vst [vmem:[%s4163_s7 + $0x7d0] sm:$0xff] %v702_v58  ;;  %705 = vst [vmem:[%s4163_s7 + $0x7d8] sm:$0xff] %v704_v59  ;;  %v706_v60 = vld [vmem:[%s4158_s6 + $0x1f80] sm:$0xff]  ;;  %v708_v61 = vld [vmem:[%s4158_s6 + $0x1f88] sm:$0xff] }
  0x90   : > { %v710_v62 = vld [vmem:[%s4158_s6 + $0x1fc0] sm:$0xff]  ;;  %707 = vst [vmem:[%s4163_s7 + $0x7e0] sm:$0xff] %v706_v60  ;;  %709 = vst [vmem:[%s4163_s7 + $0x7e8] sm:$0xff] %v708_v61  ;;  %v712_v63 = vld [vmem:[%s4158_s6 + $0x1fc8] sm:$0xff] }
  0x91   : > { %711 = vst [vmem:[%s4163_s7 + $0x7f0] sm:$0xff] %v710_v62  ;;  %713 = vst [vmem:[%s4163_s7 + $0x7f8] sm:$0xff] %v712_v63 }
  0x92 PF: > { %p3238_p5 = scmp.ge.s32.totalorder %s4090_s20, 1  ;;  %p726_p6 = scmp.lt.s32.totalorder %s4090_s20, 5 }
  0x94   : > { %p727_p7 = pnand %p3238_p5, %p726_p6 }
  0x95   : > { %v778_v0 = vld [vmem:[%s5410_s1 + $0x8] sm:$0xff] (!%p727_p7)  ;;  %v777_v2 = vld [vmem:[%s5410_s1] sm:$0xff] (!%p727_p7)  ;;  %v4092_v7 = vmov (!%p727_p7), 0.0   ;;  %v780_v28 = vld [vmem:[%s5410_s1 + $0x18] sm:$0xff] (!%p727_p7)  ;;  %s733_s8 = sand.u32 (!%p727_p7), 1, %s4082_s18   ;;  %s3240_s29 = sshll.u32 (!%p727_p7), %s3231_s21, 2 }
  0x96   : > { %730 = sbr.rel (%p727_p7) target bundleno = 821 (0x335), region = 59  ;;  %v786_v1 = vld [vmem:[%s5410_s1 + $0x48] sm:$0xff] (!%p727_p7)  ;;  %v785_v4 = vld [vmem:[%s5410_s1 + $0x40] sm:$0xff] (!%p727_p7)  ;;  %1011 = vmatprep.mubr.f32.mxu0 (!%p727_p7), %v4092_v7  ;;  %1082 = vmatprep.mubr.f32.mxu1 (!%p727_p7), %v4092_v7  ;;  %v788_v29 = vld [vmem:[%s5410_s1 + $0x58] sm:$0xff] (!%p727_p7)  ;;  %s3239_s23 = sshll.u32 (!%p727_p7), %s733_s8, 11 }
  0x97   : > { %v3502_v3 = vpack.c.bf16 (!%p727_p7), %v786_v1, %v778_v0  ;;  %v794_v5 = vld [vmem:[%s5410_s1 + $0x88] sm:$0xff] (!%p727_p7)  ;;  %v3504_v8 = vpack.c.bf16 (!%p727_p7), %v785_v4, %v777_v2  ;;  %v793_v10 = vld [vmem:[%s5410_s1 + $0x80] sm:$0xff] (!%p727_p7)  ;;  %v779_v30 = vld [vmem:[%s5410_s1 + $0x10] sm:$0xff] (!%p727_p7)  ;;  %v3534_v32 = vpack.c.bf16 (!%p727_p7), %v788_v29, %v780_v28  ;;  %s4959_s28 = scalar_lea.vmem (!%p727_p7), [#allocation2], %s3239_s23  ;;  %p766_p8 = scmp.lt.s32.totalorder (!%p727_p7), %s3240_s29, 15 }
  0x98   : > { %v802_v6 = vld [vmem:[%s5410_s1 + $0xc8] sm:$0xff] (!%p727_p7)  ;;  %v801_v11 = vld [vmem:[%s5410_s1 + $0xc0] sm:$0xff] (!%p727_p7)  ;;  %v787_v33 = vld [vmem:[%s5410_s1 + $0x50] sm:$0xff] (!%p727_p7) }
  0x99   : > { %v3506_v9 = vpack.c.bf16 (!%p727_p7), %v802_v6, %v794_v5  ;;  %v810_v12 = vld [vmem:[%s5410_s1 + $0x108] sm:$0xff] (!%p727_p7)  ;;  %3503 = vmatprep.subr.bf16.mxu0 (!%p727_p7), %v3502_v3  ;;  %v3508_v14 = vpack.c.bf16 (!%p727_p7), %v801_v11, %v793_v10  ;;  %v809_v16 = vld [vmem:[%s5410_s1 + $0x100] sm:$0xff] (!%p727_p7)  ;;  %v796_v34 = vld [vmem:[%s5410_s1 + $0x98] sm:$0xff] (!%p727_p7)  ;;  %v3536_v37 = vpack.c.bf16 (!%p727_p7), %v787_v33, %v779_v30  ;;  %3535 = vmatprep.subr.bf16.mxu1 (!%p727_p7), %v3534_v32 }
  0x9a   : > { %v818_v13 = vld [vmem:[%s5410_s1 + $0x148] sm:$0xff] (!%p727_p7)  ;;  %3505 = vmatpush1.bf16.msra.mxu0 (!%p727_p7), %v3504_v8  ;;  %v817_v17 = vld [vmem:[%s5410_s1 + $0x140] sm:$0xff] (!%p727_p7)  ;;  %v804_v35 = vld [vmem:[%s5410_s1 + $0xd8] sm:$0xff] (!%p727_p7) }
  0x9b   : > { %3507 = vmatprep.subr.bf16.mxu0 (!%p727_p7), %v3506_v9  ;;  %v3510_v15 = vpack.c.bf16 (!%p727_p7), %v818_v13, %v810_v12  ;;  %v826_v18 = vld [vmem:[%s5410_s1 + $0x188] sm:$0xff] (!%p727_p7)  ;;  %v3512_v20 = vpack.c.bf16 (!%p727_p7), %v817_v17, %v809_v16  ;;  %v825_v22 = vld [vmem:[%s5410_s1 + $0x180] sm:$0xff] (!%p727_p7)  ;;  %v3538_v38 = vpack.c.bf16 (!%p727_p7), %v804_v35, %v796_v34  ;;  %v795_v39 = vld [vmem:[%s5410_s1 + $0x90] sm:$0xff] (!%p727_p7)  ;;  %3537 = vmatpush1.bf16.msra.mxu1 (!%p727_p7), %v3536_v37 }
  0x9c   : > { %v834_v19 = vld [vmem:[%s5410_s1 + $0x1c8] sm:$0xff] (!%p727_p7)  ;;  %v833_v23 = vld [vmem:[%s5410_s1 + $0x1c0] sm:$0xff] (!%p727_p7)  ;;  %v803_v40 = vld [vmem:[%s5410_s1 + $0xd0] sm:$0xff] (!%p727_p7) }
  0x9d   : > { %v3514_v21 = vpack.c.bf16 %v834_v19, %v826_v18  ;;  %v842_v24 = vld [vmem:[%s5410_s1 + $0x208] sm:$0xff]  ;;  %v841_v26 = vld [vmem:[%s5410_s1 + $0x200] sm:$0xff]  ;;  %v3516_v31 = vpack.c.bf16 %v833_v23, %v825_v22  ;;  %v812_v41 = vld [vmem:[%s5410_s1 + $0x118] sm:$0xff]  ;;  %v3540_v45 = vpack.c.bf16 %v803_v40, %v795_v39  ;;  %3539 = vmatprep.subr.bf16.mxu1 %v3538_v38  ;;  %s5419_s29 = smov (!%p766_p8, %s3240_s29), 15 }
  0x9e   : > { %3509 = vmatpush1.bf16.msra.mxu0 %v3508_v14  ;;  %v850_v25 = vld [vmem:[%s5410_s1 + $0x248] sm:$0xff]  ;;  %v849_v27 = vld [vmem:[%s5410_s1 + $0x240] sm:$0xff]  ;;  %v820_v44 = vld [vmem:[%s5410_s1 + $0x158] sm:$0xff]  ;;  %s768_s7 = scalar_lea.vmem %s5413_s4, %s5419_s29  ;;  %s3242_s20 = sshll.u32 %s5419_s29, 1 }
  0x9f   : > { %3511 = vmatprep.subr.bf16.mxu0 %v3510_v15  ;;  %v3518_v36 = vpack.c.bf16 %v850_v25, %v842_v24  ;;  %v858_v42 = vld [vmem:[%s5410_s1 + $0x288] sm:$0xff]  ;;  %v3520_v46 = vpack.c.bf16 %v849_v27, %v841_v26  ;;  %v857_v47 = vld [vmem:[%s5410_s1 + $0x280] sm:$0xff]  ;;  %v3542_v48 = vpack.c.bf16 %v820_v44, %v812_v41  ;;  %v811_v49 = vld [vmem:[%s5410_s1 + $0x110] sm:$0xff]  ;;  %3541 = vmatpush1.bf16.msra.mxu1 %v3540_v45  ;;  %s774_s8 = scalar_lea.vmem %s5414_s5, %s3242_s20 }
  0xa0   : > { %v866_v43 = vld [vmem:[%s5410_s1 + $0x2c8] sm:$0xff]  ;;  %v819_v50 = vld [vmem:[%s5410_s1 + $0x150] sm:$0xff]  ;;  %v865_v52 = vld [vmem:[%s5410_s1 + $0x2c0] sm:$0xff] }
  0xa1   : > { %v3522_v51 = vpack.c.bf16 %v866_v43, %v858_v42  ;;  %v828_v53 = vld [vmem:[%s5410_s1 + $0x198] sm:$0xff]  ;;  %v874_v55 = vld [vmem:[%s5410_s1 + $0x308] sm:$0xff]  ;;  %v3544_v57 = vpack.c.bf16 %v819_v50, %v811_v49  ;;  %v3524_v58 = vpack.c.bf16 %v865_v52, %v857_v47  ;;  %v873_v59 = vld [vmem:[%s5410_s1 + $0x300] sm:$0xff]  ;;  %3543 = vmatprep.subr.bf16.mxu1 %v3542_v48 }
  0xa2   : > { %3513 = vmatpush1.bf16.msra.mxu0 %v3512_v20  ;;  %v836_v54 = vld [vmem:[%s5410_s1 + $0x1d8] sm:$0xff]  ;;  %v882_v56 = vld [vmem:[%s5410_s1 + $0x348] sm:$0xff]  ;;  %v827_v61 = vld [vmem:[%s5410_s1 + $0x190] sm:$0xff] }
  0xa3   : > { %3515 = vmatprep.subr.bf16.mxu0 %v3514_v21  ;;  %v3546_v60 = vpack.c.bf16 %v836_v54, %v828_v53  ;;  %v835_v62 = vld [vmem:[%s5410_s1 + $0x1d0] sm:$0xff]  ;;  %v3526_v63 = vpack.c.bf16 %v882_v56, %v874_v55  ;;  %v881_v0 = vld [vmem:[%s5410_s1 + $0x340] sm:$0xff]  ;;  %v844_v1 = vld [vmem:[%s5410_s1 + $0x218] sm:$0xff]  ;;  %3545 = vmatpush1.bf16.msra.mxu1 %v3544_v57 }
  0xa4   : > { %v852_v2 = vld [vmem:[%s5410_s1 + $0x258] sm:$0xff]  ;;  %v890_v3 = vld [vmem:[%s5410_s1 + $0x388] sm:$0xff]  ;;  %v3548_v5 = vpack.c.bf16 %v835_v62, %v827_v61  ;;  %v3528_v6 = vpack.c.bf16 %v881_v0, %v873_v59  ;;  %v889_v8 = vld [vmem:[%s5410_s1 + $0x380] sm:$0xff] }
  0xa5   : > { %v898_v4 = vld [vmem:[%s5410_s1 + $0x3c8] sm:$0xff]  ;;  %3547 = vmatprep.subr.bf16.mxu1 %v3546_v60  ;;  %v3550_v9 = vpack.c.bf16 %v852_v2, %v844_v1  ;;  %v843_v10 = vld [vmem:[%s5410_s1 + $0x210] sm:$0xff]  ;;  %v897_v13 = vld [vmem:[%s5410_s1 + $0x3c0] sm:$0xff] }
  0xa6   : > { %3517 = vmatpush1.bf16.msra.mxu0 %v3516_v31  ;;  %v851_v11 = vld [vmem:[%s5410_s1 + $0x250] sm:$0xff]  ;;  %v3530_v12 = vpack.c.bf16 %v898_v4, %v890_v3  ;;  %v860_v14 = vld [vmem:[%s5410_s1 + $0x298] sm:$0xff]  ;;  %v782_v16 = vld [vmem:[%s5410_s1 + $0x28] sm:$0xff]  ;;  %v3532_v19 = vpack.c.bf16 %v897_v13, %v889_v8 }
  0xa7   : > { %3519 = vmatprep.subr.bf16.mxu0 %v3518_v36  ;;  %v868_v15 = vld [vmem:[%s5410_s1 + $0x2d8] sm:$0xff]  ;;  %v790_v17 = vld [vmem:[%s5410_s1 + $0x68] sm:$0xff]  ;;  %3549 = vmatpush1.bf16.msra.mxu1 %v3548_v5  ;;  %v3552_v18 = vpack.c.bf16 %v851_v11, %v843_v10  ;;  %v859_v21 = vld [vmem:[%s5410_s1 + $0x290] sm:$0xff] }
  0xa8   : > { %3551 = vmatprep.subr.bf16.mxu1 %v3550_v9  ;;  %v3554_v20 = vpack.c.bf16 %v868_v15, %v860_v14  ;;  %v867_v22 = vld [vmem:[%s5410_s1 + $0x2d0] sm:$0xff]  ;;  %v876_v23 = vld [vmem:[%s5410_s1 + $0x318] sm:$0xff]  ;;  %v3566_v25 = vpack.c.bf16 %v790_v17, %v782_v16  ;;  %v781_v26 = vld [vmem:[%s5410_s1 + $0x20] sm:$0xff] }
  0xa9   : > { %v884_v24 = vld [vmem:[%s5410_s1 + $0x358] sm:$0xff]  ;;  %v789_v27 = vld [vmem:[%s5410_s1 + $0x60] sm:$0xff]  ;;  %v798_v28 = vld [vmem:[%s5410_s1 + $0xa8] sm:$0xff]  ;;  %v3556_v31 = vpack.c.bf16 %v867_v22, %v859_v21 }
  0xaa   : > { %3521 = vmatpush1.bf16.msra.mxu0 %v3520_v46  ;;  %v806_v29 = vld [vmem:[%s5410_s1 + $0xe8] sm:$0xff]  ;;  %v4873_v30 = vld [vmem:[%s5409_s0] sm:$0x3]  ;;  %v3558_v32 = vpack.c.bf16 %v884_v24, %v876_v23  ;;  %v875_v33 = vld [vmem:[%s5410_s1 + $0x310] sm:$0xff]  ;;  %v3568_v36 = vpack.c.bf16 %v789_v27, %v781_v26 }
  0xab   : > { %3523 = vmatprep.subr.bf16.mxu0 %v3522_v51  ;;  %3553 = vmatpush1.bf16.msra.mxu1 %v3552_v18  ;;  %v883_v34 = vld [vmem:[%s5410_s1 + $0x350] sm:$0xff]  ;;  %v892_v35 = vld [vmem:[%s5410_s1 + $0x398] sm:$0xff]  ;;  %v3570_v38 = vpack.c.bf16 %v806_v29, %v798_v28  ;;  %v797_v39 = vld [vmem:[%s5410_s1 + $0xa0] sm:$0xff] }
  0xac   : > { %3555 = vmatprep.subr.bf16.mxu1 %v3554_v20  ;;  %v900_v37 = vld [vmem:[%s5410_s1 + $0x3d8] sm:$0xff]  ;;  %v805_v40 = vld [vmem:[%s5410_s1 + $0xe0] sm:$0xff]  ;;  %v814_v41 = vld [vmem:[%s5410_s1 + $0x128] sm:$0xff]  ;;  %v3560_v43 = vpack.c.bf16 %v883_v34, %v875_v33 }
  0xad   : > { %v822_v42 = vld [vmem:[%s5410_s1 + $0x168] sm:$0xff]  ;;  %v3562_v44 = vpack.c.bf16 %v900_v37, %v892_v35  ;;  %v891_v45 = vld [vmem:[%s5410_s1 + $0x390] sm:$0xff]  ;;  %v3572_v47 = vpack.c.bf16 %v805_v40, %v797_v39  ;;  %v813_v48 = vld [vmem:[%s5410_s1 + $0x120] sm:$0xff] }
  0xae   : > { %3525 = vmatpush1.bf16.msra.mxu0 %v3524_v58  ;;  %v899_v46 = vld [vmem:[%s5410_s1 + $0x3d0] sm:$0xff]  ;;  %v3574_v49 = vpack.c.bf16 %v822_v42, %v814_v41  ;;  %v821_v50 = vld [vmem:[%s5410_s1 + $0x160] sm:$0xff]  ;;  %v784_v51 = vld [vmem:[%s5410_s1 + $0x38] sm:$0xff] }
  0xaf   : > { %3527 = vmatprep.subr.bf16.mxu0 %v3526_v63  ;;  %3557 = vmatpush1.bf16.msra.mxu1 %v3556_v31  ;;  %v792_v52 = vld [vmem:[%s5410_s1 + $0x78] sm:$0xff]  ;;  %v830_v53 = vld [vmem:[%s5410_s1 + $0x1a8] sm:$0xff]  ;;  %v3564_v55 = vpack.c.bf16 %v899_v46, %v891_v45  ;;  %v3576_v56 = vpack.c.bf16 %v821_v50, %v813_v48  ;;  %v829_v57 = vld [vmem:[%s5410_s1 + $0x1a0] sm:$0xff] }
  0xb0   : > { %3559 = vmatprep.subr.bf16.mxu1 %v3558_v32  ;;  %v838_v54 = vld [vmem:[%s5410_s1 + $0x1e8] sm:$0xff]  ;;  %v3598_v58 = vpack.c.bf16 %v792_v52, %v784_v51  ;;  %v783_v59 = vld [vmem:[%s5410_s1 + $0x30] sm:$0xff]  ;;  %v837_v62 = vld [vmem:[%s5410_s1 + $0x1e0] sm:$0xff] }
  0xb1   : > { %v791_v60 = vld [vmem:[%s5410_s1 + $0x70] sm:$0xff]  ;;  %v3578_v61 = vpack.c.bf16 %v838_v54, %v830_v53  ;;  %v800_v63 = vld [vmem:[%s5410_s1 + $0xb8] sm:$0xff]  ;;  %v846_v1 = vld [vmem:[%s5410_s1 + $0x228] sm:$0xff]  ;;  %v3580_v8 = vpack.c.bf16 %v837_v62, %v829_v57 }
  0xb2   : > { %3529 = vmatpush1.bf16.msra.mxu0 %v3528_v6  ;;  %v808_v0 = vld [vmem:[%s5410_s1 + $0xf8] sm:$0xff]  ;;  %v854_v2 = vld [vmem:[%s5410_s1 + $0x268] sm:$0xff]  ;;  %v845_v3 = vld [vmem:[%s5410_s1 + $0x220] sm:$0xff]  ;;  %v3600_v5 = vpack.c.bf16 %v791_v60, %v783_v59 }
  0xb3   : > { %3531 = vmatprep.subr.bf16.mxu0 %v3530_v12  ;;  %3561 = vmatpush1.bf16.msra.mxu1 %v3560_v43  ;;  %v853_v4 = vld [vmem:[%s5410_s1 + $0x260] sm:$0xff]  ;;  %v799_v6 = vld [vmem:[%s5410_s1 + $0xb0] sm:$0xff]  ;;  %v3602_v9 = vpack.c.bf16 %v808_v0, %v800_v63  ;;  %v3582_v11 = vpack.c.bf16 %v854_v2, %v846_v1  ;;  %v816_v12 = vld [vmem:[%s5410_s1 + $0x138] sm:$0xff] }
  0xb4   : > { %3563 = vmatprep.subr.bf16.mxu1 %v3562_v44  ;;  %v807_v10 = vld [vmem:[%s5410_s1 + $0xf0] sm:$0xff]  ;;  %v824_v13 = vld [vmem:[%s5410_s1 + $0x178] sm:$0xff]  ;;  %v862_v14 = vld [vmem:[%s5410_s1 + $0x2a8] sm:$0xff]  ;;  %v3584_v20 = vpack.c.bf16 %v853_v4, %v845_v3 }
  0xb5   : > { %v870_v15 = vld [vmem:[%s5410_s1 + $0x2e8] sm:$0xff]  ;;  %v861_v16 = vld [vmem:[%s5410_s1 + $0x2a0] sm:$0xff]  ;;  %v3604_v18 = vpack.c.bf16 %v807_v10, %v799_v6  ;;  %v3606_v21 = vpack.c.bf16 %v824_v13, %v816_v12  ;;  %v823_v22 = vld [vmem:[%s5410_s1 + $0x170] sm:$0xff] }
  0xb6   : > { %3533 = vmatpush1.bf16.msra.mxu0 %v3532_v19  ;;  %v869_v17 = vld [vmem:[%s5410_s1 + $0x2e0] sm:$0xff]  ;;  %v815_v19 = vld [vmem:[%s5410_s1 + $0x130] sm:$0xff]  ;;  %v3586_v23 = vpack.c.bf16 %v870_v15, %v862_v14  ;;  %v832_v24 = vld [vmem:[%s5410_s1 + $0x1b8] sm:$0xff] }
  0xb7   : > { %3567 = vmatprep.subr.bf16.mxu0 %v3566_v25  ;;  %3565 = vmatpush1.bf16.msra.mxu1 %v3564_v55  ;;  %v840_v25 = vld [vmem:[%s5410_s1 + $0x1f8] sm:$0xff]  ;;  %v886_v26 = vld [vmem:[%s5410_s1 + $0x368] sm:$0xff]  ;;  %v877_v27 = vld [vmem:[%s5410_s1 + $0x320] sm:$0xff]  ;;  %v3608_v29 = vpack.c.bf16 %v823_v22, %v815_v19  ;;  %v3588_v32 = vpack.c.bf16 %v869_v17, %v861_v16 }
  0xb8   : > { %3599 = vmatprep.subr.bf16.mxu1 %v3598_v58  ;;  %v885_v28 = vld [vmem:[%s5410_s1 + $0x360] sm:$0xff]  ;;  %v831_v31 = vld [vmem:[%s5410_s1 + $0x1b0] sm:$0xff]  ;;  %v3610_v33 = vpack.c.bf16 %v840_v25, %v832_v24  ;;  %v856_v37 = vld [vmem:[%s5410_s1 + $0x278] sm:$0xff] }
  0xb9   : > { %1012 = vmatmul.mubr.f32.vlgmr.msra.gmra.mrb[0].mxu0 %v4873_v30  ;;  %v839_v34 = vld [vmem:[%s5410_s1 + $0x1f0] sm:$0xff]  ;;  %v902_v39 = vld [vmem:[%s5410_s1 + $0x3e8] sm:$0xff]  ;;  %v893_v40 = vld [vmem:[%s5410_s1 + $0x3a0] sm:$0xff]  ;;  %v3592_v44 = vpack.c.bf16 %v885_v28, %v877_v27 }
  0xba   : > { %3569 = vmatpush1.bf16.msra.mxu0 %v3568_v36  ;;  %1153 = vmatprep.mubr.f32.mxu0 %v4092_v7  ;;  %v848_v36 = vld [vmem:[%s5410_s1 + $0x238] sm:$0xff]  ;;  %v901_v41 = vld [vmem:[%s5410_s1 + $0x3e0] sm:$0xff]  ;;  %v3612_v42 = vpack.c.bf16 %v839_v34, %v831_v31  ;;  %v847_v43 = vld [vmem:[%s5410_s1 + $0x230] sm:$0xff] }
  0xbb   : > { %3571 = vmatprep.subr.bf16.mxu0 %v3570_v38  ;;  %1083 = vmatmul.mubr.f32.vlgmr.msra.gmra.mrb[0].mxu1 %v4873_v30  ;;  %v894_v38 = vld [vmem:[%s5410_s1 + $0x3a8] sm:$0xff]  ;;  %v3614_v45 = vpack.c.bf16 %v856_v37, %v848_v36  ;;  %v855_v46 = vld [vmem:[%s5410_s1 + $0x270] sm:$0xff]  ;;  %v864_v48 = vld [vmem:[%s5410_s1 + $0x2b8] sm:$0xff]  ;;  %v3596_v53 = vpack.c.bf16 %v901_v41, %v893_v40 }
  0xbc   : > { %3601 = vmatpush1.bf16.msra.mxu1 %v3600_v5  ;;  %1224 = vmatprep.mubr.f32.mxu1 %v4092_v7  ;;  %v878_v7 = vld [vmem:[%s5410_s1 + $0x328] sm:$0xff]  ;;  %v863_v50 = vld [vmem:[%s5410_s1 + $0x2b0] sm:$0xff]  ;;  %v3616_v51 = vpack.c.bf16 %v855_v46, %v847_v43  ;;  %v880_v55 = vld [vmem:[%s5410_s1 + $0x338] sm:$0xff] }
  0xbd   : > { %3603 = vmatprep.subr.bf16.mxu1 %v3602_v9  ;;  %v3590_v35 = vpack.c.bf16 %v886_v26, %v878_v7  ;;  %v871_v52 = vld [vmem:[%s5410_s1 + $0x2f0] sm:$0xff]  ;;  %v904_v0 = vld [vmem:[%s5410_s1 + $0x3f8] sm:$0xff] }
  0xbe   : > { %3573 = vmatpush1.bf16.msra.mxu0 %v3572_v47  ;;  %v3594_v47 = vpack.c.bf16 %v902_v39, %v894_v38  ;;  %v3686_v57 = vld [vmem:[%s4959_s28 + $0x4] ss:$16 sps:$4 sm:$0xff]   ;;  %v3620_v60 = vpack.c.bf16 %v871_v52, %v863_v50  ;;  %v3684_v63 = vld [vmem:[%s4959_s28] ss:$16 sps:$4 sm:$0xff]   ;;  %v3689_v10 = vld [vmem:[%s4959_s28 + $0xc] ss:$16 sps:$4 sm:$0xff]  }
  0xbf   : > { %3575 = vmatprep.subr.bf16.mxu0 %v3574_v49  ;;  %v872_v49 = vld [vmem:[%s5410_s1 + $0x2f8] sm:$0xff]  ;;  %v879_v58 = vld [vmem:[%s5410_s1 + $0x330] sm:$0xff] }
  0xc0   : > { %3605 = vmatpush1.bf16.msra.mxu1 %v3604_v18  ;;  %v3618_v54 = vpack.c.bf16 %v872_v49, %v864_v48  ;;  %v887_v59 = vld [vmem:[%s5410_s1 + $0x370] sm:$0xff]  ;;  %v3687_v13 = vld [vmem:[%s4959_s28 + $0x8] ss:$16 sps:$4 sm:$0xff]   ;;  %v3695_v14 = vld [vmem:[%s4959_s28 + $0x2c] ss:$16 sps:$4 sm:$0xff]  }
  0xc1   : > { %3607 = vmatprep.subr.bf16.mxu1 %v3606_v21  ;;  %v3692_v1 = vld [vmem:[%s4959_s28 + $0x24] ss:$16 sps:$4 sm:$0xff]   ;;  %v3624_v3 = vpack.c.bf16 %v887_v59, %v879_v58  ;;  %v3690_v6 = vld [vmem:[%s4959_s28 + $0x20] ss:$16 sps:$4 sm:$0xff]   ;;  %v3693_v17 = vld [vmem:[%s4959_s28 + $0x28] ss:$16 sps:$4 sm:$0xff]  }
  0xc2   : > { %3577 = vmatpush1.bf16.msra.mxu0 %v3576_v56  ;;  %v888_v56 = vld [vmem:[%s5410_s1 + $0x378] sm:$0xff]  ;;  %v895_v2 = vld [vmem:[%s5410_s1 + $0x3b0] sm:$0xff] }
  0xc3   : > { %3579 = vmatprep.subr.bf16.mxu0 %v3578_v61  ;;  %v896_v61 = vld [vmem:[%s5410_s1 + $0x3b8] sm:$0xff]  ;;  %v3622_v62 = vpack.c.bf16 %v888_v56, %v880_v55  ;;  %v903_v4 = vld [vmem:[%s5410_s1 + $0x3f0] sm:$0xff] }
  0xc4   : > { %3609 = vmatpush1.bf16.msra.mxu1 %v3608_v29  ;;  %v3626_v5 = vpack.c.bf16 %v904_v0, %v896_v61  ;;  %v3628_v9 = vpack.c.bf16 %v903_v4, %v895_v2  ;;  %v3704_v12 = vld [vmem:[%s4959_s28 + $0x64] ss:$16 sps:$4 sm:$0xff]   ;;  %v3702_v15 = vld [vmem:[%s4959_s28 + $0x60] ss:$16 sps:$4 sm:$0xff]   ;;  %v3701_v18 = vld [vmem:[%s4959_s28 + $0x4c] ss:$16 sps:$4 sm:$0xff]  }
  0xc5   : > { %3611 = vmatprep.subr.bf16.mxu1 %v3610_v33  ;;  %v3710_v16 = vld [vmem:[%s4959_s28 + $0x84] ss:$16 sps:$4 sm:$0xff]   ;;  %v3708_v19 = vld [vmem:[%s4959_s28 + $0x80] ss:$16 sps:$4 sm:$0xff]   ;;  %v3699_v21 = vld [vmem:[%s4959_s28 + $0x48] ss:$16 sps:$4 sm:$0xff]  }
  0xc6   : > { %3581 = vmatpush1.bf16.msra.mxu0 %v3580_v8  ;;  %v3698_v8 = vld [vmem:[%s4959_s28 + $0x44] ss:$16 sps:$4 sm:$0xff]   ;;  %v3707_v22 = vld [vmem:[%s4959_s28 + $0x6c] ss:$16 sps:$4 sm:$0xff]   ;;  %v3705_v24 = vld [vmem:[%s4959_s28 + $0x68] ss:$16 sps:$4 sm:$0xff]  }
  0xc7   : > { %3583 = vmatprep.subr.bf16.mxu0 %v3582_v11  ;;  %v3696_v11 = vld [vmem:[%s4959_s28 + $0x40] ss:$16 sps:$4 sm:$0xff]   ;;  %v3713_v25 = vld [vmem:[%s4959_s28 + $0x8c] ss:$16 sps:$4 sm:$0xff]   ;;  %v3728_v26 = vld [vmem:[%s4959_s28 + $0xe4] ss:$16 sps:$4 sm:$0xff]  }
  0xc8   : > { %3613 = vmatpush1.bf16.msra.mxu1 %v3612_v42  ;;  %v3720_v7 = vld [vmem:[%s4959_s28 + $0xc0] ss:$16 sps:$4 sm:$0xff]   ;;  %v3711_v27 = vld [vmem:[%s4959_s28 + $0x88] ss:$16 sps:$4 sm:$0xff]   ;;  %v3719_v28 = vld [vmem:[%s4959_s28 + $0xac] ss:$16 sps:$4 sm:$0xff]  }
  0xc9   : > { %3615 = vmatprep.subr.bf16.mxu1 %v3614_v45  ;;  %v3726_v29 = vld [vmem:[%s4959_s28 + $0xe0] ss:$16 sps:$4 sm:$0xff]   ;;  %v3734_v31 = vld [vmem:[%s4959_s28 + $0x104] ss:$16 sps:$4 sm:$0xff]   ;;  %v3725_v33 = vld [vmem:[%s4959_s28 + $0xcc] ss:$16 sps:$4 sm:$0xff]  }
  0xca   : > { %3585 = vmatpush1.bf16.msra.mxu0 %v3584_v20  ;;  %v3716_v20 = vld [vmem:[%s4959_s28 + $0xa4] ss:$16 sps:$4 sm:$0xff]   ;;  %v3732_v34 = vld [vmem:[%s4959_s28 + $0x100] ss:$16 sps:$4 sm:$0xff]   ;;  %v3723_v36 = vld [vmem:[%s4959_s28 + $0xc8] ss:$16 sps:$4 sm:$0xff]  }
  0xcb   : > { %3587 = vmatprep.subr.bf16.mxu0 %v3586_v23  ;;  %v3714_v23 = vld [vmem:[%s4959_s28 + $0xa0] ss:$16 sps:$4 sm:$0xff]   ;;  %v3731_v37 = vld [vmem:[%s4959_s28 + $0xec] ss:$16 sps:$4 sm:$0xff]   ;;  %v3746_v39 = vld [vmem:[%s4959_s28 + $0x144] ss:$16 sps:$4 sm:$0xff]  }
  0xcc   : > { %3617 = vmatpush1.bf16.msra.mxu1 %v3616_v51  ;;  %v3738_v38 = vld [vmem:[%s4959_s28 + $0x120] ss:$16 sps:$4 sm:$0xff]   ;;  %v3729_v40 = vld [vmem:[%s4959_s28 + $0xe8] ss:$16 sps:$4 sm:$0xff]   ;;  %v3737_v41 = vld [vmem:[%s4959_s28 + $0x10c] ss:$16 sps:$4 sm:$0xff]  }
  0xcd   : > { %3619 = vmatprep.subr.bf16.mxu1 %v3618_v54  ;;  %v3744_v42 = vld [vmem:[%s4959_s28 + $0x140] ss:$16 sps:$4 sm:$0xff]   ;;  %v3752_v43 = vld [vmem:[%s4959_s28 + $0x164] ss:$16 sps:$4 sm:$0xff]   ;;  %v3743_v45 = vld [vmem:[%s4959_s28 + $0x12c] ss:$16 sps:$4 sm:$0xff]  }
  0xce   : > { %3589 = vmatpush1.bf16.msra.mxu0 %v3588_v32  ;;  %v3717_v32 = vld [vmem:[%s4959_s28 + $0xa8] ss:$16 sps:$4 sm:$0xff]   ;;  %v3750_v46 = vld [vmem:[%s4959_s28 + $0x160] ss:$16 sps:$4 sm:$0xff]   ;;  %v3749_v49 = vld [vmem:[%s4959_s28 + $0x14c] ss:$16 sps:$4 sm:$0xff]  }
  0xcf   : > { %3591 = vmatprep.subr.bf16.mxu0 %v3590_v35  ;;  %v3740_v35 = vld [vmem:[%s4959_s28 + $0x124] ss:$16 sps:$4 sm:$0xff]   ;;  %v3741_v48 = vld [vmem:[%s4959_s28 + $0x128] ss:$16 sps:$4 sm:$0xff]   ;;  %v3756_v50 = vld [vmem:[%s4959_s28 + $0x180] ss:$16 sps:$4 sm:$0xff]  }
  0xd0   : > { %3621 = vmatpush1.bf16.msra.mxu1 %v3620_v60  ;;  %v3764_v51 = vld [vmem:[%s4959_s28 + $0x1a4] ss:$16 sps:$4 sm:$0xff]   ;;  %v3747_v52 = vld [vmem:[%s4959_s28 + $0x148] ss:$16 sps:$4 sm:$0xff]   ;;  %v3762_v54 = vld [vmem:[%s4959_s28 + $0x1a0] ss:$16 sps:$4 sm:$0xff]  }
  0xd1   : > { %3623 = vmatprep.subr.bf16.mxu1 %v3622_v62  ;;  %v3753_v55 = vld [vmem:[%s4959_s28 + $0x168] ss:$16 sps:$4 sm:$0xff]   ;;  %v3770_v56 = vld [vmem:[%s4959_s28 + $0x1c4] ss:$16 sps:$4 sm:$0xff]   ;;  %v3768_v58 = vld [vmem:[%s4959_s28 + $0x1c0] ss:$16 sps:$4 sm:$0xff]  }
  0xd2   : > { %3593 = vmatpush1.bf16.msra.mxu0 %v3592_v44  ;;  %v3735_v44 = vld [vmem:[%s4959_s28 + $0x108] ss:$16 sps:$4 sm:$0xff]   ;;  %v3776_v60 = vld [vmem:[%s4959_s28 + $0x1e4] ss:$16 sps:$4 sm:$0xff]   ;;  %v3767_v61 = vld [vmem:[%s4959_s28 + $0x1ac] ss:$16 sps:$4 sm:$0xff]  }
  0xd3   : > { %3595 = vmatprep.subr.bf16.mxu0 %v3594_v47  ;;  %v3758_v47 = vld [vmem:[%s4959_s28 + $0x184] ss:$16 sps:$4 sm:$0xff]   ;;  %v3759_v59 = vld [vmem:[%s4959_s28 + $0x188] ss:$16 sps:$4 sm:$0xff]   ;;  %v3774_v62 = vld [vmem:[%s4959_s28 + $0x1e0] ss:$16 sps:$4 sm:$0xff]  }
  0xd4   : > { %3625 = vmatpush1.bf16.msra.mxu1 %v3624_v3  ;;  %v3782_v0 = vld [vmem:[%s4959_s28 + $0x204] ss:$16 sps:$4 sm:$0xff]   ;;  %v3771_v2 = vld [vmem:[%s4959_s28 + $0x1c8] ss:$16 sps:$4 sm:$0xff]   ;;  %v3779_v3 = vld [vmem:[%s4959_s28 + $0x1ec] ss:$16 sps:$4 sm:$0xff]  }
  0xd5   : > { %3627 = vmatprep.subr.bf16.mxu1 %v3626_v5  ;;  %v3777_v4 = vld [vmem:[%s4959_s28 + $0x1e8] ss:$16 sps:$4 sm:$0xff]   ;;  %v3785_v5 = vld [vmem:[%s4959_s28 + $0x20c] ss:$16 sps:$4 sm:$0xff]  }
  0xd6   : > { %3597 = vmatpush1.bf16.msra.mxu0 %v3596_v53  ;;  %v3755_v53 = vld [vmem:[%s4959_s28 + $0x16c] ss:$16 sps:$4 sm:$0xff]  }
  0xd7   : > { %2805 = vmatprep.subr.bf16.mxu0 %v3686_v57  ;;  %v3761_v57 = vld [vmem:[%s4959_s28 + $0x18c] ss:$16 sps:$4 sm:$0xff]  }
  0xd8   : > { %3629 = vmatpush1.bf16.msra.mxu1 %v3628_v9 }
  0xd9   : > { %1154 = vmatmul.mubr.f32.vlgmr.msra.gmra.mrb[2].mxu0 %v4873_v30  ;;  %2969 = vmatprep.subr.bf16.mxu1 %v3689_v10  ;;  %v5148_v10 = vld [vmem:[%s5411_s2] sm:$0xff] }
  0xda   : > { %2806 = vmatpush1.bf16.msra.mxu0 %v3684_v63  ;;  %v3765_v63 = vld [vmem:[%s4959_s28 + $0x1a8] ss:$16 sps:$4 sm:$0xff]  }
  0xdb   : > { %2807 = vmatprep.subr.bf16.mxu0 %v3692_v1  ;;  %1225 = vmatmul.mubr.f32.vlgmr.msra.gmra.mrb[2].mxu1 %v4873_v30  ;;  %v3722_v30 = vld [vmem:[%s4959_s28 + $0xc4] ss:$16 sps:$4 sm:$0xff]   ;;  %v3773_v1 = vld [vmem:[%s4959_s28 + $0x1cc] ss:$16 sps:$4 sm:$0xff]  }
  0xdc   : > { %2970 = vmatpush1.bf16.msra.mxu1 %v3687_v13 }
  0xdd   : > { %2971 = vmatprep.subr.bf16.mxu1 %v3695_v14 }
  0xde   : > { %2808 = vmatpush1.bf16.msra.mxu0 %v3690_v6  ;;  %v907_v6 = vlaneseq }
  0xdf   : > { %2809 = vmatprep.subr.bf16.mxu0 %v3698_v8 }
  0xe0   : > { %2972 = vmatpush1.bf16.msra.mxu1 %v3693_v17  ;;  %v5142_v8 = vshrl.u32 %v907_v6, 7 }
  0xe1   : > { %2973 = vmatprep.subr.bf16.mxu1 %v3701_v18 }
  0xe2   : > { %2810 = vmatpush1.bf16.msra.mxu0 %v3696_v11  ;;  %v909_v9 = vsub.s32 0, %v5142_v8  ;;  %v913_v11 = vsub.s32 1, %v5142_v8 }
  0xe3   : > { %2811 = vmatprep.subr.bf16.mxu0 %v3704_v12 }
  0xe4   : > { %2974 = vmatpush1.bf16.msra.mxu1 %v3699_v21  ;;  %v910_v12 = vrot.slane %v5148_v10, %v909_v9  ;;  %v914_v13 = vrot.slane %v5148_v10, %v913_v11 }
  0xe5   : > { %2975 = vmatprep.subr.bf16.mxu1 %v3707_v22  ;;  %v3780_v22 = vld [vmem:[%s4959_s28 + $0x200] ss:$16 sps:$4 sm:$0xff]  }
  0xe6   : > { %2812 = vmatpush1.bf16.msra.mxu0 %v3702_v15 }
  0xe7   : > { %2813 = vmatprep.subr.bf16.mxu0 %v3710_v16 }
  0xe8   : > { %2976 = vmatpush1.bf16.msra.mxu1 %v3705_v24  ;;  %v3788_v24 = vld [vmem:[%s4959_s28 + $0x224] ss:$16 sps:$4 sm:$0xff]  }
  0xe9   : > { %2977 = vmatprep.subr.bf16.mxu1 %v3713_v25  ;;  %v3791_v25 = vld [vmem:[%s4959_s28 + $0x22c] ss:$16 sps:$4 sm:$0xff]  }
  0xea   : > { %2814 = vmatpush1.bf16.msra.mxu0 %v3708_v19 }
  0xeb   : > { %2815 = vmatprep.subr.bf16.mxu0 %v3716_v20  ;;  %v921_v20 = vsub.s32 3, %v5142_v8 }
  0xec   : > { %2978 = vmatpush1.bf16.msra.mxu1 %v3711_v27  ;;  %v3789_v27 = vld [vmem:[%s4959_s28 + $0x228] ss:$16 sps:$4 sm:$0xff]  }
  0xed   : > { %2979 = vmatprep.subr.bf16.mxu1 %v3719_v28  ;;  %v3794_v28 = vld [vmem:[%s4959_s28 + $0x244] ss:$16 sps:$4 sm:$0xff]  }
  0xee   : > { %2816 = vmatpush1.bf16.msra.mxu0 %v3714_v23  ;;  %v3783_v23 = vld [vmem:[%s4959_s28 + $0x208] ss:$16 sps:$4 sm:$0xff]  }
  0xef   : > { %2817 = vmatprep.subr.bf16.mxu0 %v3722_v30 }
  0xf0   : > { %2980 = vmatpush1.bf16.msra.mxu1 %v3717_v32 }
  0xf1   : > { %2981 = vmatprep.subr.bf16.mxu1 %v3725_v33 }
  0xf2   : > { %2818 = vmatpush1.bf16.msra.mxu0 %v3720_v7  ;;  %v922_v7 = vrot.slane %v5148_v10, %v921_v20 }
  0xf3   : > { %2819 = vmatprep.subr.bf16.mxu0 %v3728_v26  ;;  %v3786_v26 = vld [vmem:[%s4959_s28 + $0x220] ss:$16 sps:$4 sm:$0xff]  }
  0xf4   : > { %2982 = vmatpush1.bf16.msra.mxu1 %v3723_v36  ;;  %v3800_v36 = vld [vmem:[%s4959_s28 + $0x264] ss:$16 sps:$4 sm:$0xff]  }
  0xf5   : > { %2983 = vmatprep.subr.bf16.mxu1 %v3731_v37  ;;  %v3803_v37 = vld [vmem:[%s4959_s28 + $0x26c] ss:$16 sps:$4 sm:$0xff]  }
  0xf6   : > { %2820 = vmatpush1.bf16.msra.mxu0 %v3726_v29  ;;  %v3797_v29 = vld [vmem:[%s4959_s28 + $0x24c] ss:$16 sps:$4 sm:$0xff]  }
  0xf7   : > { %2821 = vmatprep.subr.bf16.mxu0 %v3734_v31 }
  0xf8   : > { %2984 = vmatpush1.bf16.msra.mxu1 %v3729_v40  ;;  %v3798_v40 = vld [vmem:[%s4959_s28 + $0x260] ss:$16 sps:$4 sm:$0xff]  }
  0xf9   : > { %2985 = vmatprep.subr.bf16.mxu1 %v3737_v41  ;;  %v3801_v41 = vld [vmem:[%s4959_s28 + $0x268] ss:$16 sps:$4 sm:$0xff]  }
  0xfa   : > { %2822 = vmatpush1.bf16.msra.mxu0 %v3732_v34  ;;  %v3792_v34 = vld [vmem:[%s4959_s28 + $0x240] ss:$16 sps:$4 sm:$0xff]  }
  0xfb   : > { %2823 = vmatprep.subr.bf16.mxu0 %v3740_v35  ;;  %v3795_v35 = vld [vmem:[%s4959_s28 + $0x248] ss:$16 sps:$4 sm:$0xff]  }
  0xfc   : > { %2986 = vmatpush1.bf16.msra.mxu1 %v3735_v44  ;;  %v3804_v44 = vld [vmem:[%s4959_s28 + $0x280] ss:$16 sps:$4 sm:$0xff]  }
  0xfd   : > { %2987 = vmatprep.subr.bf16.mxu1 %v3743_v45  ;;  %v3807_v45 = vld [vmem:[%s4959_s28 + $0x288] ss:$16 sps:$4 sm:$0xff]  }
  0xfe   : > { %2824 = vmatpush1.bf16.msra.mxu0 %v3738_v38 }
  0xff   : > { %2825 = vmatprep.subr.bf16.mxu0 %v3746_v39 }
 0x100   : > { %2988 = vmatpush1.bf16.msra.mxu1 %v3741_v48  ;;  %v3810_v48 = vld [vmem:[%s4959_s28 + $0x2a0] ss:$16 sps:$4 sm:$0xff]  }
 0x101   : > { %2989 = vmatprep.subr.bf16.mxu1 %v3749_v49  ;;  %v3813_v49 = vld [vmem:[%s4959_s28 + $0x2a8] ss:$16 sps:$4 sm:$0xff]  }
 0x102   : > { %2826 = vmatpush1.bf16.msra.mxu0 %v3744_v42  ;;  %v3806_v42 = vld [vmem:[%s4959_s28 + $0x284] ss:$16 sps:$4 sm:$0xff]  }
 0x103   : > { %2827 = vmatprep.subr.bf16.mxu0 %v3752_v43  ;;  %v3809_v43 = vld [vmem:[%s4959_s28 + $0x28c] ss:$16 sps:$4 sm:$0xff]  }
 0x104   : > { %2990 = vmatpush1.bf16.msra.mxu1 %v3747_v52  ;;  %v3816_v52 = vld [vmem:[%s4959_s28 + $0x2c0] ss:$16 sps:$4 sm:$0xff]  }
 0x105   : > { %2991 = vmatprep.subr.bf16.mxu1 %v3755_v53  ;;  %v3819_v53 = vld [vmem:[%s4959_s28 + $0x2c8] ss:$16 sps:$4 sm:$0xff]  }
 0x106   : > { %2828 = vmatpush1.bf16.msra.mxu0 %v3750_v46  ;;  %v3812_v46 = vld [vmem:[%s4959_s28 + $0x2a4] ss:$16 sps:$4 sm:$0xff]  }
 0x107   : > { %2829 = vmatprep.subr.bf16.mxu0 %v3758_v47  ;;  %v3815_v47 = vld [vmem:[%s4959_s28 + $0x2ac] ss:$16 sps:$4 sm:$0xff]  }
 0x108   : > { %2992 = vmatpush1.bf16.msra.mxu1 %v3753_v55  ;;  %v3827_v55 = vld [vmem:[%s4959_s28 + $0x2ec] ss:$16 sps:$4 sm:$0xff]  }
 0x109   : > { %2993 = vmatprep.subr.bf16.mxu1 %v3761_v57 }
 0x10a   : > { %2830 = vmatpush1.bf16.msra.mxu0 %v3756_v50  ;;  %v3818_v50 = vld [vmem:[%s4959_s28 + $0x2c4] ss:$16 sps:$4 sm:$0xff]  }
 0x10b   : > { %2831 = vmatprep.subr.bf16.mxu0 %v3764_v51  ;;  %v3821_v51 = vld [vmem:[%s4959_s28 + $0x2cc] ss:$16 sps:$4 sm:$0xff]  }
 0x10c   : > { %2994 = vmatpush1.bf16.msra.mxu1 %v3759_v59  ;;  %v3825_v59 = vld [vmem:[%s4959_s28 + $0x2e8] ss:$16 sps:$4 sm:$0xff]  }
 0x10d   : > { %2995 = vmatprep.subr.bf16.mxu1 %v3767_v61  ;;  %v3833_v61 = vld [vmem:[%s4959_s28 + $0x30c] ss:$16 sps:$4 sm:$0xff]  }
 0x10e   : > { %2832 = vmatpush1.bf16.msra.mxu0 %v3762_v54  ;;  %v3824_v54 = vld [vmem:[%s4959_s28 + $0x2e4] ss:$16 sps:$4 sm:$0xff]  }
 0x10f   : > { %2833 = vmatprep.subr.bf16.mxu0 %v3770_v56 }
 0x110   : > { %2996 = vmatpush1.bf16.msra.mxu1 %v3765_v63  ;;  %v3831_v63 = vld [vmem:[%s4959_s28 + $0x308] ss:$16 sps:$4 sm:$0xff]  }
 0x111   : > { %2997 = vmatprep.subr.bf16.mxu1 %v3773_v1  ;;  %v3839_v1 = vld [vmem:[%s4959_s28 + $0x32c] ss:$16 sps:$4 sm:$0xff]  }
 0x112   : > { %2834 = vmatpush1.bf16.msra.mxu0 %v3768_v58  ;;  %v3822_v58 = vld [vmem:[%s4959_s28 + $0x2e0] ss:$16 sps:$4 sm:$0xff]  }
 0x113   : > { %2835 = vmatprep.subr.bf16.mxu0 %v3776_v60  ;;  %v3830_v60 = vld [vmem:[%s4959_s28 + $0x304] ss:$16 sps:$4 sm:$0xff]  }
 0x114   : > { %2998 = vmatpush1.bf16.msra.mxu1 %v3771_v2  ;;  %v3834_v2 = vld [vmem:[%s4959_s28 + $0x320] ss:$16 sps:$4 sm:$0xff]  }
 0x115   : > { %2999 = vmatprep.subr.bf16.mxu1 %v3779_v3  ;;  %v3837_v3 = vld [vmem:[%s4959_s28 + $0x328] ss:$16 sps:$4 sm:$0xff]  }
 0x116   : > { %2836 = vmatpush1.bf16.msra.mxu0 %v3774_v62  ;;  %v3828_v62 = vld [vmem:[%s4959_s28 + $0x300] ss:$16 sps:$4 sm:$0xff]  }
 0x117   : > { %2846 = vmatprep.subr.bf16.mxu0 %v3782_v0  ;;  %v3836_v0 = vld [vmem:[%s4959_s28 + $0x324] ss:$16 sps:$4 sm:$0xff]  }
 0x118   : > { %3000 = vmatpush1.bf16.msra.mxu1 %v3777_v4  ;;  %v3842_v4 = vld [vmem:[%s4959_s28 + $0x344] ss:$16 sps:$4 sm:$0xff]  }
 0x119   : > { %3010 = vmatprep.subr.bf16.mxu1 %v3785_v5  ;;  %v3845_v5 = vld [vmem:[%s4959_s28 + $0x34c] ss:$16 sps:$4 sm:$0xff]  }
 0x18c   : > { %v1013_v14 = vpop.f32.mrb[0].mxu0 }
 0x18d   : > { %v1014_v15 = vadd.f32 %v1013_v14, %v910_v12  ;;  %v1015_v16 = vpop.f32.mrb[1].mxu0  ;;  %v3843_v14 = vld [vmem:[%s4959_s28 + $0x348] ss:$16 sps:$4 sm:$0xff]  }
 0x18e   : > { %v1016_v17 = vadd.f32 %v1015_v16, %v914_v13  ;;  %v5169_v31 = vpop.f32.mrb[0].mxu1  ;;  %v3840_v13 = vld [vmem:[%s4959_s28 + $0x340] ss:$16 sps:$4 sm:$0xff]   ;;  %v3851_v16 = vld [vmem:[%s4959_s28 + $0x36c] ss:$16 sps:$4 sm:$0xff]  }
 0x18f   : > { %v1231_v18 = vmax.f32 %v1014_v15, 0.0  ;;  %v1086_v32 = vpop.f32.mrb[1].mxu1  ;;  %v3848_v15 = vld [vmem:[%s4959_s28 + $0x364] ss:$16 sps:$4 sm:$0xff]  }
 0x190   : > { %v1232_v19 = vmax.f32 %v1016_v17, 0.0  ;;  %v1087_v33 = vadd.f32 %v1086_v32, %v922_v7  ;;  %v3846_v17 = vld [vmem:[%s4959_s28 + $0x360] ss:$16 sps:$4 sm:$0xff]   ;;  %v929_v7 = vsub.s32 5, %v5142_v8  ;;  %v3869_v32 = vld [vmem:[%s4959_s28 + $0x3cc] ss:$16 sps:$4 sm:$0xff]  }
 0x191   : > { %v1239_v30 = vpack.c.bf16 %v1231_v18, %v1231_v18  ;;  %v3849_v18 = vld [vmem:[%s4959_s28 + $0x368] ss:$16 sps:$4 sm:$0xff]  }
 0x192   : > { %v1240_v21 = vpack.c.bf16 %v1232_v19, %v1232_v19  ;;  %v1234_v38 = vmax.f32 %v1087_v33, 0.0  ;;  %v3854_v19 = vld [vmem:[%s4959_s28 + $0x384] ss:$16 sps:$4 sm:$0xff]   ;;  %v930_v33 = vrot.slane %v5148_v10, %v929_v7 }
 0x193   : > { %v3932_v7 = vld [vmem:[%s4959_s28 + $0x524] ss:$16 sps:$4 sm:$0xff]  }
 0x194   : > { %2837 = vmatprep.mubr.bf16.mxu0 %v1240_v21  ;;  %3001 = vmatprep.mubr.bf16.mxu1 %v1240_v21  ;;  %v1242_v39 = vpack.c.bf16 %v1234_v38, %v1234_v38  ;;  %v3857_v21 = vld [vmem:[%s4959_s28 + $0x38c] ss:$16 sps:$4 sm:$0xff]  }
 0x195   : > { %2838 = vmatmul.mubr.bf16.vlgmr.msra.gmra.mrb[4].mxu0 %v1239_v30  ;;  %3002 = vmatmul.mubr.bf16.vlgmr.msra.gmra.mrb[4].mxu1 %v1239_v30  ;;  %v3855_v30 = vld [vmem:[%s4959_s28 + $0x388] ss:$16 sps:$4 sm:$0xff]   ;;  %v3875_v38 = vld [vmem:[%s4959_s28 + $0x3ec] ss:$16 sps:$4 sm:$0xff]  }
 0x196   : > { %2847 = vmatpush1.bf16.msra.mxu0 %v3780_v22  ;;  %3011 = vmatpush1.bf16.msra.mxu1 %v3783_v23  ;;  %v917_v22 = vsub.s32 2, %v5142_v8  ;;  %v3852_v23 = vld [vmem:[%s4959_s28 + $0x380] ss:$16 sps:$4 sm:$0xff]  }
 0x197   : > { %2848 = vmatprep.subr.bf16.mxu0 %v3788_v24  ;;  %3012 = vmatprep.subr.bf16.mxu1 %v3791_v25  ;;  %v3860_v24 = vld [vmem:[%s4959_s28 + $0x3a4] ss:$16 sps:$4 sm:$0xff]   ;;  %v3863_v25 = vld [vmem:[%s4959_s28 + $0x3ac] ss:$16 sps:$4 sm:$0xff]  }
 0x198   : > { %2878 = vmatprep.mubr.bf16.mxu0 %v1242_v39  ;;  %3042 = vmatprep.mubr.bf16.mxu1 %v1242_v39 }
 0x19a   : > { %2849 = vmatpush1.bf16.msra.mxu0 %v3786_v26  ;;  %3013 = vmatpush1.bf16.msra.mxu1 %v3789_v27  ;;  %v918_v26 = vrot.slane %v5148_v10, %v917_v22  ;;  %v3858_v27 = vld [vmem:[%s4959_s28 + $0x3a0] ss:$16 sps:$4 sm:$0xff]  }
 0x19b   : > { %2850 = vmatprep.subr.bf16.mxu0 %v3794_v28  ;;  %3014 = vmatprep.subr.bf16.mxu1 %v3797_v29  ;;  %v3861_v28 = vld [vmem:[%s4959_s28 + $0x3a8] ss:$16 sps:$4 sm:$0xff]   ;;  %v3866_v29 = vld [vmem:[%s4959_s28 + $0x3c4] ss:$16 sps:$4 sm:$0xff]  }
 0x19e   : > { %2851 = vmatpush1.bf16.msra.mxu0 %v3792_v34  ;;  %3015 = vmatpush1.bf16.msra.mxu1 %v3795_v35  ;;  %v1085_v34 = vadd.f32 %v5169_v31, %v918_v26  ;;  %v3864_v35 = vld [vmem:[%s4959_s28 + $0x3c0] ss:$16 sps:$4 sm:$0xff]   ;;  %v3935_v26 = vld [vmem:[%s4959_s28 + $0x52c] ss:$16 sps:$4 sm:$0xff]  }
 0x19f   : > { %2852 = vmatprep.subr.bf16.mxu0 %v3800_v36  ;;  %3016 = vmatprep.subr.bf16.mxu1 %v3803_v37  ;;  %v3867_v36 = vld [vmem:[%s4959_s28 + $0x3c8] ss:$16 sps:$4 sm:$0xff]   ;;  %v3872_v37 = vld [vmem:[%s4959_s28 + $0x3e4] ss:$16 sps:$4 sm:$0xff]   ;;  %v3870_v31 = vld [vmem:[%s4959_s28 + $0x3e0] ss:$16 sps:$4 sm:$0xff]  }
 0x1a2   : > { %2853 = vmatpush1.bf16.msra.mxu0 %v3798_v40  ;;  %3017 = vmatpush1.bf16.msra.mxu1 %v3801_v41  ;;  %v1233_v40 = vmax.f32 %v1085_v34, 0.0  ;;  %v3873_v41 = vld [vmem:[%s4959_s28 + $0x3e8] ss:$16 sps:$4 sm:$0xff]  }
 0x1a3   : > { %2854 = vmatprep.subr.bf16.mxu0 %v3806_v42  ;;  %3018 = vmatprep.subr.bf16.mxu1 %v3809_v43  ;;  %v3878_v42 = vld [vmem:[%s4959_s28 + $0x404] ss:$16 sps:$4 sm:$0xff]   ;;  %v3881_v43 = vld [vmem:[%s4959_s28 + $0x40c] ss:$16 sps:$4 sm:$0xff]   ;;  %v3939_v34 = vld [vmem:[%s4959_s28 + $0x548] ss:$16 sps:$4 sm:$0xff]  }
 0x1a6   : > { %2855 = vmatpush1.bf16.msra.mxu0 %v3804_v44  ;;  %3019 = vmatpush1.bf16.msra.mxu1 %v3807_v45  ;;  %v1241_v45 = vpack.c.bf16 %v1233_v40, %v1233_v40  ;;  %v3953_v40 = vld [vmem:[%s4959_s28 + $0x58c] ss:$16 sps:$4 sm:$0xff]  }
 0x1a7   : > { %2856 = vmatprep.subr.bf16.mxu0 %v3812_v46  ;;  %3020 = vmatprep.subr.bf16.mxu1 %v3815_v47  ;;  %v3876_v46 = vld [vmem:[%s4959_s28 + $0x400] ss:$16 sps:$4 sm:$0xff]   ;;  %v3879_v47 = vld [vmem:[%s4959_s28 + $0x408] ss:$16 sps:$4 sm:$0xff]  }
 0x1aa   : > { %2857 = vmatpush1.bf16.msra.mxu0 %v3810_v48  ;;  %3021 = vmatpush1.bf16.msra.mxu1 %v3813_v49  ;;  %v3884_v48 = vld [vmem:[%s4959_s28 + $0x424] ss:$16 sps:$4 sm:$0xff]   ;;  %v3887_v49 = vld [vmem:[%s4959_s28 + $0x42c] ss:$16 sps:$4 sm:$0xff]  }
 0x1ab   : > { %2858 = vmatprep.subr.bf16.mxu0 %v3818_v50  ;;  %3022 = vmatprep.subr.bf16.mxu1 %v3821_v51  ;;  %v3882_v51 = vld [vmem:[%s4959_s28 + $0x420] ss:$16 sps:$4 sm:$0xff]  }
 0x1ac   : > { %v5191_v56 = vpop.f32.mrb[2].mxu0 }
 0x1ad   : > { %v5193_v57 = vpop.f32.mrb[3].mxu0 }
 0x1ae   : > { %2859 = vmatpush1.bf16.msra.mxu0 %v3816_v52  ;;  %3023 = vmatpush1.bf16.msra.mxu1 %v3819_v53  ;;  %v5207_v6 = vpop.f32.mrb[2].mxu1  ;;  %v1158_v39 = vadd.f32 %v5193_v57, %v930_v33  ;;  %v3885_v52 = vld [vmem:[%s4959_s28 + $0x428] ss:$16 sps:$4 sm:$0xff]   ;;  %v3890_v53 = vld [vmem:[%s4959_s28 + $0x444] ss:$16 sps:$4 sm:$0xff]  }
 0x1af   : > { %2860 = vmatprep.subr.bf16.mxu0 %v3824_v54  ;;  %3024 = vmatprep.subr.bf16.mxu1 %v3827_v55  ;;  %v5209_v12 = vpop.f32.mrb[3].mxu1  ;;  %v3893_v54 = vld [vmem:[%s4959_s28 + $0x44c] ss:$16 sps:$4 sm:$0xff]   ;;  %v3888_v55 = vld [vmem:[%s4959_s28 + $0x440] ss:$16 sps:$4 sm:$0xff]  }
 0x1b0   : > { %v1236_v44 = vmax.f32 %v1158_v39, 0.0  ;;  %v3891_v57 = vld [vmem:[%s4959_s28 + $0x448] ss:$16 sps:$4 sm:$0xff]   ;;  %v3936_v33 = vld [vmem:[%s4959_s28 + $0x540] ss:$16 sps:$4 sm:$0xff]  }
 0x1b1   : > { %v3950_v39 = vld [vmem:[%s4959_s28 + $0x584] ss:$16 sps:$4 sm:$0xff]  }
 0x1b2   : > { %2861 = vmatpush1.bf16.msra.mxu0 %v3822_v58  ;;  %3025 = vmatpush1.bf16.msra.mxu1 %v3825_v59  ;;  %v1244_v50 = vpack.c.bf16 %v1236_v44, %v1236_v44  ;;  %v3896_v58 = vld [vmem:[%s4959_s28 + $0x464] ss:$16 sps:$4 sm:$0xff]   ;;  %v3899_v59 = vld [vmem:[%s4959_s28 + $0x46c] ss:$16 sps:$4 sm:$0xff]  }
 0x1b3   : > { %2862 = vmatprep.subr.bf16.mxu0 %v3830_v60  ;;  %3026 = vmatprep.subr.bf16.mxu1 %v3833_v61  ;;  %v3894_v60 = vld [vmem:[%s4959_s28 + $0x460] ss:$16 sps:$4 sm:$0xff]   ;;  %v3897_v61 = vld [vmem:[%s4959_s28 + $0x468] ss:$16 sps:$4 sm:$0xff]   ;;  %v3959_v44 = vld [vmem:[%s4959_s28 + $0x5ac] ss:$16 sps:$4 sm:$0xff]  }
 0x1b6   : > { %2863 = vmatpush1.bf16.msra.mxu0 %v3828_v62  ;;  %3027 = vmatpush1.bf16.msra.mxu1 %v3831_v63  ;;  %v3902_v62 = vld [vmem:[%s4959_s28 + $0x484] ss:$16 sps:$4 sm:$0xff]   ;;  %v3905_v63 = vld [vmem:[%s4959_s28 + $0x48c] ss:$16 sps:$4 sm:$0xff]  }
 0x1b7   : > { %2864 = vmatprep.subr.bf16.mxu0 %v3836_v0  ;;  %3028 = vmatprep.subr.bf16.mxu1 %v3839_v1  ;;  %v3900_v0 = vld [vmem:[%s4959_s28 + $0x480] ss:$16 sps:$4 sm:$0xff]   ;;  %v3903_v1 = vld [vmem:[%s4959_s28 + $0x488] ss:$16 sps:$4 sm:$0xff]  }
 0x1ba   : > { %2865 = vmatpush1.bf16.msra.mxu0 %v3834_v2  ;;  %3029 = vmatpush1.bf16.msra.mxu1 %v3837_v3  ;;  %v3908_v2 = vld [vmem:[%s4959_s28 + $0x4a4] ss:$16 sps:$4 sm:$0xff]   ;;  %v3911_v3 = vld [vmem:[%s4959_s28 + $0x4ac] ss:$16 sps:$4 sm:$0xff]  }
 0x1bb   : > { %2866 = vmatprep.subr.bf16.mxu0 %v3842_v4  ;;  %3030 = vmatprep.subr.bf16.mxu1 %v3845_v5  ;;  %v3906_v4 = vld [vmem:[%s4959_s28 + $0x4a0] ss:$16 sps:$4 sm:$0xff]   ;;  %v3909_v5 = vld [vmem:[%s4959_s28 + $0x4a8] ss:$16 sps:$4 sm:$0xff]  }
 0x1be   : > { %2867 = vmatpush1.bf16.msra.mxu0 %v3840_v13  ;;  %3031 = vmatpush1.bf16.msra.mxu1 %v3843_v14  ;;  %v3914_v13 = vld [vmem:[%s4959_s28 + $0x4c4] ss:$16 sps:$4 sm:$0xff]   ;;  %v3917_v14 = vld [vmem:[%s4959_s28 + $0x4cc] ss:$16 sps:$4 sm:$0xff]  }
 0x1bf   : > { %2868 = vmatprep.subr.bf16.mxu0 %v3848_v15  ;;  %3032 = vmatprep.subr.bf16.mxu1 %v3851_v16  ;;  %v3912_v15 = vld [vmem:[%s4959_s28 + $0x4c0] ss:$16 sps:$4 sm:$0xff]   ;;  %v3915_v16 = vld [vmem:[%s4959_s28 + $0x4c8] ss:$16 sps:$4 sm:$0xff]  }
 0x1c2   : > { %2869 = vmatpush1.bf16.msra.mxu0 %v3846_v17  ;;  %3033 = vmatpush1.bf16.msra.mxu1 %v3849_v18  ;;  %v3920_v17 = vld [vmem:[%s4959_s28 + $0x4e4] ss:$16 sps:$4 sm:$0xff]   ;;  %v3923_v18 = vld [vmem:[%s4959_s28 + $0x4ec] ss:$16 sps:$4 sm:$0xff]  }
 0x1c3   : > { %2870 = vmatprep.subr.bf16.mxu0 %v3854_v19  ;;  %3034 = vmatprep.subr.bf16.mxu1 %v3857_v21  ;;  %v3918_v19 = vld [vmem:[%s4959_s28 + $0x4e0] ss:$16 sps:$4 sm:$0xff]   ;;  %v3921_v21 = vld [vmem:[%s4959_s28 + $0x4e8] ss:$16 sps:$4 sm:$0xff]  }
 0x1c6   : > { %2871 = vmatpush1.bf16.msra.mxu0 %v3852_v23  ;;  %3035 = vmatpush1.bf16.msra.mxu1 %v3855_v30  ;;  %v3926_v23 = vld [vmem:[%s4959_s28 + $0x504] ss:$16 sps:$4 sm:$0xff]   ;;  %v3929_v30 = vld [vmem:[%s4959_s28 + $0x50c] ss:$16 sps:$4 sm:$0xff]  }
 0x1c7   : > { %2872 = vmatprep.subr.bf16.mxu0 %v3860_v24  ;;  %3036 = vmatprep.subr.bf16.mxu1 %v3863_v25  ;;  %v3924_v24 = vld [vmem:[%s4959_s28 + $0x500] ss:$16 sps:$4 sm:$0xff]   ;;  %v3927_v25 = vld [vmem:[%s4959_s28 + $0x508] ss:$16 sps:$4 sm:$0xff]  }
 0x1ca   : > { %2873 = vmatpush1.bf16.msra.mxu0 %v3858_v27  ;;  %3037 = vmatpush1.bf16.msra.mxu1 %v3861_v28  ;;  %v3930_v27 = vld [vmem:[%s4959_s28 + $0x520] ss:$16 sps:$4 sm:$0xff]   ;;  %v3933_v28 = vld [vmem:[%s4959_s28 + $0x528] ss:$16 sps:$4 sm:$0xff]  }
 0x1cb   : > { %2874 = vmatprep.subr.bf16.mxu0 %v3866_v29  ;;  %3038 = vmatprep.subr.bf16.mxu1 %v3869_v32  ;;  %v3938_v29 = vld [vmem:[%s4959_s28 + $0x544] ss:$16 sps:$4 sm:$0xff]   ;;  %v3941_v32 = vld [vmem:[%s4959_s28 + $0x54c] ss:$16 sps:$4 sm:$0xff]  }
 0x1ce   : > { %2875 = vmatpush1.bf16.msra.mxu0 %v3864_v35  ;;  %3039 = vmatpush1.bf16.msra.mxu1 %v3867_v36  ;;  %v3944_v35 = vld [vmem:[%s4959_s28 + $0x564] ss:$16 sps:$4 sm:$0xff]   ;;  %v3947_v36 = vld [vmem:[%s4959_s28 + $0x56c] ss:$16 sps:$4 sm:$0xff]  }
 0x1cf   : > { %2876 = vmatprep.subr.bf16.mxu0 %v3872_v37  ;;  %3040 = vmatprep.subr.bf16.mxu1 %v3875_v38  ;;  %v3942_v37 = vld [vmem:[%s4959_s28 + $0x560] ss:$16 sps:$4 sm:$0xff]   ;;  %v3945_v38 = vld [vmem:[%s4959_s28 + $0x568] ss:$16 sps:$4 sm:$0xff]  }
 0x1d2   : > { %2877 = vmatpush1.bf16.msra.mxu0 %v3870_v31  ;;  %3041 = vmatpush1.bf16.msra.mxu1 %v3873_v41  ;;  %v925_v31 = vsub.s32 4, %v5142_v8  ;;  %v3948_v41 = vld [vmem:[%s4959_s28 + $0x580] ss:$16 sps:$4 sm:$0xff]  }
 0x1d3   : > { %2887 = vmatprep.subr.bf16.mxu0 %v3878_v42  ;;  %3051 = vmatprep.subr.bf16.mxu1 %v3881_v43  ;;  %v3951_v42 = vld [vmem:[%s4959_s28 + $0x588] ss:$16 sps:$4 sm:$0xff]   ;;  %v3956_v43 = vld [vmem:[%s4959_s28 + $0x5a4] ss:$16 sps:$4 sm:$0xff]  }
 0x1d5   : > { %2879 = vmatmul.mubr.bf16.vlgmr.msra.gmra.mrb[4].mxu0 %v1241_v45  ;;  %3043 = vmatmul.mubr.bf16.vlgmr.msra.gmra.mrb[4].mxu1 %v1241_v45  ;;  %v937_v45 = vsub.s32 7, %v5142_v8 }
 0x1d6   : > { %2888 = vmatpush1.bf16.msra.mxu0 %v3876_v46  ;;  %3052 = vmatpush1.bf16.msra.mxu1 %v3879_v47  ;;  %v926_v46 = vrot.slane %v5148_v10, %v925_v31  ;;  %v3954_v47 = vld [vmem:[%s4959_s28 + $0x5a0] ss:$16 sps:$4 sm:$0xff]   ;;  %v4025_v31 = vld [vmem:[%s4959_s28 + $0x70c] ss:$16 sps:$4 sm:$0xff]  }
 0x1d7   : > { %2889 = vmatprep.subr.bf16.mxu0 %v3884_v48  ;;  %3053 = vmatprep.subr.bf16.mxu1 %v3887_v49  ;;  %v3957_v48 = vld [vmem:[%s4959_s28 + $0x5a8] ss:$16 sps:$4 sm:$0xff]   ;;  %v3962_v49 = vld [vmem:[%s4959_s28 + $0x5c4] ss:$16 sps:$4 sm:$0xff]  }
 0x1d8   : > { %2919 = vmatprep.mubr.bf16.mxu0 %v1244_v50  ;;  %3083 = vmatprep.mubr.bf16.mxu1 %v1244_v50  ;;  %v3965_v50 = vld [vmem:[%s4959_s28 + $0x5cc] ss:$16 sps:$4 sm:$0xff]  }
 0x1da   : > { %2890 = vmatpush1.bf16.msra.mxu0 %v3882_v51  ;;  %3054 = vmatpush1.bf16.msra.mxu1 %v3885_v52  ;;  %v938_v51 = vrot.slane %v5148_v10, %v937_v45  ;;  %v1156_v52 = vadd.f32 %v5191_v56, %v926_v46  ;;  %v3966_v56 = vld [vmem:[%s4959_s28 + $0x5e0] ss:$16 sps:$4 sm:$0xff]   ;;  %v4029_v46 = vld [vmem:[%s4959_s28 + $0x728] ss:$16 sps:$4 sm:$0xff]  }
 0x1db   : > { %2891 = vmatprep.subr.bf16.mxu0 %v3890_v53  ;;  %3055 = vmatprep.subr.bf16.mxu1 %v3893_v54  ;;  %v3960_v53 = vld [vmem:[%s4959_s28 + $0x5c0] ss:$16 sps:$4 sm:$0xff]   ;;  %v3963_v54 = vld [vmem:[%s4959_s28 + $0x5c8] ss:$16 sps:$4 sm:$0xff]  }
 0x1dc   : > { %v4026_v45 = vld [vmem:[%s4959_s28 + $0x720] ss:$16 sps:$4 sm:$0xff]  }
 0x1de   : > { %2892 = vmatpush1.bf16.msra.mxu0 %v3888_v55  ;;  %3056 = vmatpush1.bf16.msra.mxu1 %v3891_v57  ;;  %v3968_v55 = vld [vmem:[%s4959_s28 + $0x5e4] ss:$16 sps:$4 sm:$0xff]   ;;  %v3971_v57 = vld [vmem:[%s4959_s28 + $0x5ec] ss:$16 sps:$4 sm:$0xff]  }
 0x1df   : > { %2893 = vmatprep.subr.bf16.mxu0 %v3896_v58  ;;  %3057 = vmatprep.subr.bf16.mxu1 %v3899_v59  ;;  %v1229_v58 = vadd.f32 %v5209_v12, %v938_v51  ;;  %v1235_v59 = vmax.f32 %v1156_v52, 0.0  ;;  %v3975_v12 = vld [vmem:[%s4959_s28 + $0x608] ss:$16 sps:$4 sm:$0xff]   ;;  %v4040_v51 = vld [vmem:[%s4959_s28 + $0x764] ss:$16 sps:$4 sm:$0xff]  }
 0x1e0   : > { %v4043_v52 = vld [vmem:[%s4959_s28 + $0x76c] ss:$16 sps:$4 sm:$0xff]  }
 0x1e2   : > { %2894 = vmatpush1.bf16.msra.mxu0 %v3894_v60  ;;  %3058 = vmatpush1.bf16.msra.mxu1 %v3897_v61  ;;  %v3969_v60 = vld [vmem:[%s4959_s28 + $0x5e8] ss:$16 sps:$4 sm:$0xff]   ;;  %v3974_v61 = vld [vmem:[%s4959_s28 + $0x604] ss:$16 sps:$4 sm:$0xff]  }
 0x1e3   : > { %2895 = vmatprep.subr.bf16.mxu0 %v3902_v62  ;;  %3059 = vmatprep.subr.bf16.mxu1 %v3905_v63  ;;  %v3977_v62 = vld [vmem:[%s4959_s28 + $0x60c] ss:$16 sps:$4 sm:$0xff]   ;;  %v1238_v63 = vmax.f32 %v1229_v58, 0.0  ;;  %v4044_v58 = vld [vmem:[%s4959_s28 + $0x780] ss:$16 sps:$4 sm:$0xff]  }
 0x1e6   : > { %2896 = vmatpush1.bf16.msra.mxu0 %v3900_v0  ;;  %3060 = vmatpush1.bf16.msra.mxu1 %v3903_v1  ;;  %v1243_v0 = vpack.c.bf16 %v1235_v59, %v1235_v59  ;;  %v3972_v1 = vld [vmem:[%s4959_s28 + $0x600] ss:$16 sps:$4 sm:$0xff]   ;;  %v4047_v59 = vld [vmem:[%s4959_s28 + $0x788] ss:$16 sps:$4 sm:$0xff]  }
 0x1e7   : > { %2897 = vmatprep.subr.bf16.mxu0 %v3908_v2  ;;  %3061 = vmatprep.subr.bf16.mxu1 %v3911_v3  ;;  %v3980_v2 = vld [vmem:[%s4959_s28 + $0x624] ss:$16 sps:$4 sm:$0xff]   ;;  %v3983_v3 = vld [vmem:[%s4959_s28 + $0x62c] ss:$16 sps:$4 sm:$0xff]  }
 0x1ea   : > { %2898 = vmatpush1.bf16.msra.mxu0 %v3906_v4  ;;  %3062 = vmatpush1.bf16.msra.mxu1 %v3909_v5  ;;  %v1246_v4 = vpack.c.bf16 %v1238_v63, %v1238_v63  ;;  %v3978_v5 = vld [vmem:[%s4959_s28 + $0x620] ss:$16 sps:$4 sm:$0xff]   ;;  %v4053_v63 = vld [vmem:[%s4959_s28 + $0x7a8] ss:$16 sps:$4 sm:$0xff]  }
 0x1eb   : > { %2899 = vmatprep.subr.bf16.mxu0 %v3914_v13  ;;  %3063 = vmatprep.subr.bf16.mxu1 %v3917_v14  ;;  %v3981_v13 = vld [vmem:[%s4959_s28 + $0x628] ss:$16 sps:$4 sm:$0xff]   ;;  %v3986_v14 = vld [vmem:[%s4959_s28 + $0x644] ss:$16 sps:$4 sm:$0xff]  }
 0x1ee   : > { %2900 = vmatpush1.bf16.msra.mxu0 %v3912_v15  ;;  %3064 = vmatpush1.bf16.msra.mxu1 %v3915_v16  ;;  %v3989_v15 = vld [vmem:[%s4959_s28 + $0x64c] ss:$16 sps:$4 sm:$0xff]   ;;  %v3984_v16 = vld [vmem:[%s4959_s28 + $0x640] ss:$16 sps:$4 sm:$0xff]  }
 0x1ef   : > { %2901 = vmatprep.subr.bf16.mxu0 %v3920_v17  ;;  %3065 = vmatprep.subr.bf16.mxu1 %v3923_v18  ;;  %v3987_v17 = vld [vmem:[%s4959_s28 + $0x648] ss:$16 sps:$4 sm:$0xff]   ;;  %v3992_v18 = vld [vmem:[%s4959_s28 + $0x664] ss:$16 sps:$4 sm:$0xff]  }
 0x1f2   : > { %2902 = vmatpush1.bf16.msra.mxu0 %v3918_v19  ;;  %3066 = vmatpush1.bf16.msra.mxu1 %v3921_v21  ;;  %v3995_v19 = vld [vmem:[%s4959_s28 + $0x66c] ss:$16 sps:$4 sm:$0xff]   ;;  %v3990_v21 = vld [vmem:[%s4959_s28 + $0x660] ss:$16 sps:$4 sm:$0xff]  }
 0x1f3   : > { %2903 = vmatprep.subr.bf16.mxu0 %v3926_v23  ;;  %3067 = vmatprep.subr.bf16.mxu1 %v3929_v30  ;;  %v3993_v23 = vld [vmem:[%s4959_s28 + $0x668] ss:$16 sps:$4 sm:$0xff]   ;;  %v3998_v30 = vld [vmem:[%s4959_s28 + $0x684] ss:$16 sps:$4 sm:$0xff]  }
 0x1f6   : > { %2904 = vmatpush1.bf16.msra.mxu0 %v3924_v24  ;;  %3068 = vmatpush1.bf16.msra.mxu1 %v3927_v25  ;;  %v4001_v24 = vld [vmem:[%s4959_s28 + $0x68c] ss:$16 sps:$4 sm:$0xff]   ;;  %v3996_v25 = vld [vmem:[%s4959_s28 + $0x680] ss:$16 sps:$4 sm:$0xff]  }
 0x1f7   : > { %2905 = vmatprep.subr.bf16.mxu0 %v3932_v7  ;;  %3069 = vmatprep.subr.bf16.mxu1 %v3935_v26  ;;  %v3999_v7 = vld [vmem:[%s4959_s28 + $0x688] ss:$16 sps:$4 sm:$0xff]   ;;  %v4004_v26 = vld [vmem:[%s4959_s28 + $0x6a4] ss:$16 sps:$4 sm:$0xff]  }
 0x1fa   : > { %2906 = vmatpush1.bf16.msra.mxu0 %v3930_v27  ;;  %3070 = vmatpush1.bf16.msra.mxu1 %v3933_v28  ;;  %v4007_v27 = vld [vmem:[%s4959_s28 + $0x6ac] ss:$16 sps:$4 sm:$0xff]   ;;  %v4002_v28 = vld [vmem:[%s4959_s28 + $0x6a0] ss:$16 sps:$4 sm:$0xff]  }
 0x1fb   : > { %2907 = vmatprep.subr.bf16.mxu0 %v3938_v29  ;;  %3071 = vmatprep.subr.bf16.mxu1 %v3941_v32  ;;  %v4005_v29 = vld [vmem:[%s4959_s28 + $0x6a8] ss:$16 sps:$4 sm:$0xff]   ;;  %v4010_v32 = vld [vmem:[%s4959_s28 + $0x6c4] ss:$16 sps:$4 sm:$0xff]  }
 0x1fe   : > { %2908 = vmatpush1.bf16.msra.mxu0 %v3936_v33  ;;  %3072 = vmatpush1.bf16.msra.mxu1 %v3939_v34  ;;  %v4013_v33 = vld [vmem:[%s4959_s28 + $0x6cc] ss:$16 sps:$4 sm:$0xff]   ;;  %v4008_v34 = vld [vmem:[%s4959_s28 + $0x6c0] ss:$16 sps:$4 sm:$0xff]  }
 0x1ff   : > { %2909 = vmatprep.subr.bf16.mxu0 %v3944_v35  ;;  %3073 = vmatprep.subr.bf16.mxu1 %v3947_v36  ;;  %v4011_v35 = vld [vmem:[%s4959_s28 + $0x6c8] ss:$16 sps:$4 sm:$0xff]   ;;  %v4016_v36 = vld [vmem:[%s4959_s28 + $0x6e4] ss:$16 sps:$4 sm:$0xff]  }
 0x202   : > { %2910 = vmatpush1.bf16.msra.mxu0 %v3942_v37  ;;  %3074 = vmatpush1.bf16.msra.mxu1 %v3945_v38  ;;  %v4019_v37 = vld [vmem:[%s4959_s28 + $0x6ec] ss:$16 sps:$4 sm:$0xff]   ;;  %v4014_v38 = vld [vmem:[%s4959_s28 + $0x6e0] ss:$16 sps:$4 sm:$0xff]  }
 0x203   : > { %2911 = vmatprep.subr.bf16.mxu0 %v3950_v39  ;;  %3075 = vmatprep.subr.bf16.mxu1 %v3953_v40  ;;  %v4017_v39 = vld [vmem:[%s4959_s28 + $0x6e8] ss:$16 sps:$4 sm:$0xff]   ;;  %v4022_v40 = vld [vmem:[%s4959_s28 + $0x704] ss:$16 sps:$4 sm:$0xff]  }
 0x206   : > { %2912 = vmatpush1.bf16.msra.mxu0 %v3948_v41  ;;  %3076 = vmatpush1.bf16.msra.mxu1 %v3951_v42  ;;  %v4020_v41 = vld [vmem:[%s4959_s28 + $0x700] ss:$16 sps:$4 sm:$0xff]   ;;  %v4023_v42 = vld [vmem:[%s4959_s28 + $0x708] ss:$16 sps:$4 sm:$0xff]  }
 0x207   : > { %2913 = vmatprep.subr.bf16.mxu0 %v3956_v43  ;;  %3077 = vmatprep.subr.bf16.mxu1 %v3959_v44  ;;  %v4028_v43 = vld [vmem:[%s4959_s28 + $0x724] ss:$16 sps:$4 sm:$0xff]   ;;  %v4031_v44 = vld [vmem:[%s4959_s28 + $0x72c] ss:$16 sps:$4 sm:$0xff]  }
 0x20a   : > { %2914 = vmatpush1.bf16.msra.mxu0 %v3954_v47  ;;  %3078 = vmatpush1.bf16.msra.mxu1 %v3957_v48  ;;  %v4034_v47 = vld [vmem:[%s4959_s28 + $0x744] ss:$16 sps:$4 sm:$0xff]   ;;  %v4037_v48 = vld [vmem:[%s4959_s28 + $0x74c] ss:$16 sps:$4 sm:$0xff]  }
 0x20b   : > { %2915 = vmatprep.subr.bf16.mxu0 %v3962_v49  ;;  %3079 = vmatprep.subr.bf16.mxu1 %v3965_v50  ;;  %v4032_v49 = vld [vmem:[%s4959_s28 + $0x740] ss:$16 sps:$4 sm:$0xff]   ;;  %v4035_v50 = vld [vmem:[%s4959_s28 + $0x748] ss:$16 sps:$4 sm:$0xff]  }
 0x20e   : > { %2916 = vmatpush1.bf16.msra.mxu0 %v3960_v53  ;;  %3080 = vmatpush1.bf16.msra.mxu1 %v3963_v54  ;;  %v4038_v53 = vld [vmem:[%s4959_s28 + $0x760] ss:$16 sps:$4 sm:$0xff]   ;;  %v4041_v54 = vld [vmem:[%s4959_s28 + $0x768] ss:$16 sps:$4 sm:$0xff]  }
 0x20f   : > { %2917 = vmatprep.subr.bf16.mxu0 %v3968_v55  ;;  %3081 = vmatprep.subr.bf16.mxu1 %v3971_v57  ;;  %v4046_v55 = vld [vmem:[%s4959_s28 + $0x784] ss:$16 sps:$4 sm:$0xff]   ;;  %v4049_v57 = vld [vmem:[%s4959_s28 + $0x78c] ss:$16 sps:$4 sm:$0xff]  }
 0x212   : > { %2918 = vmatpush1.bf16.msra.mxu0 %v3966_v56  ;;  %3082 = vmatpush1.bf16.msra.mxu1 %v3969_v60  ;;  %v933_v56 = vsub.s32 6, %v5142_v8  ;;  %v4052_v60 = vld [vmem:[%s4959_s28 + $0x7a4] ss:$16 sps:$4 sm:$0xff]  }
 0x213   : > { %2928 = vmatprep.subr.bf16.mxu0 %v3974_v61  ;;  %3092 = vmatprep.subr.bf16.mxu1 %v3977_v62  ;;  %v4055_v61 = vld [vmem:[%s4959_s28 + $0x7ac] ss:$16 sps:$4 sm:$0xff]   ;;  %v4050_v62 = vld [vmem:[%s4959_s28 + $0x7a0] ss:$16 sps:$4 sm:$0xff]  }
 0x215   : > { %2920 = vmatmul.mubr.bf16.vlgmr.msra.gmra.mrb[4].mxu0 %v1243_v0  ;;  %3084 = vmatmul.mubr.bf16.vlgmr.msra.gmra.mrb[4].mxu1 %v1243_v0  ;;  %v934_v0 = vrot.slane %v5148_v10, %v933_v56  ;;  %v4062_v10 = vld [vmem:[%s4959_s28 + $0x7e0] ss:$16 sps:$4 sm:$0xff]  }
 0x216   : > { %2929 = vmatpush1.bf16.msra.mxu0 %v3972_v1  ;;  %3093 = vmatpush1.bf16.msra.mxu1 %v3975_v12  ;;  %v4058_v1 = vld [vmem:[%s4959_s28 + $0x7c4] ss:$16 sps:$4 sm:$0xff]   ;;  %v4061_v12 = vld [vmem:[%s4959_s28 + $0x7cc] ss:$16 sps:$4 sm:$0xff]  }
 0x217   : > { %2930 = vmatprep.subr.bf16.mxu0 %v3980_v2  ;;  %3094 = vmatprep.subr.bf16.mxu1 %v3983_v3  ;;  %v4056_v2 = vld [vmem:[%s4959_s28 + $0x7c0] ss:$16 sps:$4 sm:$0xff]   ;;  %v4059_v3 = vld [vmem:[%s4959_s28 + $0x7c8] ss:$16 sps:$4 sm:$0xff]  }
 0x218   : > { %2960 = vmatprep.mubr.bf16.mxu0 %v1246_v4  ;;  %3124 = vmatprep.mubr.bf16.mxu1 %v1246_v4  ;;  %v1227_v4 = vadd.f32 %v5207_v6, %v934_v0  ;;  %v1503_v6 = vld [vmem:[%s768_s7] sm:$0xf] }
 0x21a   : > { %2931 = vmatpush1.bf16.msra.mxu0 %v3978_v5  ;;  %3095 = vmatpush1.bf16.msra.mxu1 %v3981_v13  ;;  %v4064_v5 = vld [vmem:[%s4959_s28 + $0x7e4] ss:$16 sps:$4 sm:$0xff]   ;;  %v4067_v13 = vld [vmem:[%s4959_s28 + $0x7ec] ss:$16 sps:$4 sm:$0xff]  }
 0x21b   : > { %2932 = vmatprep.subr.bf16.mxu0 %v3986_v14  ;;  %3096 = vmatprep.subr.bf16.mxu1 %v3989_v15  ;;  %v4065_v14 = vld [vmem:[%s4959_s28 + $0x7e8] ss:$16 sps:$4 sm:$0xff]   ;;  %v1237_v15 = vmax.f32 %v1227_v4, 0.0 }
 0x21e   : > { %2933 = vmatpush1.bf16.msra.mxu0 %v3984_v16  ;;  %3097 = vmatpush1.bf16.msra.mxu1 %v3987_v17  ;;  %v1245_v16 = vpack.c.bf16 %v1237_v15, %v1237_v15  ;;  %v4093_v17 = vmov 1983009808  }
 0x21f   : > { %2934 = vmatprep.subr.bf16.mxu0 %v3992_v18  ;;  %3098 = vmatprep.subr.bf16.mxu1 %v3995_v19  ;;  %v3144_v18 = vunpack.c.l.s4 %v4093_v17  ;;  %v1508_v19 = vrot.slane %v1503_v6, %v909_v9 }
 0x222   : > { %2935 = vmatpush1.bf16.msra.mxu0 %v3990_v21  ;;  %3099 = vmatpush1.bf16.msra.mxu1 %v3993_v23  ;;  %v1516_v21 = vrot.slane %v1503_v6, %v917_v22  ;;  %v1512_v23 = vrot.slane %v1503_v6, %v913_v11 }
 0x223   : > { %2936 = vmatprep.subr.bf16.mxu0 %v3998_v30  ;;  %3100 = vmatprep.subr.bf16.mxu1 %v4001_v24  ;;  %v1520_v30 = vrot.slane %v1503_v6, %v921_v20 }
 0x226   : > { %2937 = vmatpush1.bf16.msra.mxu0 %v3996_v25  ;;  %3101 = vmatpush1.bf16.msra.mxu1 %v3999_v7  ;;  %v3145_v7 = vunpack.c.0.s8 %v3144_v18 }
 0x227   : > { %2938 = vmatprep.subr.bf16.mxu0 %v4004_v26  ;;  %3102 = vmatprep.subr.bf16.mxu1 %v4007_v27 }
 0x22a   : > { %2939 = vmatpush1.bf16.msra.mxu0 %v4002_v28  ;;  %3103 = vmatpush1.bf16.msra.mxu1 %v4005_v29 }
 0x22b   : > { %2940 = vmatprep.subr.bf16.mxu0 %v4010_v32  ;;  %3104 = vmatprep.subr.bf16.mxu1 %v4013_v33 }
 0x22e   : > { %2941 = vmatpush1.bf16.msra.mxu0 %v4008_v34  ;;  %3105 = vmatpush1.bf16.msra.mxu1 %v4011_v35 }
 0x22f   : > { %2942 = vmatprep.subr.bf16.mxu0 %v4016_v36  ;;  %3106 = vmatprep.subr.bf16.mxu1 %v4019_v37 }
 0x232   : > { %2943 = vmatpush1.bf16.msra.mxu0 %v4014_v38  ;;  %3107 = vmatpush1.bf16.msra.mxu1 %v4017_v39  ;;  %v3148_v38 = vsub.s32 %v3145_v7, %v5142_v8 }
 0x233   : > { %2944 = vmatprep.subr.bf16.mxu0 %v4022_v40  ;;  %3108 = vmatprep.subr.bf16.mxu1 %v4025_v31 }
 0x236   : > { %2945 = vmatpush1.bf16.msra.mxu0 %v4020_v41  ;;  %3109 = vmatpush1.bf16.msra.mxu1 %v4023_v42 }
 0x237   : > { %2946 = vmatprep.subr.bf16.mxu0 %v4028_v43  ;;  %3110 = vmatprep.subr.bf16.mxu1 %v4031_v44 }
 0x23a   : > { %2947 = vmatpush1.bf16.msra.mxu0 %v4026_v45  ;;  %3111 = vmatpush1.bf16.msra.mxu1 %v4029_v46 }
 0x23b   : > { %2948 = vmatprep.subr.bf16.mxu0 %v4034_v47  ;;  %3112 = vmatprep.subr.bf16.mxu1 %v4037_v48 }
 0x23e   : > { %2949 = vmatpush1.bf16.msra.mxu0 %v4032_v49  ;;  %3113 = vmatpush1.bf16.msra.mxu1 %v4035_v50 }
 0x23f   : > { %2950 = vmatprep.subr.bf16.mxu0 %v4040_v51  ;;  %3114 = vmatprep.subr.bf16.mxu1 %v4043_v52 }
 0x242   : > { %2951 = vmatpush1.bf16.msra.mxu0 %v4038_v53  ;;  %3115 = vmatpush1.bf16.msra.mxu1 %v4041_v54 }
 0x243   : > { %2952 = vmatprep.subr.bf16.mxu0 %v4046_v55  ;;  %3116 = vmatprep.subr.bf16.mxu1 %v4049_v57 }
 0x246   : > { %2953 = vmatpush1.bf16.msra.mxu0 %v4044_v58  ;;  %3117 = vmatpush1.bf16.msra.mxu1 %v4047_v59 }
 0x247   : > { %2954 = vmatprep.subr.bf16.mxu0 %v4052_v60  ;;  %3118 = vmatprep.subr.bf16.mxu1 %v4055_v61 }
 0x24a   : > { %2955 = vmatpush1.bf16.msra.mxu0 %v4050_v62  ;;  %3119 = vmatpush1.bf16.msra.mxu1 %v4053_v63 }
 0x24b   : > { %2956 = vmatprep.subr.bf16.mxu0 %v4058_v1  ;;  %3120 = vmatprep.subr.bf16.mxu1 %v4061_v12 }
 0x24e   : > { %2957 = vmatpush1.bf16.msra.mxu0 %v4056_v2  ;;  %3121 = vmatpush1.bf16.msra.mxu1 %v4059_v3 }
 0x24f   : > { %2958 = vmatprep.subr.bf16.mxu0 %v4064_v5  ;;  %3122 = vmatprep.subr.bf16.mxu1 %v4067_v13 }
 0x252   : > { %2959 = vmatpush1.bf16.msra.mxu0 %v4062_v10  ;;  %3123 = vmatpush1.bf16.msra.mxu1 %v4065_v14 }
 0x255   : > { %2961 = vmatmul.mubr.bf16.vlgmr.msra.gmra.mrb[4].mxu0 %v1245_v16  ;;  %3125 = vmatmul.mubr.bf16.vlgmr.msra.gmra.mrb[4].mxu1 %v1245_v16 }
 0x328   : > { %v2962_v24 = vpop.f32.mrb[4].mxu0  ;;  %v3126_v25 = vpop.f32.mrb[4].mxu1 }
 0x329   : > { %v3630_v26 = vadd.f32 %v2962_v24, %v1508_v19  ;;  %v3632_v27 = vadd.f32 %v3126_v25, %v1516_v21  ;;  %v2964_v28 = vpop.f32.mrb[5].mxu0  ;;  %v3128_v29 = vpop.f32.mrb[5].mxu1 }
 0x32a   : > { %v3631_v32 = vadd.f32 %v2964_v28, %v1512_v23  ;;  %v3633_v33 = vadd.f32 %v3128_v29, %v1520_v30  ;;  %v2966_v9 = vpop.f32.mrb[6].mxu0  ;;  %v3130_v34 = vpop.f32.mrb[6].mxu1 }
 0x32b   : > { %v3133_v35 = vmax.f32 %v3630_v26, 0.0  ;;  %v3135_v22 = vmax.f32 %v3632_v27, 0.0  ;;  %v2967_v36 = vpop.f32.mrb[7].mxu0  ;;  %v3131_v37 = vpop.f32.mrb[7].mxu1 }
 0x32c   : > { %v3134_v11 = vmax.f32 %v3631_v32, 0.0  ;;  %v3136_v20 = vmax.f32 %v3633_v33, 0.0 }
 0x32e   : > { %v3141_v39 = vcombine.low %v3133_v35, %v3134_v11  ;;  %v3142_v40 = vcombine.low %v3135_v22, %v3136_v20 }
 0x330   : > { %v3149_v31 = vrot.slane %v3141_v39, %v3148_v38  ;;  %v3156_v41 = vrot.slane %v3142_v40, %v3148_v38 }
 0x332   : > { %v3157_v42 = vcombine.low %v3149_v31, %v3156_v41 }
 0x334   : > { %3159 = vst [vmem:[%s774_s8] sm:$0xff] %v3157_v42 }
 0x335 PF: > { %p12_p9 = scmp.ge.s32.totalorder %s4141_s22, 6   ;;  %s5415_s18 = smov %s4086_s19 }
 0x336   : > { %s5416_s19 = smov %s4150_s25  ;;  %s5417_s20 = smov %s4141_s22 }
 0x337   :  { %14 = sbr.rel (!%p12_p9) target bundleno = 2 (0x2), region = 101 }

// kernel: tile.23
= control target key start
LH: loop header
LB: loop body
LE: loop exit
PB: predicated region body
PF: predicated region fallthrough
CT: control target
= control target key end

     0   :  { %s28_s0 = inlined_call_operand.vmem [shape: f32[16], index: 0, kind: input, shape index: {}]   ;;  %s29_s1 = inlined_call_operand.vmem [shape: f32[11,16], index: 1, kind: output, shape index: {}]  }
   0x1   :  { %v4_v0 = vld [vmem:[%s28_s0] ss:$0 sm:$0xff] }
   0x2   :  { %5 = vst [vmem:[%s29_s1] sm:$0xff] %v4_v0  ;;  %8 = vst [vmem:[%s29_s1 + $0x8] sm:$0xff] %v4_v0 }

// kernel: tile.24
= control target key start
LH: loop header
LB: loop body
LE: loop exit
PB: predicated region body
PF: predicated region fallthrough
CT: control target
= control target key end

     0   :  { %s76_s10 = smov 112   ;;  %s77_s11 = smov 80   ;;  %vm4_vm0 = vcmask 130048   ;;  %vm10_vm1 = vcmask 1048448   ;;  %vm16_vm2 = vcmask 917248   ;;  %vm22_vm3 = vcmask 786048   ;;  %s123_s0 = inlined_call_operand.vmem [shape: f32[11,16], index: 0, kind: input, shape index: {}]   ;;  %s124_s1 = inlined_call_operand.vmem [shape: f32[1,176], index: 1, kind: output, shape index: {}]  }
   0x1   :  { %v61_v0 = vld [vmem:[%s123_s0 + $0x7] sm:$0x1]   ;;  %v63_v1 = vld [vmem:[%s123_s0 + $0x5] sm:$0x1]   ;;  %v62_v2 = vld [vmem:[%s123_s0 + $0x6] sm:$0x1]  }
   0x2   :  { %8 = vrot.lane.b32.xlu0 %v61_v0, %s76_s10  ;;  %20 = vrot.lane.b32.xlu1 %v63_v1, %s77_s11  ;;  %v64_v3 = vld [vmem:[%s123_s0 + $0x4] sm:$0x1]   ;;  %s37_s16 = smov 3  ;;  %s2_s17 = smov 3  ;;  %v65_v5 = vld [vmem:[%s123_s0 + $0x3] sm:$0x1]  }
   0x3   :  { %s78_s18 = smov 96   ;;  %s79_s19 = smov 64   ;;  %v3_v4 = vld [vmem:[%s123_s0] ss:$8 sm:%s2_s17]   ;;  %v66_v6 = vld [vmem:[%s123_s0 + $0x2] ss:$8 sm:%s37_s16]  }
   0x4   :  { %5 = vst.msk [vmem:[#allocation0] ss:$8 sm:$0x3] %vm4_vm0, %v3_v4   ;;  %s44_s26 = smov 3  ;;  %s80_s27 = smov 48   ;;  %vm28_vm4 = vcmask 654848  }
   0x5   :  { %s81_s28 = smov 32   ;;  %v67_v7 = vld [vmem:[%s123_s0 + $0x1] ss:$8 sm:%s44_s26]   ;;  %s82_s0 = smov 16   ;;  %vm34_vm5 = vcmask 523648   ;;  %vm41_vm6 = vcmask 392448  }
   0x6   :  { %14 = vrot.lane.b32.xlu0 %v62_v2, %s78_s18  ;;  %26 = vrot.lane.b32.xlu1 %v64_v3, %s79_s19  ;;  %vm48_vm7 = vcmask 261248  }
   0xa   :  { %32 = vrot.lane.b32.xlu0 %v65_v5, %s80_s27  ;;  %39 = vrot.lane.b32.xlu1 %v66_v6, %s81_s28 }
   0xe   :  { %46 = vrot.lane.b32.xlu0 %v67_v7, %s82_s0 }
  0x74   :  { %v9_v8 = vpop.permute.xlu0 %8   ;;  %v21_v9 = vpop.permute.xlu1 %20  }
  0x75   :  { %11 = vst.msk [vmem:[#allocation0] sm:$0x1] %vm10_vm1, %v9_v8  }
  0x78   :  { %v15_v10 = vpop.permute.xlu0 %14   ;;  %v27_v11 = vpop.permute.xlu1 %26  }
  0x79   :  { %17 = vst.msk [vmem:[#allocation0] sm:$0x1] %vm16_vm2, %v15_v10  }
  0x7a   :  { %23 = vst.msk [vmem:[#allocation0] sm:$0x1] %vm22_vm3, %v21_v9  }
  0x7b   :  { %29 = vst.msk [vmem:[#allocation0] sm:$0x1] %vm28_vm4, %v27_v11  }
  0x7c   :  { %v33_v12 = vpop.permute.xlu0 %32   ;;  %v40_v13 = vpop.permute.xlu1 %39  }
  0x7d   :  { %35 = vst.msk [vmem:[#allocation0] sm:$0x1] %vm34_vm5, %v33_v12  }
  0x7e   :  { %42 = vst.msk [vmem:[#allocation0] ss:$8 sm:$0x3] %vm41_vm6, %v40_v13  }
  0x80   :  { %v47_v14 = vpop.permute.xlu0 %46  }
  0x81   :  { %49 = vst.msk [vmem:[#allocation0] ss:$8 sm:$0x3] %vm48_vm7, %v47_v14  }
  0x88   :  { %v53_v15 = vld [vmem:[#allocation0] sm:$0x1]  ;;  %v57_v16 = vld [vmem:[#allocation0 + $0x8] sm:$0x1] }
  0x89   :  { %55 = vst [vmem:[%s124_s1] sm:$0x1] %v53_v15  ;;  %68 = vst [vmem:[%s124_s1 + $0x1] sm:$0x1] %v57_v16 }

// kernel: tile.18
= control target key start
LH: loop header
LB: loop body
LE: loop exit
PB: predicated region body
PF: predicated region fallthrough
CT: control target
= control target key end

     0   :  { %s22_s0 = inlined_call_operand.vmem [shape: f32[32], index: 0, kind: input, shape index: {}]   ;;  %s23_s1 = inlined_call_operand.vmem [shape: f32[6,32], index: 1, kind: output, shape index: {}]  }
   0x1   :  { %v4_v0 = vld [vmem:[%s22_s0] ss:$0 sm:$0xff] }
   0x2   :  { %5 = vst [vmem:[%s23_s1] sm:$0xff] %v4_v0 }

// kernel: tile.19
= control target key start
LH: loop header
LB: loop body
LE: loop exit
PB: predicated region body
PF: predicated region fallthrough
CT: control target
= control target key end

     0   :  { %s43_s8 = smov 96   ;;  %s19_s9 = smov 3  ;;  %vm4_vm0 = vcmask 261120   ;;  %vm10_vm1 = vcmask 1048320   ;;  %vm16_vm2 = vcmask 785920   ;;  %vm23_vm3 = vcmask 523520   ;;  %s74_s0 = inlined_call_operand.vmem [shape: f32[6,32], index: 0, kind: input, shape index: {}]   ;;  %s75_s1 = inlined_call_operand.vmem [shape: f32[1,192], index: 1, kind: output, shape index: {}]  }
   0x1   :  { %v36_v0 = vld [vmem:[%s74_s0 + $0x3] sm:$0x1]   ;;  %v37_v1 = vld [vmem:[%s74_s0 + $0x2] sm:$0x1]   ;;  %v38_v2 = vld [vmem:[%s74_s0 + $0x1] ss:$4 sm:%s19_s9]  }
   0x2   :  { %8 = vrot.lane.b32.xlu0 %v36_v0, %s43_s8  ;;  %s2_s14 = smov 3  ;;  %s44_s15 = smov 32  }
   0x3   :  { %21 = vrot.lane.b32.xlu1 %v38_v2, %s44_s15  ;;  %v3_v3 = vld [vmem:[%s74_s0] ss:$4 sm:%s2_s14]   ;;  %s45_s0 = smov 64  }
   0x4   :  { %5 = vst.msk [vmem:[#allocation0] ss:$8 sm:$0x3] %vm4_vm0, %v3_v3  }
   0x6   :  { %14 = vrot.lane.b32.xlu0 %v37_v1, %s45_s0 }
  0x74   :  { %v9_v4 = vpop.permute.xlu0 %8  }
  0x75   :  { %11 = vst.msk [vmem:[#allocation0] sm:$0x1] %vm10_vm1, %v9_v4   ;;  %v22_v5 = vpop.permute.xlu1 %21  }
  0x78   :  { %v15_v6 = vpop.permute.xlu0 %14  }
  0x79   :  { %17 = vst.msk [vmem:[#allocation0] sm:$0x1] %vm16_vm2, %v15_v6  }
  0x7a   :  { %24 = vst.msk [vmem:[#allocation0] ss:$8 sm:$0x3] %vm23_vm3, %v22_v5  }
  0x81   :  { %v28_v7 = vld [vmem:[#allocation0] sm:$0x1]  ;;  %v32_v8 = vld [vmem:[#allocation0 + $0x8] sm:$0x1] }
  0x82   :  { %30 = vst [vmem:[%s75_s1] sm:$0x1] %v28_v7  ;;  %39 = vst [vmem:[%s75_s1 + $0x1] sm:$0x1] %v32_v8 }

// kernel: generator_forward.3
= control target key start
LH: loop header
LB: loop body
LE: loop exit
PB: predicated region body
PF: predicated region fallthrough
CT: control target
= control target key end

     0   :  { %s4799_s13 = smov 0   ;;  %s6890_s0 = inlined_call_operand.vmem [shape: f32[16,256], index: 0, kind: input, shape index: {}]   ;;  %s6891_s1 = inlined_call_operand.vmem [shape: f32[4,16,8], index: 1, kind: input, shape index: {}]   ;;  %s6892_s2 = inlined_call_operand.vmem [shape: f32[4,256,192], index: 2, kind: input, shape index: {}]   ;;  %s6893_s3 = inlined_call_operand.vmem [shape: f32[1,192], index: 3, kind: input, shape index: {}]   ;;  %s6894_s4 = inlined_call_operand.vmem [shape: f32[4,32,16], index: 4, kind: input, shape index: {}]   ;;  %s6895_s5 = inlined_call_operand.vmem [shape: f32[4,192,176], index: 5, kind: input, shape index: {}]   ;;  %s6896_s6 = inlined_call_operand.vmem [shape: f32[1,176], index: 6, kind: input, shape index: {}]   ;;  %s6897_s7 = inlined_call_operand.vmem [shape: f32[4,64,32], index: 7, kind: input, shape index: {}]   ;;  %s6898_s8 = inlined_call_operand.vmem [shape: f32[4,176,128], index: 8, kind: input, shape index: {}]   ;;  %s6899_s9 = inlined_call_operand.vmem [shape: f32[1,128], index: 9, kind: input, shape index: {}]   ;;  %s6900_s10 = inlined_call_operand.vmem [shape: f32[128,128], index: 10, kind: output, shape index: {}]  }
   0x1 LB: > { %s4805_s14 = sadd.s32 4294967295, %s4740_s13   ;;  %p3359_p0 = scmp.ge.s32.totalorder %s4740_s13, 1  ;;  %s4740_s13 = sphi %s4799_s13, %s20_s13  }
   0x2   : > { %p312_p1 = scmp.lt.s32.totalorder %s4740_s13, 3 }
   0x4   : > { %p313_p2 = pnand %p3359_p0, %p312_p1 }
   0x5   : > { %v3365_v0 = vld [vmem:[%s6892_s2 + $0x208] sm:$0xff] (!%p313_p2)  ;;  %v3367_v1 = vld [vmem:[%s6892_s2 + $0x218] sm:$0xff] (!%p313_p2)  ;;  %v3364_v2 = vld [vmem:[%s6892_s2 + $0x200] sm:$0xff] (!%p313_p2)  ;;  %p350_p3 = scmp.lt.s32.totalorder (!%p313_p2), %s4805_s14, 1  ;;  %vm639_vm0 = vcmask (!%p313_p2), 64512   ;;  %vm1326_vm1 = vcmask (!%p313_p2), 523264  }
   0x6   : > { %316 = sbr.rel (%p313_p2) target bundleno = 2844 (0xb1c), region = 60  ;;  %v4084_v3 = vpack.c.bf16 (!%p313_p2), %v3367_v1, %v3365_v0  ;;  %v3366_v4 = vld [vmem:[%s6892_s2 + $0x210] sm:$0xff] (!%p313_p2)  ;;  %v3369_v5 = vld [vmem:[%s6892_s2 + $0x228] sm:$0xff] (!%p313_p2)  ;;  %v3371_v6 = vld [vmem:[%s6892_s2 + $0x238] sm:$0xff] (!%p313_p2)  ;;  %vm1545_vm2 = vcmask (!%p313_p2), 130048   ;;  %vm2278_vm3 = vcmask (!%p313_p2), 392192  }
   0x7   : > { %v4086_v7 = vpack.c.bf16 (!%p313_p2), %v3366_v4, %v3364_v2  ;;  %v4088_v8 = vpack.c.bf16 (!%p313_p2), %v3371_v6, %v3369_v5  ;;  %v3368_v9 = vld [vmem:[%s6892_s2 + $0x220] sm:$0xff] (!%p313_p2)  ;;  %v3370_v10 = vld [vmem:[%s6892_s2 + $0x230] sm:$0xff] (!%p313_p2)  ;;  %v3373_v11 = vld [vmem:[%s6892_s2 + $0x248] sm:$0xff] (!%p313_p2)  ;;  %vm2501_vm4 = vcmask (!%p313_p2), 261120  }
   0x8   : > { %4085 = vmatprep.subr.bf16.mxu1 (!%p313_p2), %v4084_v3  ;;  %v3375_v12 = vld [vmem:[%s6892_s2 + $0x258] sm:$0xff] (!%p313_p2)  ;;  %v4090_v13 = vpack.c.bf16 (!%p313_p2), %v3370_v10, %v3368_v9  ;;  %v3372_v15 = vld [vmem:[%s6892_s2 + $0x240] sm:$0xff] (!%p313_p2)  ;;  %v3374_v16 = vld [vmem:[%s6892_s2 + $0x250] sm:$0xff] (!%p313_p2) }
   0x9   : > { %4087 = vmatpush1.bf16.msra.mxu1 (!%p313_p2), %v4086_v7  ;;  %v4092_v14 = vpack.c.bf16 (!%p313_p2), %v3375_v12, %v3373_v11  ;;  %v3377_v17 = vld [vmem:[%s6892_s2 + $0x268] sm:$0xff] (!%p313_p2)  ;;  %v3379_v18 = vld [vmem:[%s6892_s2 + $0x278] sm:$0xff] (!%p313_p2)  ;;  %v4094_v19 = vpack.c.bf16 (!%p313_p2), %v3374_v16, %v3372_v15  ;;  %v3376_v21 = vld [vmem:[%s6892_s2 + $0x260] sm:$0xff] (!%p313_p2) }
   0xa   : > { %4089 = vmatprep.subr.bf16.mxu1 (!%p313_p2), %v4088_v8  ;;  %v4096_v20 = vpack.c.bf16 (!%p313_p2), %v3379_v18, %v3377_v17  ;;  %v3378_v22 = vld [vmem:[%s6892_s2 + $0x270] sm:$0xff] (!%p313_p2)  ;;  %v3381_v23 = vld [vmem:[%s6892_s2 + $0x288] sm:$0xff] (!%p313_p2)  ;;  %v3383_v24 = vld [vmem:[%s6892_s2 + $0x298] sm:$0xff] (!%p313_p2) }
   0xb   : > { %v4098_v25 = vpack.c.bf16 (!%p313_p2), %v3378_v22, %v3376_v21  ;;  %v4100_v26 = vpack.c.bf16 (!%p313_p2), %v3383_v24, %v3381_v23  ;;  %v3380_v27 = vld [vmem:[%s6892_s2 + $0x280] sm:$0xff] (!%p313_p2)  ;;  %v3382_v28 = vld [vmem:[%s6892_s2 + $0x290] sm:$0xff] (!%p313_p2)  ;;  %v3385_v29 = vld [vmem:[%s6892_s2 + $0x2a8] sm:$0xff] (!%p313_p2) }
   0xc   : > { %v3387_v30 = vld [vmem:[%s6892_s2 + $0x2b8] sm:$0xff] (!%p313_p2)  ;;  %v4102_v31 = vpack.c.bf16 (!%p313_p2), %v3382_v28, %v3380_v27  ;;  %v3384_v33 = vld [vmem:[%s6892_s2 + $0x2a0] sm:$0xff] (!%p313_p2)  ;;  %v3386_v34 = vld [vmem:[%s6892_s2 + $0x2b0] sm:$0xff] (!%p313_p2) }
   0xd   : > { %4091 = vmatpush1.bf16.msra.mxu1 %v4090_v13  ;;  %s351_s15 = scalar_select %p350_p3, %s4805_s14, 1  ;;  %v4104_v32 = vpack.c.bf16 %v3387_v30, %v3385_v29  ;;  %v3389_v35 = vld [vmem:[%s6892_s2 + $0x2c8] sm:$0xff]  ;;  %v3391_v36 = vld [vmem:[%s6892_s2 + $0x2d8] sm:$0xff]  ;;  %v4106_v37 = vpack.c.bf16 %v3386_v34, %v3384_v33  ;;  %v3388_v38 = vld [vmem:[%s6892_s2 + $0x2c0] sm:$0xff] }
   0xe   : > { %4093 = vmatprep.subr.bf16.mxu1 %v4092_v14  ;;  %v3390_v39 = vld [vmem:[%s6892_s2 + $0x2d0] sm:$0xff]  ;;  %v4108_v40 = vpack.c.bf16 %v3391_v36, %v3389_v35  ;;  %v3393_v41 = vld [vmem:[%s6892_s2 + $0x2e8] sm:$0xff]  ;;  %v3395_v42 = vld [vmem:[%s6892_s2 + $0x2f8] sm:$0xff] }
   0xf   : > { %s3891_s24 = sshll.u32 %s351_s15, 4  ;;  %v364_v44 = vld [vmem:[%s6892_s2 + $0x8] sm:$0xff]  ;;  %v366_v45 = vld [vmem:[%s6892_s2 + $0x18] sm:$0xff]  ;;  %v363_v46 = vld [vmem:[%s6892_s2] sm:$0xff]  ;;  %v4110_v51 = vpack.c.bf16 %v3390_v39, %v3388_v38  ;;  %v4112_v56 = vpack.c.bf16 %v3395_v42, %v3393_v41 }
  0x10   : > { %s4892_s17 = scalar_lea.vmem %s6890_s0, %s3891_s24  ;;  %v4020_v47 = vpack.c.bf16 %v366_v45, %v364_v44  ;;  %v365_v48 = vld [vmem:[%s6892_s2 + $0x10] sm:$0xff]  ;;  %v368_v49 = vld [vmem:[%s6892_s2 + $0x28] sm:$0xff]  ;;  %v370_v50 = vld [vmem:[%s6892_s2 + $0x38] sm:$0xff]  ;;  %s3362_s24 = sshll.u32 %s4805_s14, 3 }
  0x11   : > { %4095 = vmatpush1.bf16.msra.mxu1 %v4094_v19  ;;  %v4907_v43 = vld [vmem:[%s4892_s17 + $0x8] sm:$0xff]  ;;  %v4022_v52 = vpack.c.bf16 %v365_v48, %v363_v46  ;;  %v4024_v53 = vpack.c.bf16 %v370_v50, %v368_v49  ;;  %v367_v54 = vld [vmem:[%s6892_s2 + $0x20] sm:$0xff]  ;;  %v369_v55 = vld [vmem:[%s6892_s2 + $0x30] sm:$0xff]  ;;  %p356_p4 = scmp.lt.s32.totalorder %s3362_s24, 15 }
  0x12   : > { %4097 = vmatprep.subr.bf16.mxu1 %v4096_v20  ;;  %629 = vmatprep.mubr.f32.mxu1 %v4907_v43  ;;  %v3392_v57 = vld [vmem:[%s6892_s2 + $0x2e0] sm:$0xff]  ;;  %v3394_v58 = vld [vmem:[%s6892_s2 + $0x2f0] sm:$0xff]  ;;  %v3397_v59 = vld [vmem:[%s6892_s2 + $0x308] sm:$0xff]  ;;  %v4026_v61 = vpack.c.bf16 %v369_v55, %v367_v54 }
  0x13   : > { %491 = vmatprep.mubr.f32.mxu0 %v4907_v43  ;;  %4021 = vmatprep.subr.bf16.mxu0 %v4020_v47  ;;  %v3399_v60 = vld [vmem:[%s6892_s2 + $0x318] sm:$0xff]  ;;  %v4114_v62 = vpack.c.bf16 %v3394_v58, %v3392_v57  ;;  %v3396_v0 = vld [vmem:[%s6892_s2 + $0x300] sm:$0xff]  ;;  %v3398_v1 = vld [vmem:[%s6892_s2 + $0x310] sm:$0xff]  ;;  %s6902_s24 = smov (!%p356_p4, %s3362_s24), 15 }
  0x14   : > { %4023 = vmatpush1.bf16.msra.mxu0 %v4022_v52  ;;  %v4116_v63 = vpack.c.bf16 %v3399_v60, %v3397_v59  ;;  %v3401_v2 = vld [vmem:[%s6892_s2 + $0x328] sm:$0xff]  ;;  %v3403_v3 = vld [vmem:[%s6892_s2 + $0x338] sm:$0xff]  ;;  %v4118_v4 = vpack.c.bf16 %v3398_v1, %v3396_v0  ;;  %v3400_v6 = vld [vmem:[%s6892_s2 + $0x320] sm:$0xff]  ;;  %s3363_s14 = sshll.u32 %s6902_s24, 3 }
  0x15   : > { %4099 = vmatpush1.bf16.msra.mxu1 %v4098_v25  ;;  %4025 = vmatprep.subr.bf16.mxu0 %v4024_v53  ;;  %v4120_v5 = vpack.c.bf16 %v3403_v3, %v3401_v2  ;;  %v3402_v7 = vld [vmem:[%s6892_s2 + $0x330] sm:$0xff]  ;;  %v3405_v8 = vld [vmem:[%s6892_s2 + $0x348] sm:$0xff]  ;;  %v3407_v9 = vld [vmem:[%s6892_s2 + $0x358] sm:$0xff]  ;;  %v4742_v53 = vmov 0.0   ;;  %s359_s30 = scalar_lea.vmem %s6900_s10, %s3363_s14 }
  0x16   : > { %4101 = vmatprep.subr.bf16.mxu1 %v4100_v26  ;;  %v4122_v10 = vpack.c.bf16 %v3402_v7, %v3400_v6  ;;  %v4124_v11 = vpack.c.bf16 %v3407_v9, %v3405_v8  ;;  %v3404_v12 = vld [vmem:[%s6892_s2 + $0x340] sm:$0xff]  ;;  %v3406_v13 = vld [vmem:[%s6892_s2 + $0x350] sm:$0xff]  ;;  %v3409_v14 = vld [vmem:[%s6892_s2 + $0x368] sm:$0xff] }
  0x17   : > { %v3411_v15 = vld [vmem:[%s6892_s2 + $0x378] sm:$0xff]  ;;  %v4126_v16 = vpack.c.bf16 %v3406_v13, %v3404_v12  ;;  %v3408_v18 = vld [vmem:[%s6892_s2 + $0x360] sm:$0xff]  ;;  %v3410_v19 = vld [vmem:[%s6892_s2 + $0x370] sm:$0xff] }
  0x18   : > { %4027 = vmatpush1.bf16.msra.mxu0 %v4026_v61  ;;  %v4128_v17 = vpack.c.bf16 %v3411_v15, %v3409_v14  ;;  %v3413_v20 = vld [vmem:[%s6892_s2 + $0x388] sm:$0xff]  ;;  %v3415_v21 = vld [vmem:[%s6892_s2 + $0x398] sm:$0xff]  ;;  %v4130_v22 = vpack.c.bf16 %v3410_v19, %v3408_v18  ;;  %v3412_v24 = vld [vmem:[%s6892_s2 + $0x380] sm:$0xff] }
  0x19   : > { %4103 = vmatpush1.bf16.msra.mxu1 %v4102_v31  ;;  %v4132_v23 = vpack.c.bf16 %v3415_v21, %v3413_v20  ;;  %v3414_v25 = vld [vmem:[%s6892_s2 + $0x390] sm:$0xff]  ;;  %v3417_v26 = vld [vmem:[%s6892_s2 + $0x3a8] sm:$0xff]  ;;  %v3419_v27 = vld [vmem:[%s6892_s2 + $0x3b8] sm:$0xff] }
  0x1a   : > { %4105 = vmatprep.subr.bf16.mxu1 %v4104_v32  ;;  %v4134_v28 = vpack.c.bf16 %v3414_v25, %v3412_v24  ;;  %v4136_v29 = vpack.c.bf16 %v3419_v27, %v3417_v26  ;;  %v3416_v30 = vld [vmem:[%s6892_s2 + $0x3a0] sm:$0xff]  ;;  %v3418_v31 = vld [vmem:[%s6892_s2 + $0x3b0] sm:$0xff]  ;;  %v3421_v32 = vld [vmem:[%s6892_s2 + $0x3c8] sm:$0xff] }
  0x1b   : > { %v3423_v33 = vld [vmem:[%s6892_s2 + $0x3d8] sm:$0xff]  ;;  %v4138_v34 = vpack.c.bf16 %v3418_v31, %v3416_v30  ;;  %v3420_v36 = vld [vmem:[%s6892_s2 + $0x3c0] sm:$0xff]  ;;  %v3425_v38 = vld [vmem:[%s6892_s2 + $0x3e8] sm:$0xff] }
  0x1c   : > { %v4140_v35 = vpack.c.bf16 %v3423_v33, %v3421_v32  ;;  %v3427_v39 = vld [vmem:[%s6892_s2 + $0x3f8] sm:$0xff]  ;;  %v3424_v42 = vld [vmem:[%s6892_s2 + $0x3e0] sm:$0xff]  ;;  %v3426_v44 = vld [vmem:[%s6892_s2 + $0x3f0] sm:$0xff] }
  0x1d   : > { %4107 = vmatpush1.bf16.msra.mxu1 %v4106_v37  ;;  %v3422_v37 = vld [vmem:[%s6892_s2 + $0x3d0] sm:$0xff]  ;;  %v4144_v41 = vpack.c.bf16 %v3427_v39, %v3425_v38  ;;  %v4146_v45 = vpack.c.bf16 %v3426_v44, %v3424_v42  ;;  %v5038_v46 = vld [vmem:[%s4892_s17] sm:$0xff]  ;;  %v372_v47 = vld [vmem:[%s6892_s2 + $0x48] sm:$0xff] }
  0x1e   : > { %4109 = vmatprep.subr.bf16.mxu1 %v4108_v40  ;;  %v4142_v40 = vpack.c.bf16 %v3422_v37, %v3420_v36  ;;  %v374_v48 = vld [vmem:[%s6892_s2 + $0x58] sm:$0xff]  ;;  %v371_v50 = vld [vmem:[%s6892_s2 + $0x40] sm:$0xff]  ;;  %v376_v54 = vld [vmem:[%s6892_s2 + $0x68] sm:$0xff] }
  0x1f   : > { %v4028_v49 = vpack.c.bf16 %v374_v48, %v372_v47  ;;  %v378_v55 = vld [vmem:[%s6892_s2 + $0x78] sm:$0xff]  ;;  %v375_v57 = vld [vmem:[%s6892_s2 + $0x60] sm:$0xff]  ;;  %v377_v58 = vld [vmem:[%s6892_s2 + $0x70] sm:$0xff] }
  0x20   : > { %v4034_v59 = vpack.c.bf16 %v377_v58, %v375_v57  ;;  %v380_v60 = vld [vmem:[%s6892_s2 + $0x88] sm:$0xff]  ;;  %v382_v61 = vld [vmem:[%s6892_s2 + $0x98] sm:$0xff]  ;;  %v381_v0 = vld [vmem:[%s6892_s2 + $0x90] sm:$0xff] }
  0x21   : > { %4111 = vmatpush1.bf16.msra.mxu1 %v4110_v51  ;;  %v373_v51 = vld [vmem:[%s6892_s2 + $0x50] sm:$0xff]  ;;  %4029 = vmatprep.subr.bf16.mxu0 %v4028_v49  ;;  %v384_v2 = vld [vmem:[%s6892_s2 + $0xa8] sm:$0xff]  ;;  %v386_v3 = vld [vmem:[%s6892_s2 + $0xb8] sm:$0xff] }
  0x22   : > { %4113 = vmatprep.subr.bf16.mxu1 %v4112_v56  ;;  %v4030_v52 = vpack.c.bf16 %v373_v51, %v371_v50  ;;  %v4032_v56 = vpack.c.bf16 %v378_v55, %v376_v54  ;;  %v385_v6 = vld [vmem:[%s6892_s2 + $0xb0] sm:$0xff]  ;;  %v388_v8 = vld [vmem:[%s6892_s2 + $0xc8] sm:$0xff]  ;;  %v390_v9 = vld [vmem:[%s6892_s2 + $0xd8] sm:$0xff] }
  0x23   : > { %v389_v12 = vld [vmem:[%s6892_s2 + $0xd0] sm:$0xff]  ;;  %v392_v14 = vld [vmem:[%s6892_s2 + $0xe8] sm:$0xff]  ;;  %v394_v15 = vld [vmem:[%s6892_s2 + $0xf8] sm:$0xff] }
  0x24   : > { %4031 = vmatpush1.bf16.msra.mxu0 %v4030_v52  ;;  %v393_v18 = vld [vmem:[%s6892_s2 + $0xf0] sm:$0xff]  ;;  %v396_v20 = vld [vmem:[%s6892_s2 + $0x108] sm:$0xff]  ;;  %v398_v21 = vld [vmem:[%s6892_s2 + $0x118] sm:$0xff] }
  0x25   : > { %4115 = vmatpush1.bf16.msra.mxu1 %v4114_v62  ;;  %4033 = vmatprep.subr.bf16.mxu0 %v4032_v56  ;;  %v4036_v62 = vpack.c.bf16 %v382_v61, %v380_v60  ;;  %v397_v24 = vld [vmem:[%s6892_s2 + $0x110] sm:$0xff]  ;;  %v400_v26 = vld [vmem:[%s6892_s2 + $0x128] sm:$0xff]  ;;  %v402_v27 = vld [vmem:[%s6892_s2 + $0x138] sm:$0xff] }
  0x26   : > { %4117 = vmatprep.subr.bf16.mxu1 %v4116_v63  ;;  %v379_v63 = vld [vmem:[%s6892_s2 + $0x80] sm:$0xff]  ;;  %v401_v30 = vld [vmem:[%s6892_s2 + $0x130] sm:$0xff]  ;;  %v404_v32 = vld [vmem:[%s6892_s2 + $0x148] sm:$0xff] }
  0x27   : > { %v4038_v1 = vpack.c.bf16 %v381_v0, %v379_v63  ;;  %v406_v33 = vld [vmem:[%s6892_s2 + $0x158] sm:$0xff]  ;;  %v405_v36 = vld [vmem:[%s6892_s2 + $0x150] sm:$0xff]  ;;  %v408_v38 = vld [vmem:[%s6892_s2 + $0x168] sm:$0xff] }
  0x28   : > { %4035 = vmatpush1.bf16.msra.mxu0 %v4034_v59  ;;  %v410_v39 = vld [vmem:[%s6892_s2 + $0x178] sm:$0xff]  ;;  %v409_v42 = vld [vmem:[%s6892_s2 + $0x170] sm:$0xff]  ;;  %v411_v49 = vld [vmem:[%s6892_s2 + $0x180] sm:$0xff] }
  0x29   : > { %4119 = vmatpush1.bf16.msra.mxu1 %v4118_v4  ;;  %4037 = vmatprep.subr.bf16.mxu0 %v4036_v62  ;;  %v4040_v4 = vpack.c.bf16 %v386_v3, %v384_v2  ;;  %v414_v47 = vld [vmem:[%s6892_s2 + $0x198] sm:$0xff]  ;;  %v413_v50 = vld [vmem:[%s6892_s2 + $0x190] sm:$0xff]  ;;  %v416_v52 = vld [vmem:[%s6892_s2 + $0x1a8] sm:$0xff] }
  0x2a   : > { %4121 = vmatprep.subr.bf16.mxu1 %v4120_v5  ;;  %v383_v5 = vld [vmem:[%s6892_s2 + $0xa0] sm:$0xff]  ;;  %v4070_v51 = vpack.c.bf16 %v413_v50, %v411_v49  ;;  %v418_v54 = vld [vmem:[%s6892_s2 + $0x1b8] sm:$0xff]  ;;  %v417_v57 = vld [vmem:[%s6892_s2 + $0x1b0] sm:$0xff] }
  0x2b   : > { %v4042_v7 = vpack.c.bf16 %v385_v6, %v383_v5  ;;  %v4072_v55 = vpack.c.bf16 %v418_v54, %v416_v52  ;;  %v415_v56 = vld [vmem:[%s6892_s2 + $0x1a0] sm:$0xff]  ;;  %v420_v59 = vld [vmem:[%s6892_s2 + $0x1c8] sm:$0xff]  ;;  %v422_v60 = vld [vmem:[%s6892_s2 + $0x1d8] sm:$0xff] }
  0x2c   : > { %4039 = vmatpush1.bf16.msra.mxu0 %v4038_v1  ;;  %v4074_v58 = vpack.c.bf16 %v417_v57, %v415_v56  ;;  %v4076_v61 = vpack.c.bf16 %v422_v60, %v420_v59  ;;  %v419_v62 = vld [vmem:[%s6892_s2 + $0x1c0] sm:$0xff]  ;;  %v421_v63 = vld [vmem:[%s6892_s2 + $0x1d0] sm:$0xff]  ;;  %v424_v1 = vld [vmem:[%s6892_s2 + $0x1e8] sm:$0xff] }
  0x2d   : > { %4123 = vmatpush1.bf16.msra.mxu1 %v4122_v10  ;;  %4041 = vmatprep.subr.bf16.mxu0 %v4040_v4  ;;  %v4044_v10 = vpack.c.bf16 %v390_v9, %v388_v8  ;;  %v4078_v0 = vpack.c.bf16 %v421_v63, %v419_v62  ;;  %v426_v2 = vld [vmem:[%s6892_s2 + $0x1f8] sm:$0xff]  ;;  %v423_v4 = vld [vmem:[%s6892_s2 + $0x1e0] sm:$0xff]  ;;  %v425_v5 = vld [vmem:[%s6892_s2 + $0x1f0] sm:$0xff] }
  0x2e   : > { %4125 = vmatprep.subr.bf16.mxu1 %v4124_v11  ;;  %v387_v11 = vld [vmem:[%s6892_s2 + $0xc0] sm:$0xff]  ;;  %v4080_v3 = vpack.c.bf16 %v426_v2, %v424_v1  ;;  %v4082_v6 = vpack.c.bf16 %v425_v5, %v423_v4  ;;  %v3437_v8 = vld [vmem:[%s6892_s2 + $0x418] sm:$0xff]  ;;  %v3460_v54 = vld [vmem:[%s6892_s2 + $0x4d0] sm:$0xff] }
  0x2f   : > { %v4046_v13 = vpack.c.bf16 %v389_v12, %v387_v11  ;;  %v3434_v9 = vld [vmem:[%s6892_s2 + $0x400] sm:$0xff]  ;;  %v3439_v11 = vld [vmem:[%s6892_s2 + $0x428] sm:$0xff]  ;;  %v3441_v12 = vld [vmem:[%s6892_s2 + $0x438] sm:$0xff] }
  0x30   : > { %4043 = vmatpush1.bf16.msra.mxu0 %v4042_v7  ;;  %v3435_v7 = vld [vmem:[%s6892_s2 + $0x408] sm:$0xff]  ;;  %v3461_v49 = vld [vmem:[%s6892_s2 + $0x4d8] sm:$0xff]  ;;  %v3458_v52 = vld [vmem:[%s6892_s2 + $0x4c0] sm:$0xff] }
  0x31   : > { %4127 = vmatpush1.bf16.msra.mxu1 %v4126_v16  ;;  %4045 = vmatprep.subr.bf16.mxu0 %v4044_v10  ;;  %v4048_v16 = vpack.c.bf16 %v394_v15, %v392_v14  ;;  %v3436_v10 = vld [vmem:[%s6892_s2 + $0x410] sm:$0xff]  ;;  %v4148_v14 = vpack.c.bf16 %v3437_v8, %v3435_v7  ;;  %v3465_v56 = vld [vmem:[%s6892_s2 + $0x4f8] sm:$0xff]  ;;  %v4174_v57 = vpack.c.bf16 %v3460_v54, %v3458_v52  ;;  %v3462_v59 = vld [vmem:[%s6892_s2 + $0x4e0] sm:$0xff] }
  0x32   : > { %4129 = vmatprep.subr.bf16.mxu1 %v4128_v17  ;;  %v391_v17 = vld [vmem:[%s6892_s2 + $0xe0] sm:$0xff]  ;;  %v3464_v60 = vld [vmem:[%s6892_s2 + $0x4f0] sm:$0xff]  ;;  %v3469_v62 = vld [vmem:[%s6892_s2 + $0x518] sm:$0xff] }
  0x33   : > { %v4050_v19 = vpack.c.bf16 %v393_v18, %v391_v17  ;;  %v4150_v17 = vpack.c.bf16 %v3436_v10, %v3434_v9  ;;  %v4152_v18 = vpack.c.bf16 %v3441_v12, %v3439_v11  ;;  %v4178_v63 = vpack.c.bf16 %v3464_v60, %v3462_v59  ;;  %v3466_v1 = vld [vmem:[%s6892_s2 + $0x500] sm:$0xff]  ;;  %v3468_v2 = vld [vmem:[%s6892_s2 + $0x510] sm:$0xff]  ;;  %v3473_v4 = vld [vmem:[%s6892_s2 + $0x538] sm:$0xff] }
  0x34   : > { %4047 = vmatpush1.bf16.msra.mxu0 %v4046_v13  ;;  %v4182_v5 = vpack.c.bf16 %v3468_v2, %v3466_v1  ;;  %v3470_v7 = vld [vmem:[%s6892_s2 + $0x520] sm:$0xff]  ;;  %v3472_v8 = vld [vmem:[%s6892_s2 + $0x530] sm:$0xff]  ;;  %v3475_v9 = vld [vmem:[%s6892_s2 + $0x548] sm:$0xff] }
  0x35   : > { %4131 = vmatpush1.bf16.msra.mxu1 %v4130_v22  ;;  %4049 = vmatprep.subr.bf16.mxu0 %v4048_v16  ;;  %v4052_v22 = vpack.c.bf16 %v398_v21, %v396_v20  ;;  %v3428_v16 = vld [vmem:[%s6891_s1 + $0x10] sm:$0xff]  ;;  %v3443_v21 = vld [vmem:[%s6892_s2 + $0x448] sm:$0xff]  ;;  %v3477_v10 = vld [vmem:[%s6892_s2 + $0x558] sm:$0xff]  ;;  %v4186_v11 = vpack.c.bf16 %v3472_v8, %v3470_v7 }
  0x36   : > { %4133 = vmatprep.subr.bf16.mxu1 %v4132_v23  ;;  %v395_v23 = vld [vmem:[%s6892_s2 + $0x100] sm:$0xff]  ;;  %v3440_v20 = vld [vmem:[%s6892_s2 + $0x430] sm:$0xff]  ;;  %v4188_v12 = vpack.c.bf16 %v3477_v10, %v3475_v9  ;;  %v3511_v7 = vld [vmem:[%s6892_s2 + $0x648] sm:$0xff] }
  0x37   : > { %v4054_v25 = vpack.c.bf16 %v397_v24, %v395_v23  ;;  %v3429_v24 = vld [vmem:[%s6891_s1 + $0x18] sm:$0xff]  ;;  %v3502_v59 = vld [vmem:[%s6892_s2 + $0x600] sm:$0xff]  ;;  %v3504_v60 = vld [vmem:[%s6892_s2 + $0x610] sm:$0xff] }
  0x38   : > { %4051 = vmatpush1.bf16.msra.mxu0 %v4050_v19  ;;  %v3438_v19 = vld [vmem:[%s6892_s2 + $0x420] sm:$0xff]  ;;  %v3513_v8 = vld [vmem:[%s6892_s2 + $0x658] sm:$0xff]  ;;  %v3499_v10 = vld [vmem:[%s6891_s1 + $0x28] sm:$0xff] }
  0x39   : > { %4135 = vmatpush1.bf16.msra.mxu1 %v4134_v28  ;;  %4053 = vmatprep.subr.bf16.mxu0 %v4052_v22  ;;  %v4056_v28 = vpack.c.bf16 %v402_v27, %v400_v26  ;;  %v3445_v22 = vld [vmem:[%s6892_s2 + $0x458] sm:$0xff]  ;;  %v4154_v23 = vpack.c.bf16 %v3440_v20, %v3438_v19  ;;  %v3442_v26 = vld [vmem:[%s6892_s2 + $0x440] sm:$0xff]  ;;  %v3444_v27 = vld [vmem:[%s6892_s2 + $0x450] sm:$0xff] }
  0x3a   : > { %4137 = vmatprep.subr.bf16.mxu1 %v4136_v29  ;;  %v399_v29 = vld [vmem:[%s6892_s2 + $0x120] sm:$0xff]  ;;  %v3480_v20 = vld [vmem:[%s6892_s2 + $0x570] sm:$0xff] }
  0x3b   : > { %v4058_v31 = vpack.c.bf16 %v401_v30, %v399_v29  ;;  %v3449_v29 = vld [vmem:[%s6892_s2 + $0x478] sm:$0xff]  ;;  %v4158_v30 = vpack.c.bf16 %v3444_v27, %v3442_v26  ;;  %v3478_v19 = vld [vmem:[%s6892_s2 + $0x560] sm:$0xff]  ;;  %v3484_v26 = vld [vmem:[%s6892_s2 + $0x590] sm:$0xff] }
  0x3c   : > { %4055 = vmatpush1.bf16.msra.mxu0 %v4054_v25  ;;  %v4156_v25 = vpack.c.bf16 %v3445_v22, %v3443_v21  ;;  %v3483_v21 = vld [vmem:[%s6892_s2 + $0x588] sm:$0xff]  ;;  %v3485_v22 = vld [vmem:[%s6892_s2 + $0x598] sm:$0xff]  ;;  %v3498_v2 = vld [vmem:[%s6891_s1 + $0x20] sm:$0xff] }
  0x3d   : > { %4139 = vmatpush1.bf16.msra.mxu1 %v4138_v34  ;;  %4057 = vmatprep.subr.bf16.mxu0 %v4056_v28  ;;  %v4060_v34 = vpack.c.bf16 %v406_v33, %v404_v32  ;;  %v3447_v28 = vld [vmem:[%s6892_s2 + $0x468] sm:$0xff]  ;;  %v3446_v32 = vld [vmem:[%s6892_s2 + $0x460] sm:$0xff]  ;;  %v3448_v33 = vld [vmem:[%s6892_s2 + $0x470] sm:$0xff] }
  0x3e   : > { %4141 = vmatprep.subr.bf16.mxu1 %v4140_v35  ;;  %v403_v35 = vld [vmem:[%s6892_s2 + $0x140] sm:$0xff]  ;;  %v3487_v27 = vld [vmem:[%s6892_s2 + $0x5a8] sm:$0xff] }
  0x3f   : > { %v4062_v37 = vpack.c.bf16 %v405_v36, %v403_v35  ;;  %v3453_v35 = vld [vmem:[%s6892_s2 + $0x498] sm:$0xff]  ;;  %v4162_v36 = vpack.c.bf16 %v3448_v33, %v3446_v32  ;;  %v3488_v32 = vld [vmem:[%s6892_s2 + $0x5b0] sm:$0xff]  ;;  %v3491_v33 = vld [vmem:[%s6892_s2 + $0x5c8] sm:$0xff] }
  0x40   : > { %4059 = vmatpush1.bf16.msra.mxu0 %v4058_v31  ;;  %v4160_v31 = vpack.c.bf16 %v3449_v29, %v3447_v28  ;;  %v3489_v28 = vld [vmem:[%s6892_s2 + $0x5b8] sm:$0xff] }
  0x41   : > { %4143 = vmatpush1.bf16.msra.mxu1 %v4142_v40  ;;  %4061 = vmatprep.subr.bf16.mxu0 %v4060_v34  ;;  %v4064_v40 = vpack.c.bf16 %v410_v39, %v408_v38  ;;  %v3451_v34 = vld [vmem:[%s6892_s2 + $0x488] sm:$0xff]  ;;  %v3450_v38 = vld [vmem:[%s6892_s2 + $0x480] sm:$0xff]  ;;  %v3452_v39 = vld [vmem:[%s6892_s2 + $0x490] sm:$0xff] }
  0x42   : > { %4145 = vmatprep.subr.bf16.mxu1 %v4144_v41  ;;  %v407_v41 = vld [vmem:[%s6892_s2 + $0x160] sm:$0xff] }
  0x43   : > { %v4066_v44 = vpack.c.bf16 %v409_v42, %v407_v41  ;;  %v3457_v41 = vld [vmem:[%s6892_s2 + $0x4b8] sm:$0xff]  ;;  %v4166_v42 = vpack.c.bf16 %v3452_v39, %v3450_v38  ;;  %v3492_v38 = vld [vmem:[%s6892_s2 + $0x5d0] sm:$0xff]  ;;  %v3495_v39 = vld [vmem:[%s6892_s2 + $0x5e8] sm:$0xff] }
  0x44   : > { %4063 = vmatpush1.bf16.msra.mxu0 %v4062_v37  ;;  %v4164_v37 = vpack.c.bf16 %v3453_v35, %v3451_v34  ;;  %v3493_v34 = vld [vmem:[%s6892_s2 + $0x5d8] sm:$0xff] }
  0x45   : > { %4147 = vmatpush1.bf16.msra.mxu1 %v4146_v45  ;;  %4065 = vmatprep.subr.bf16.mxu0 %v4064_v40  ;;  %v412_v45 = vld [vmem:[%s6892_s2 + $0x188] sm:$0xff] }
  0x46   : > { %v4068_v48 = vpack.c.bf16 %v414_v47, %v412_v45  ;;  %v3455_v40 = vld [vmem:[%s6892_s2 + $0x4a8] sm:$0xff]  ;;  %v3454_v45 = vld [vmem:[%s6892_s2 + $0x4a0] sm:$0xff]  ;;  %v3456_v47 = vld [vmem:[%s6892_s2 + $0x4b0] sm:$0xff] }
  0x47   : > { %v4170_v50 = vpack.c.bf16 %v3456_v47, %v3454_v45  ;;  %v3496_v45 = vld [vmem:[%s6892_s2 + $0x5f0] sm:$0xff] }
  0x48   : > { %630 = vmatmul.mubr.f32.vlgmr.msra.gmra.mrb[0].mxu1 %v5038_v46  ;;  %4067 = vmatpush1.bf16.msra.mxu0 %v4066_v44  ;;  %v4168_v44 = vpack.c.bf16 %v3457_v41, %v3455_v40  ;;  %v3497_v40 = vld [vmem:[%s6892_s2 + $0x5f8] sm:$0xff] }
  0x49   : > { %710 = vmatprep.mubr.f32.mxu1 %v4742_v53  ;;  %4069 = vmatprep.subr.bf16.mxu0 %v4068_v48  ;;  %v3459_v48 = vld [vmem:[%s6892_s2 + $0x4c8] sm:$0xff] }
  0x4c   : > { %4071 = vmatpush1.bf16.msra.mxu0 %v4070_v51  ;;  %v4172_v51 = vpack.c.bf16 %v3461_v49, %v3459_v48 }
  0x4d   : > { %4073 = vmatprep.subr.bf16.mxu0 %v4072_v55  ;;  %v3463_v55 = vld [vmem:[%s6892_s2 + $0x4e8] sm:$0xff] }
  0x50   : > { %4075 = vmatpush1.bf16.msra.mxu0 %v4074_v58  ;;  %v4176_v58 = vpack.c.bf16 %v3465_v56, %v3463_v55 }
  0x51   : > { %4077 = vmatprep.subr.bf16.mxu0 %v4076_v61  ;;  %v3467_v61 = vld [vmem:[%s6892_s2 + $0x508] sm:$0xff] }
  0x54   : > { %4079 = vmatpush1.bf16.msra.mxu0 %v4078_v0  ;;  %v4180_v0 = vpack.c.bf16 %v3469_v62, %v3467_v61  ;;  %v3507_v61 = vld [vmem:[%s6892_s2 + $0x628] sm:$0xff]  ;;  %v3509_v62 = vld [vmem:[%s6892_s2 + $0x638] sm:$0xff] }
  0x55   : > { %4081 = vmatprep.subr.bf16.mxu0 %v4080_v3  ;;  %v3471_v3 = vld [vmem:[%s6892_s2 + $0x528] sm:$0xff] }
  0x58   : > { %4083 = vmatpush1.bf16.msra.mxu0 %v4082_v6  ;;  %v4184_v6 = vpack.c.bf16 %v3473_v4, %v3471_v3  ;;  %v4214_v3 = vpack.c.bf16 %v3504_v60, %v3502_v59  ;;  %v4216_v4 = vpack.c.bf16 %v3509_v62, %v3507_v61  ;;  %v3538_v60 = vld [vmem:[%s6892_s2 + $0x720] sm:$0xff]  ;;  %v3540_v61 = vld [vmem:[%s6892_s2 + $0x730] sm:$0xff]  ;;  %v3543_v62 = vld [vmem:[%s6892_s2 + $0x748] sm:$0xff] }
  0x5b   : > { %492 = vmatmul.mubr.f32.vlgmr.msra.gmra.mrb[0].mxu0 %v5038_v46 }
  0x5c   : > { %793 = vmatprep.mubr.f32.mxu0 %v4742_v53 }
 0x11b   : > { %v631_v13 = vpop.f32.mrb[0].mxu1 }
 0x11c   : > { %v633_v15 = vpop.f32.mrb[1].mxu1 }
 0x11d   : > { %646 = vmatprep.subr.mxu1 %v633_v15  ;;  %v3479_v15 = vld [vmem:[%s6892_s2 + $0x568] sm:$0xff] }
 0x11e   : > { %647 = vmatpush1.msra.mxu1 %v631_v13  ;;  %v3474_v13 = vld [vmem:[%s6892_s2 + $0x540] sm:$0xff] }
 0x11f   : > { %3430 = vmatmul.mubr.msk.f32.vlgmr.msra.gmra.mrb[2].mxu1 %vm639_vm0, %v3428_v16  ;;  %4149 = vmatprep.subr.bf16.mxu1 %v4148_v14  ;;  %v3476_v14 = vld [vmem:[%s6892_s2 + $0x550] sm:$0xff]  ;;  %v3481_v16 = vld [vmem:[%s6892_s2 + $0x578] sm:$0xff] }
 0x120   : > { %4151 = vmatpush1.bf16.msra.mxu1 %v4150_v17  ;;  %716 = vmatprep.mubr.f32.mxu1 %v4742_v53  ;;  %v4190_v17 = vpack.c.bf16 %v3476_v14, %v3474_v13  ;;  %v3512_v13 = vld [vmem:[%s6892_s2 + $0x650] sm:$0xff]  ;;  %v3515_v14 = vld [vmem:[%s6892_s2 + $0x668] sm:$0xff] }
 0x121   : > { %4153 = vmatprep.subr.bf16.mxu1 %v4152_v18  ;;  %v4192_v18 = vpack.c.bf16 %v3481_v16, %v3479_v15  ;;  %v3517_v15 = vld [vmem:[%s6892_s2 + $0x678] sm:$0xff] }
 0x123   : > { %3431 = vmatmul.mubr.msk.f32.gmra.mrb[4].mxu1 %vm639_vm0, %v3429_v24  ;;  %v4196_v24 = vpack.c.bf16 %v3485_v22, %v3483_v21  ;;  %v3521_v21 = vld [vmem:[%s6892_s2 + $0x698] sm:$0xff] }
 0x124   : > { %4155 = vmatpush1.bf16.msra.mxu1 %v4154_v23  ;;  %935 = vmatprep.mubr.f32.mxu1 %v4907_v43  ;;  %v4194_v23 = vpack.c.bf16 %v3480_v20, %v3478_v19  ;;  %v3516_v19 = vld [vmem:[%s6892_s2 + $0x670] sm:$0xff]  ;;  %v3519_v20 = vld [vmem:[%s6892_s2 + $0x688] sm:$0xff] }
 0x125   : > { %4157 = vmatprep.subr.bf16.mxu1 %v4156_v25  ;;  %v3482_v25 = vld [vmem:[%s6892_s2 + $0x580] sm:$0xff]  ;;  %v4228_v22 = vpack.c.bf16 %v3521_v21, %v3519_v20  ;;  %v3556_v21 = vld [vmem:[%s6892_s2 + $0x7b0] sm:$0xff] }
 0x126   : > { %v4198_v29 = vpack.c.bf16 %v3484_v26, %v3482_v25  ;;  %v3523_v25 = vld [vmem:[%s6892_s2 + $0x6a8] sm:$0xff]  ;;  %v3525_v26 = vld [vmem:[%s6892_s2 + $0x6b8] sm:$0xff]  ;;  %v3554_v20 = vld [vmem:[%s6892_s2 + $0x7a0] sm:$0xff] }
 0x128   : > { %4159 = vmatpush1.bf16.msra.mxu1 %v4158_v30  ;;  %v4200_v30 = vpack.c.bf16 %v3489_v28, %v3487_v27  ;;  %v4232_v28 = vpack.c.bf16 %v3525_v26, %v3523_v25  ;;  %v3558_v25 = vld [vmem:[%s6892_s2 + $0x7c0] sm:$0xff]  ;;  %v3560_v26 = vld [vmem:[%s6892_s2 + $0x7d0] sm:$0xff] }
 0x129   : > { %4161 = vmatprep.subr.bf16.mxu1 %v4160_v31  ;;  %v3486_v31 = vld [vmem:[%s6892_s2 + $0x5a0] sm:$0xff] }
 0x12a   : > { %v4202_v35 = vpack.c.bf16 %v3488_v32, %v3486_v31  ;;  %v3527_v31 = vld [vmem:[%s6892_s2 + $0x6c8] sm:$0xff]  ;;  %v3529_v32 = vld [vmem:[%s6892_s2 + $0x6d8] sm:$0xff] }
 0x12c   : > { %4163 = vmatpush1.bf16.msra.mxu1 %v4162_v36  ;;  %v4204_v36 = vpack.c.bf16 %v3493_v34, %v3491_v33  ;;  %v4236_v34 = vpack.c.bf16 %v3529_v32, %v3527_v31  ;;  %v3562_v31 = vld [vmem:[%s6892_s2 + $0x7e0] sm:$0xff]  ;;  %v3564_v32 = vld [vmem:[%s6892_s2 + $0x7f0] sm:$0xff] }
 0x12d   : > { %4165 = vmatprep.subr.bf16.mxu1 %v4164_v37  ;;  %v3490_v37 = vld [vmem:[%s6892_s2 + $0x5c0] sm:$0xff] }
 0x12e   : > { %v4206_v41 = vpack.c.bf16 %v3492_v38, %v3490_v37  ;;  %v493_v48 = vpop.f32.mrb[0].mxu0  ;;  %v3531_v37 = vld [vmem:[%s6892_s2 + $0x6e8] sm:$0xff]  ;;  %v3533_v38 = vld [vmem:[%s6892_s2 + $0x6f8] sm:$0xff] }
 0x12f   : > { %v495_v49 = vpop.f32.mrb[1].mxu0 }
 0x130   : > { %4167 = vmatpush1.bf16.msra.mxu1 %v4166_v42  ;;  %v4208_v42 = vpack.c.bf16 %v3497_v40, %v3495_v39  ;;  %729 = vmatprep.subr.mxu0 %v495_v49  ;;  %v4240_v40 = vpack.c.bf16 %v3533_v38, %v3531_v37  ;;  %v3534_v49 = vld [vmem:[%s6892_s2 + $0x700] sm:$0xff]  ;;  %v1280_v38 = vld [vmem:[%s6895_s5 + $0x10] sm:$0xff] }
 0x131   : > { %4169 = vmatprep.subr.bf16.mxu1 %v4168_v44  ;;  %v3494_v44 = vld [vmem:[%s6892_s2 + $0x5e0] sm:$0xff]  ;;  %730 = vmatpush1.msra.mxu0 %v493_v48 }
 0x132   : > { %v4210_v47 = vpack.c.bf16 %v3496_v45, %v3494_v44  ;;  %v3535_v44 = vld [vmem:[%s6892_s2 + $0x708] sm:$0xff]  ;;  %v3537_v45 = vld [vmem:[%s6892_s2 + $0x718] sm:$0xff]  ;;  %v1278_v37 = vld [vmem:[%s6895_s5] sm:$0xff] }
 0x133   : > { %v4244_v48 = vpack.c.bf16 %v3537_v45, %v3535_v44  ;;  %v1284_v44 = vld [vmem:[%s6895_s5 + $0x30] sm:$0xff] }
 0x134   : > { %4171 = vmatpush1.bf16.msra.mxu1 %v4170_v50  ;;  %v498_v50 = vld [vmem:[%s6891_s1] sm:$0xff] }
 0x135   : > { %4173 = vmatprep.subr.bf16.mxu1 %v4172_v51  ;;  %3432 = vmatmul.mubr.msk.f32.vlgmr.msra.gmra.mrb[2].mxu0 %vm639_vm0, %v498_v50  ;;  %v499_v51 = vld [vmem:[%s6891_s1 + $0x8] sm:$0xff]  ;;  %v3536_v50 = vld [vmem:[%s6892_s2 + $0x710] sm:$0xff] }
 0x136   : > { %799 = vmatprep.mubr.f32.mxu0 %v4742_v53 }
 0x138   : > { %4175 = vmatpush1.bf16.msra.mxu1 %v4174_v57  ;;  %v3503_v57 = vld [vmem:[%s6892_s2 + $0x608] sm:$0xff] }
 0x139   : > { %4177 = vmatprep.subr.bf16.mxu1 %v4176_v58  ;;  %3433 = vmatmul.mubr.msk.f32.gmra.mrb[4].mxu0 %vm639_vm0, %v499_v51  ;;  %v3505_v58 = vld [vmem:[%s6892_s2 + $0x618] sm:$0xff]  ;;  %v3539_v51 = vld [vmem:[%s6892_s2 + $0x728] sm:$0xff] }
 0x13a   : > { %1015 = vmatprep.mubr.f32.mxu0 %v4742_v53 }
 0x13c   : > { %4179 = vmatpush1.bf16.msra.mxu1 %v4178_v63 }
 0x13d   : > { %4181 = vmatprep.subr.bf16.mxu1 %v4180_v0  ;;  %v4212_v0 = vpack.c.bf16 %v3505_v58, %v3503_v57  ;;  %v3541_v57 = vld [vmem:[%s6892_s2 + $0x738] sm:$0xff]  ;;  %v4246_v58 = vpack.c.bf16 %v3536_v50, %v3534_v49  ;;  %v1286_v50 = vld [vmem:[%s6895_s5 + $0x40] sm:$0xff] }
 0x13e   : > { %v4248_v59 = vpack.c.bf16 %v3541_v57, %v3539_v51  ;;  %v1288_v51 = vld [vmem:[%s6895_s5 + $0x50] sm:$0xff]  ;;  %v1291_v57 = vld [vmem:[%s6895_s5 + $0x68] sm:$0xff] }
 0x140   : > { %4183 = vmatpush1.bf16.msra.mxu1 %v4182_v5  ;;  %v3506_v5 = vld [vmem:[%s6892_s2 + $0x620] sm:$0xff] }
 0x141   : > { %4185 = vmatprep.subr.bf16.mxu1 %v4184_v6  ;;  %v3508_v6 = vld [vmem:[%s6892_s2 + $0x630] sm:$0xff] }
 0x142   : > { %v4218_v9 = vpack.c.bf16 %v3508_v6, %v3506_v5  ;;  %v3549_v5 = vld [vmem:[%s6892_s2 + $0x778] sm:$0xff] }
 0x144   : > { %4187 = vmatpush1.bf16.msra.mxu1 %v4186_v11  ;;  %v4220_v11 = vpack.c.bf16 %v3513_v8, %v3511_v7  ;;  %v3546_v8 = vld [vmem:[%s6892_s2 + $0x760] sm:$0xff] }
 0x145   : > { %4189 = vmatprep.subr.bf16.mxu1 %v4188_v12  ;;  %v3510_v12 = vld [vmem:[%s6892_s2 + $0x640] sm:$0xff] }
 0x146   : > { %v4222_v16 = vpack.c.bf16 %v3512_v13, %v3510_v12 }
 0x148   : > { %4191 = vmatpush1.bf16.msra.mxu1 %v4190_v17  ;;  %v4224_v17 = vpack.c.bf16 %v3517_v15, %v3515_v14  ;;  %v3550_v14 = vld [vmem:[%s6892_s2 + $0x780] sm:$0xff]  ;;  %v3552_v15 = vld [vmem:[%s6892_s2 + $0x790] sm:$0xff] }
 0x149   : > { %4193 = vmatprep.subr.bf16.mxu1 %v4192_v18  ;;  %v3514_v18 = vld [vmem:[%s6892_s2 + $0x660] sm:$0xff] }
 0x14c   : > { %4195 = vmatpush1.bf16.msra.mxu1 %v4194_v23  ;;  %v3518_v23 = vld [vmem:[%s6892_s2 + $0x680] sm:$0xff] }
 0x14d   : > { %4197 = vmatprep.subr.bf16.mxu1 %v4196_v24  ;;  %v3520_v24 = vld [vmem:[%s6892_s2 + $0x690] sm:$0xff] }
 0x14e   : > { %v4230_v27 = vpack.c.bf16 %v3520_v24, %v3518_v23  ;;  %v4266_v23 = vpack.c.bf16 %v3556_v21, %v3554_v20  ;;  %v1306_v21 = vld [vmem:[%s6895_s5 + $0xe0] sm:$0xff] }
 0x150   : > { %4199 = vmatpush1.bf16.msra.mxu1 %v4198_v29  ;;  %v3522_v29 = vld [vmem:[%s6892_s2 + $0x6a0] sm:$0xff] }
 0x151   : > { %4201 = vmatprep.subr.bf16.mxu1 %v4200_v30  ;;  %v3524_v30 = vld [vmem:[%s6892_s2 + $0x6b0] sm:$0xff] }
 0x152   : > { %v4234_v33 = vpack.c.bf16 %v3524_v30, %v3522_v29  ;;  %v4270_v29 = vpack.c.bf16 %v3560_v26, %v3558_v25  ;;  %v1310_v26 = vld [vmem:[%s6895_s5 + $0x100] sm:$0xff] }
 0x154   : > { %4203 = vmatpush1.bf16.msra.mxu1 %v4202_v35  ;;  %v3526_v35 = vld [vmem:[%s6892_s2 + $0x6c0] sm:$0xff] }
 0x155   : > { %4205 = vmatprep.subr.bf16.mxu1 %v4204_v36  ;;  %v3528_v36 = vld [vmem:[%s6892_s2 + $0x6d0] sm:$0xff] }
 0x156   : > { %v4238_v39 = vpack.c.bf16 %v3528_v36, %v3526_v35  ;;  %v1281_v35 = vld [vmem:[%s6895_s5 + $0x18] sm:$0xff] }
 0x158   : > { %4207 = vmatpush1.bf16.msra.mxu1 %v4206_v41  ;;  %v3530_v41 = vld [vmem:[%s6892_s2 + $0x6e0] sm:$0xff] }
 0x159   : > { %4209 = vmatprep.subr.bf16.mxu1 %v4208_v42  ;;  %v3532_v42 = vld [vmem:[%s6892_s2 + $0x6f0] sm:$0xff] }
 0x15c   : > { %4211 = vmatpush1.bf16.msra.mxu1 %v4210_v47  ;;  %v4242_v47 = vpack.c.bf16 %v3532_v42, %v3530_v41  ;;  %v1282_v42 = vld [vmem:[%s6895_s5 + $0x20] sm:$0xff] }
 0x15d   : > { %v4282_v45 = vpack.c.bf16 %v1284_v44, %v1282_v42  ;;  %v3566_v44 = vld [vmem:[%s6891_s1 + $0x30] sm:$0xff] }
 0x15f   : > { %936 = vmatmul.mubr.f32.vlgmr.msra.gmra.mrb[6].mxu1 %v5038_v46 }
 0x1f2   : > { %v5425_v52 = vpop.f32.mrb[2].mxu1 }
 0x1f3   : > { %v5427_v54 = vpop.f32.mrb[3].mxu1 }
 0x1f6   : > { %v5429_v55 = vpop.f32.mrb[4].mxu1 }
 0x1f7   : > { %v5431_v56 = vpop.f32.mrb[5].mxu1 }
 0x232   : > { %v937_v63 = vpop.f32.mrb[6].mxu1 }
 0x233   : > { %v939_v1 = vpop.f32.mrb[7].mxu1 }
 0x234   : > { %951 = vmatprep.subr.mxu0 %v939_v1 }
 0x235   : > { %952 = vmatpush1.msra.mxu0 %v937_v63  ;;  %v3545_v63 = vld [vmem:[%s6892_s2 + $0x758] sm:$0xff] }
 0x236   : > { %4213 = vmatprep.subr.bf16.mxu0 %v4212_v0  ;;  %3500 = vmatmul.mubr.msk.f32.vlgmr.msra.gmra.mrb[2].mxu0 %vm639_vm0, %v3498_v2  ;;  %v4250_v0 = vpack.c.bf16 %v3540_v61, %v3538_v60  ;;  %v4252_v1 = vpack.c.bf16 %v3545_v63, %v3543_v62  ;;  %v3542_v2 = vld [vmem:[%s6892_s2 + $0x740] sm:$0xff]  ;;  %v1292_v62 = vld [vmem:[%s6895_s5 + $0x70] sm:$0xff]  ;;  %v1295_v63 = vld [vmem:[%s6895_s5 + $0x88] sm:$0xff] }
 0x237   : > { %4215 = vmatpush1.bf16.msra.mxu0 %v4214_v3  ;;  %1021 = vmatprep.mubr.f32.mxu0 %v4742_v53  ;;  %v3544_v3 = vld [vmem:[%s6892_s2 + $0x750] sm:$0xff]  ;;  %v1290_v61 = vld [vmem:[%s6895_s5 + $0x60] sm:$0xff] }
 0x238   : > { %4217 = vmatprep.subr.bf16.mxu0 %v4216_v4  ;;  %v3547_v4 = vld [vmem:[%s6892_s2 + $0x768] sm:$0xff]  ;;  %v4254_v6 = vpack.c.bf16 %v3544_v3, %v3542_v2  ;;  %v1294_v3 = vld [vmem:[%s6895_s5 + $0x80] sm:$0xff] }
 0x239   : > { %v4256_v7 = vpack.c.bf16 %v3549_v5, %v3547_v4  ;;  %v1296_v4 = vld [vmem:[%s6895_s5 + $0x90] sm:$0xff]  ;;  %v1299_v5 = vld [vmem:[%s6895_s5 + $0xa8] sm:$0xff] }
 0x23a   : > { %3501 = vmatmul.mubr.msk.f32.gmra.mrb[4].mxu0 %vm639_vm0, %v3499_v10  ;;  %v3551_v10 = vld [vmem:[%s6892_s2 + $0x788] sm:$0xff] }
 0x23b   : > { %4219 = vmatpush1.bf16.msra.mxu0 %v4218_v9  ;;  %1161 = vmatprep.mubr.f32.mxu0 %v4907_v43  ;;  %v4226_v43 = vpack.c.bf16 %v3516_v19, %v3514_v18  ;;  %v3548_v9 = vld [vmem:[%s6892_s2 + $0x770] sm:$0xff]  ;;  %v4262_v18 = vpack.c.bf16 %v3552_v15, %v3550_v14  ;;  %v1302_v15 = vld [vmem:[%s6895_s5 + $0xc0] sm:$0xff] }
 0x23c   : > { %4221 = vmatprep.subr.bf16.mxu0 %v4220_v11  ;;  %v3553_v11 = vld [vmem:[%s6892_s2 + $0x798] sm:$0xff]  ;;  %v4258_v12 = vpack.c.bf16 %v3548_v9, %v3546_v8  ;;  %v1298_v9 = vld [vmem:[%s6895_s5 + $0xa0] sm:$0xff] }
 0x23d   : > { %v4260_v13 = vpack.c.bf16 %v3553_v11, %v3551_v10  ;;  %v1300_v10 = vld [vmem:[%s6895_s5 + $0xb0] sm:$0xff]  ;;  %v1303_v11 = vld [vmem:[%s6895_s5 + $0xc8] sm:$0xff] }
 0x23f   : > { %4223 = vmatpush1.bf16.msra.mxu0 %v4222_v16  ;;  %v3555_v16 = vld [vmem:[%s6892_s2 + $0x7a8] sm:$0xff] }
 0x240   : > { %4225 = vmatprep.subr.bf16.mxu0 %v4224_v17  ;;  %v3557_v17 = vld [vmem:[%s6892_s2 + $0x7b8] sm:$0xff] }
 0x241   : > { %v4264_v19 = vpack.c.bf16 %v3557_v17, %v3555_v16  ;;  %v1304_v16 = vld [vmem:[%s6895_s5 + $0xd0] sm:$0xff]  ;;  %v1307_v17 = vld [vmem:[%s6895_s5 + $0xe8] sm:$0xff] }
 0x243   : > { %4227 = vmatpush1.bf16.msra.mxu0 %v4226_v43  ;;  %v3559_v43 = vld [vmem:[%s6892_s2 + $0x7c8] sm:$0xff] }
 0x244   : > { %4229 = vmatprep.subr.bf16.mxu0 %v4228_v22  ;;  %v3561_v22 = vld [vmem:[%s6892_s2 + $0x7d8] sm:$0xff] }
 0x245   : > { %v4268_v24 = vpack.c.bf16 %v3561_v22, %v3559_v43  ;;  %v1308_v43 = vld [vmem:[%s6895_s5 + $0xf0] sm:$0xff]  ;;  %v1311_v22 = vld [vmem:[%s6895_s5 + $0x108] sm:$0xff] }
 0x247   : > { %4231 = vmatpush1.bf16.msra.mxu0 %v4230_v27  ;;  %v3563_v27 = vld [vmem:[%s6892_s2 + $0x7e8] sm:$0xff] }
 0x248   : > { %4233 = vmatprep.subr.bf16.mxu0 %v4232_v28  ;;  %v3565_v28 = vld [vmem:[%s6892_s2 + $0x7f8] sm:$0xff] }
 0x249   : > { %v4272_v30 = vpack.c.bf16 %v3565_v28, %v3563_v27  ;;  %v1312_v27 = vld [vmem:[%s6895_s5 + $0x110] sm:$0xff]  ;;  %v1315_v28 = vld [vmem:[%s6895_s5 + $0x128] sm:$0xff] }
 0x24b   : > { %4235 = vmatpush1.bf16.msra.mxu0 %v4234_v33  ;;  %v4274_v33 = vpack.c.bf16 %v3564_v32, %v3562_v31  ;;  %v1314_v32 = vld [vmem:[%s6895_s5 + $0x120] sm:$0xff] }
 0x24c   : > { %4237 = vmatprep.subr.bf16.mxu0 %v4236_v34  ;;  %v1279_v34 = vld [vmem:[%s6895_s5 + $0x8] sm:$0xff] }
 0x24d   : > { %v4276_v36 = vpack.c.bf16 %v1281_v35, %v1279_v34  ;;  %v3573_v35 = vld [vmem:[%s6895_s5 + $0x188] sm:$0xff] }
 0x24f   : > { %4239 = vmatpush1.bf16.msra.mxu0 %v4238_v39  ;;  %v1283_v39 = vld [vmem:[%s6895_s5 + $0x28] sm:$0xff]  ;;  %4277 = vmatprep.subr.bf16.mxu1 %v4276_v36  ;;  %v3575_v36 = vld [vmem:[%s6895_s5 + $0x198] sm:$0xff] }
 0x250   : > { %4241 = vmatprep.subr.bf16.mxu0 %v4240_v40  ;;  %v1285_v40 = vld [vmem:[%s6895_s5 + $0x38] sm:$0xff] }
 0x251   : > { %v4280_v41 = vpack.c.bf16 %v1285_v40, %v1283_v39  ;;  %v3579_v39 = vld [vmem:[%s6895_s5 + $0x1b8] sm:$0xff] }
 0x253   : > { %4243 = vmatpush1.bf16.msra.mxu0 %v4242_v47  ;;  %v1287_v47 = vld [vmem:[%s6895_s5 + $0x48] sm:$0xff] }
 0x254   : > { %4245 = vmatprep.subr.bf16.mxu0 %v4244_v48  ;;  %v1289_v48 = vld [vmem:[%s6895_s5 + $0x58] sm:$0xff] }
 0x255   : > { %v4284_v49 = vpack.c.bf16 %v1289_v48, %v1287_v47  ;;  %v3576_v48 = vld [vmem:[%s6895_s5 + $0x1a0] sm:$0xff] }
 0x257   : > { %4247 = vmatpush1.bf16.msra.mxu0 %v4246_v58  ;;  %v4286_v58 = vpack.c.bf16 %v1288_v51, %v1286_v50  ;;  %v3581_v50 = vld [vmem:[%s6895_s5 + $0x1c8] sm:$0xff]  ;;  %v3583_v51 = vld [vmem:[%s6895_s5 + $0x1d8] sm:$0xff] }
 0x258   : > { %4249 = vmatprep.subr.bf16.mxu0 %v4248_v59  ;;  %v1293_v59 = vld [vmem:[%s6895_s5 + $0x78] sm:$0xff] }
 0x259   : > { %v4288_v60 = vpack.c.bf16 %v1293_v59, %v1291_v57  ;;  %v3567_v57 = vld [vmem:[%s6891_s1 + $0x38] sm:$0xff]  ;;  %v4332_v59 = vpack.c.bf16 %v3583_v51, %v3581_v50  ;;  %v1320_v50 = vld [vmem:[%s6895_s5 + $0x150] sm:$0xff] }
 0x25b   : > { %4251 = vmatpush1.bf16.msra.mxu0 %v4250_v0  ;;  %v1297_v0 = vld [vmem:[%s6895_s5 + $0x98] sm:$0xff] }
 0x25c   : > { %4253 = vmatprep.subr.bf16.mxu0 %v4252_v1  ;;  %v4290_v1 = vpack.c.bf16 %v1292_v62, %v1290_v61  ;;  %v4292_v2 = vpack.c.bf16 %v1297_v0, %v1295_v63  ;;  %v3582_v61 = vld [vmem:[%s6895_s5 + $0x1d0] sm:$0xff]  ;;  %v3585_v62 = vld [vmem:[%s6895_s5 + $0x1e8] sm:$0xff]  ;;  %v3587_v63 = vld [vmem:[%s6895_s5 + $0x1f8] sm:$0xff] }
 0x25f   : > { %4255 = vmatpush1.bf16.msra.mxu0 %v4254_v6  ;;  %v1301_v6 = vld [vmem:[%s6895_s5 + $0xb8] sm:$0xff] }
 0x260   : > { %4257 = vmatprep.subr.bf16.mxu0 %v4256_v7  ;;  %v4294_v7 = vpack.c.bf16 %v1296_v4, %v1294_v3  ;;  %v4296_v8 = vpack.c.bf16 %v1301_v6, %v1299_v5  ;;  %v3586_v3 = vld [vmem:[%s6895_s5 + $0x1f0] sm:$0xff]  ;;  %v3589_v4 = vld [vmem:[%s6895_s5 + $0x208] sm:$0xff]  ;;  %v3591_v5 = vld [vmem:[%s6895_s5 + $0x218] sm:$0xff] }
 0x263   : > { %4259 = vmatpush1.bf16.msra.mxu0 %v4258_v12  ;;  %v1305_v12 = vld [vmem:[%s6895_s5 + $0xd8] sm:$0xff] }
 0x264   : > { %4261 = vmatprep.subr.bf16.mxu0 %v4260_v13  ;;  %v4298_v13 = vpack.c.bf16 %v1300_v10, %v1298_v9  ;;  %v4300_v14 = vpack.c.bf16 %v1305_v12, %v1303_v11  ;;  %v3590_v9 = vld [vmem:[%s6895_s5 + $0x210] sm:$0xff]  ;;  %v3593_v10 = vld [vmem:[%s6895_s5 + $0x228] sm:$0xff]  ;;  %v3595_v11 = vld [vmem:[%s6895_s5 + $0x238] sm:$0xff] }
 0x267   : > { %4263 = vmatpush1.bf16.msra.mxu0 %v4262_v18  ;;  %v1309_v18 = vld [vmem:[%s6895_s5 + $0xf8] sm:$0xff] }
 0x268   : > { %4265 = vmatprep.subr.bf16.mxu0 %v4264_v19  ;;  %v4302_v19 = vpack.c.bf16 %v1304_v16, %v1302_v15  ;;  %v4304_v20 = vpack.c.bf16 %v1309_v18, %v1307_v17  ;;  %v3594_v15 = vld [vmem:[%s6895_s5 + $0x230] sm:$0xff]  ;;  %v3597_v16 = vld [vmem:[%s6895_s5 + $0x248] sm:$0xff]  ;;  %v3599_v17 = vld [vmem:[%s6895_s5 + $0x258] sm:$0xff] }
 0x26b   : > { %4267 = vmatpush1.bf16.msra.mxu0 %v4266_v23  ;;  %v1313_v23 = vld [vmem:[%s6895_s5 + $0x118] sm:$0xff] }
 0x26c   : > { %4269 = vmatprep.subr.bf16.mxu0 %v4268_v24  ;;  %v4306_v24 = vpack.c.bf16 %v1308_v43, %v1306_v21  ;;  %v4308_v25 = vpack.c.bf16 %v1313_v23, %v1311_v22  ;;  %v3598_v21 = vld [vmem:[%s6895_s5 + $0x250] sm:$0xff]  ;;  %v3601_v43 = vld [vmem:[%s6895_s5 + $0x268] sm:$0xff]  ;;  %v3603_v22 = vld [vmem:[%s6895_s5 + $0x278] sm:$0xff] }
 0x26f   : > { %4271 = vmatpush1.bf16.msra.mxu0 %v4270_v29  ;;  %v1317_v29 = vld [vmem:[%s6895_s5 + $0x138] sm:$0xff] }
 0x270   : > { %4273 = vmatprep.subr.bf16.mxu0 %v4272_v30  ;;  %v4310_v30 = vpack.c.bf16 %v1312_v27, %v1310_v26  ;;  %v4312_v31 = vpack.c.bf16 %v1317_v29, %v1315_v28  ;;  %v3602_v26 = vld [vmem:[%s6895_s5 + $0x270] sm:$0xff]  ;;  %v3605_v27 = vld [vmem:[%s6895_s5 + $0x288] sm:$0xff]  ;;  %v3607_v28 = vld [vmem:[%s6895_s5 + $0x298] sm:$0xff] }
 0x273   : > { %4275 = vmatpush1.bf16.msra.mxu0 %v4274_v33  ;;  %v1316_v33 = vld [vmem:[%s6895_s5 + $0x130] sm:$0xff] }
 0x274   : > { %v4314_v34 = vpack.c.bf16 %v1316_v33, %v1314_v32  ;;  %v3606_v32 = vld [vmem:[%s6895_s5 + $0x290] sm:$0xff]  ;;  %v3609_v33 = vld [vmem:[%s6895_s5 + $0x2a8] sm:$0xff] }
 0x276   : > { %1162 = vmatmul.mubr.f32.vlgmr.msra.gmra.mrb[6].mxu0 %v5038_v46  ;;  %v4278_v46 = vpack.c.bf16 %v1280_v38, %v1278_v37  ;;  %v3572_v37 = vld [vmem:[%s6895_s5 + $0x180] sm:$0xff]  ;;  %v3574_v38 = vld [vmem:[%s6895_s5 + $0x190] sm:$0xff] }
 0x277   : > { %1241 = vmatprep.mubr.f32.mxu0 %v4742_v53 }
 0x278   : > { %4279 = vmatpush1.bf16.msra.mxu1 %v4278_v46  ;;  %v3577_v46 = vld [vmem:[%s6895_s5 + $0x1a8] sm:$0xff] }
 0x279   : > { %4281 = vmatprep.subr.bf16.mxu1 %v4280_v41  ;;  %v4324_v41 = vpack.c.bf16 %v3575_v36, %v3573_v35  ;;  %v4328_v47 = vpack.c.bf16 %v3579_v39, %v3577_v46  ;;  %v3613_v39 = vld [vmem:[%s6895_s5 + $0x2c8] sm:$0xff] }
 0x27c   : > { %4283 = vmatpush1.bf16.msra.mxu1 %v4282_v45  ;;  %v4326_v45 = vpack.c.bf16 %v3574_v38, %v3572_v37  ;;  %v3608_v37 = vld [vmem:[%s6895_s5 + $0x2a0] sm:$0xff]  ;;  %v3610_v38 = vld [vmem:[%s6895_s5 + $0x2b0] sm:$0xff] }
 0x27d   : > { %4285 = vmatprep.subr.bf16.mxu1 %v4284_v49  ;;  %v3578_v49 = vld [vmem:[%s6895_s5 + $0x1b0] sm:$0xff]  ;;  %v4362_v46 = vpack.c.bf16 %v3610_v38, %v3608_v37 }
 0x280   : > { %4287 = vmatpush1.bf16.msra.mxu1 %v4286_v58  ;;  %v4330_v58 = vpack.c.bf16 %v3578_v49, %v3576_v48  ;;  %v3614_v48 = vld [vmem:[%s6895_s5 + $0x2d0] sm:$0xff]  ;;  %v1318_v49 = vld [vmem:[%s6895_s5 + $0x140] sm:$0xff] }
 0x281   : > { %4289 = vmatprep.subr.bf16.mxu1 %v4288_v60  ;;  %v3580_v60 = vld [vmem:[%s6895_s5 + $0x1c0] sm:$0xff] }
 0x282   : > { %v4334_v0 = vpack.c.bf16 %v3582_v61, %v3580_v60  ;;  %v1323_v61 = vld [vmem:[%s6895_s5 + $0x168] sm:$0xff] }
 0x284   : > { %4291 = vmatpush1.bf16.msra.mxu1 %v4290_v1  ;;  %v4336_v1 = vpack.c.bf16 %v3587_v63, %v3585_v62  ;;  %v1325_v62 = vld [vmem:[%s6895_s5 + $0x178] sm:$0xff]  ;;  %v3616_v63 = vld [vmem:[%s6895_s5 + $0x2e0] sm:$0xff] }
 0x285   : > { %4293 = vmatprep.subr.bf16.mxu1 %v4292_v2  ;;  %v3584_v2 = vld [vmem:[%s6895_s5 + $0x1e0] sm:$0xff] }
 0x286   : > { %v4338_v6 = vpack.c.bf16 %v3586_v3, %v3584_v2  ;;  %v1322_v2 = vld [vmem:[%s6895_s5 + $0x160] sm:$0xff]  ;;  %v1324_v3 = vld [vmem:[%s6895_s5 + $0x170] sm:$0xff] }
 0x288   : > { %4295 = vmatpush1.bf16.msra.mxu1 %v4294_v7  ;;  %v4340_v7 = vpack.c.bf16 %v3591_v5, %v3589_v4  ;;  %v4322_v5 = vpack.c.bf16 %v1324_v3, %v1322_v2  ;;  %v3661_v2 = vld [vmem:[%s6895_s5 + $0x3d8] sm:$0xff] }
 0x289   : > { %4297 = vmatprep.subr.bf16.mxu1 %v4296_v8  ;;  %v3588_v8 = vld [vmem:[%s6895_s5 + $0x200] sm:$0xff] }
 0x28a   : > { %v4342_v12 = vpack.c.bf16 %v3590_v9, %v3588_v8  ;;  %v1260_v9 = vlaneseq }
 0x28c   : > { %4299 = vmatpush1.bf16.msra.mxu1 %v4298_v13  ;;  %v4344_v13 = vpack.c.bf16 %v3595_v11, %v3593_v10  ;;  %v5940_v10 = vshrl.u32 %v1260_v9, 7 }
 0x28d   : > { %4301 = vmatprep.subr.bf16.mxu1 %v4300_v14  ;;  %v3592_v14 = vld [vmem:[%s6895_s5 + $0x220] sm:$0xff] }
 0x28e   : > { %v4346_v18 = vpack.c.bf16 %v3594_v15, %v3592_v14  ;;  %v1262_v11 = vsub.s32 0, %v5940_v10 }
 0x290   : > { %4303 = vmatpush1.bf16.msra.mxu1 %v4302_v19  ;;  %v4348_v19 = vpack.c.bf16 %v3599_v17, %v3597_v16 }
 0x291   : > { %4305 = vmatprep.subr.bf16.mxu1 %v4304_v20  ;;  %v3596_v20 = vld [vmem:[%s6895_s5 + $0x240] sm:$0xff] }
 0x292   : > { %v4350_v23 = vpack.c.bf16 %v3598_v21, %v3596_v20  ;;  %v3634_v21 = vld [vmem:[%s6895_s5 + $0x300] sm:$0xff] }
 0x294   : > { %4307 = vmatpush1.bf16.msra.mxu1 %v4306_v24  ;;  %v4352_v24 = vpack.c.bf16 %v3603_v22, %v3601_v43  ;;  %v3636_v43 = vld [vmem:[%s6895_s5 + $0x310] sm:$0xff] }
 0x295   : > { %4309 = vmatprep.subr.bf16.mxu1 %v4308_v25  ;;  %v3600_v25 = vld [vmem:[%s6895_s5 + $0x260] sm:$0xff] }
 0x296   : > { %v4354_v29 = vpack.c.bf16 %v3602_v26, %v3600_v25 }
 0x298   : > { %4311 = vmatpush1.bf16.msra.mxu1 %v4310_v30  ;;  %v4356_v30 = vpack.c.bf16 %v3607_v28, %v3605_v27  ;;  %v4382_v28 = vpack.c.bf16 %v3636_v43, %v3634_v21  ;;  %v3668_v21 = vld [vmem:[%s6895_s5 + $0x410] sm:$0xff]  ;;  %v3671_v43 = vld [vmem:[%s6895_s5 + $0x428] sm:$0xff] }
 0x299   : > { %4313 = vmatprep.subr.bf16.mxu1 %v4312_v31  ;;  %v3604_v31 = vld [vmem:[%s6895_s5 + $0x280] sm:$0xff] }
 0x29a   : > { %v4358_v35 = vpack.c.bf16 %v3606_v32, %v3604_v31  ;;  %v3638_v32 = vld [vmem:[%s6895_s5 + $0x320] sm:$0xff] }
 0x29c   : > { %4315 = vmatpush1.bf16.msra.mxu1 %v4314_v34  ;;  %v3611_v34 = vld [vmem:[%s6895_s5 + $0x2b8] sm:$0xff] }
 0x29d   : > { %v4360_v36 = vpack.c.bf16 %v3611_v34, %v3609_v33  ;;  %v3640_v33 = vld [vmem:[%s6895_s5 + $0x330] sm:$0xff]  ;;  %v3645_v34 = vld [vmem:[%s6895_s5 + $0x358] sm:$0xff] }
 0x349   : > { %v1163_v40 = vpop.f32.mrb[6].mxu0 }
 0x34a   : > { %v1165_v42 = vpop.f32.mrb[7].mxu0 }
 0x34b   : > { %1177 = vmatprep.subr.mxu0 %v1165_v42  ;;  %v1319_v42 = vld [vmem:[%s6895_s5 + $0x148] sm:$0xff] }
 0x34c   : > { %1178 = vmatpush1.msra.mxu0 %v1163_v40  ;;  %v3615_v40 = vld [vmem:[%s6895_s5 + $0x2d8] sm:$0xff] }
 0x34d   : > { %3568 = vmatmul.mubr.msk.f32.vlgmr.msra.gmra.mrb[2].mxu0 %vm639_vm0, %v3566_v44  ;;  %4325 = vmatprep.subr.bf16.mxu0 %v4324_v41  ;;  %v4364_v41 = vpack.c.bf16 %v3615_v40, %v3613_v39  ;;  %v1321_v44 = vld [vmem:[%s6895_s5 + $0x158] sm:$0xff]  ;;  %v3644_v39 = vld [vmem:[%s6895_s5 + $0x350] sm:$0xff]  ;;  %v3647_v40 = vld [vmem:[%s6895_s5 + $0x368] sm:$0xff] }
 0x34e   : > { %1247 = vmatprep.mubr.f32.mxu0 %v4742_v53  ;;  %4327 = vmatpush1.bf16.msra.mxu0 %v4326_v45  ;;  %v3612_v45 = vld [vmem:[%s6895_s5 + $0x2c0] sm:$0xff] }
 0x34f   : > { %4329 = vmatprep.subr.bf16.mxu0 %v4328_v47  ;;  %v4316_v47 = vpack.c.bf16 %v1321_v44, %v1319_v42  ;;  %v4366_v51 = vpack.c.bf16 %v3614_v48, %v3612_v45  ;;  %v3646_v45 = vld [vmem:[%s6895_s5 + $0x360] sm:$0xff]  ;;  %v3651_v48 = vld [vmem:[%s6895_s5 + $0x388] sm:$0xff] }
 0x351   : > { %3569 = vmatmul.mubr.msk.f32.gmra.mrb[4].mxu0 %vm639_vm0, %v3567_v57  ;;  %v4318_v57 = vpack.c.bf16 %v1320_v50, %v1318_v49  ;;  %4317 = vmatprep.subr.bf16.mxu1 %v4316_v47  ;;  %v3648_v47 = vld [vmem:[%s6895_s5 + $0x370] sm:$0xff]  ;;  %v3653_v49 = vld [vmem:[%s6895_s5 + $0x398] sm:$0xff] }
 0x352   : > { %4331 = vmatpush1.bf16.msra.mxu0 %v4330_v58  ;;  %v3617_v58 = vld [vmem:[%s6895_s5 + $0x2e8] sm:$0xff]  ;;  %v4394_v50 = vpack.c.bf16 %v3648_v47, %v3646_v45 }
 0x353   : > { %4333 = vmatprep.subr.bf16.mxu0 %v4332_v59  ;;  %v3619_v59 = vld [vmem:[%s6895_s5 + $0x2f8] sm:$0xff]  ;;  %4319 = vmatpush1.bf16.msra.mxu1 %v4318_v57  ;;  %v3650_v57 = vld [vmem:[%s6895_s5 + $0x380] sm:$0xff] }
 0x354   : > { %v4368_v60 = vpack.c.bf16 %v3619_v59, %v3617_v58  ;;  %v3652_v58 = vld [vmem:[%s6895_s5 + $0x390] sm:$0xff]  ;;  %v3655_v59 = vld [vmem:[%s6895_s5 + $0x3a8] sm:$0xff] }
 0x356   : > { %4335 = vmatpush1.bf16.msra.mxu0 %v4334_v0  ;;  %v4320_v0 = vpack.c.bf16 %v1325_v62, %v1323_v61  ;;  %v4398_v61 = vpack.c.bf16 %v3652_v58, %v3650_v57  ;;  %v3622_v58 = vld [vmem:[%s6894_s4 + $0x20] sm:$0xff] }
 0x357   : > { %4337 = vmatprep.subr.bf16.mxu0 %v4336_v1  ;;  %v3618_v1 = vld [vmem:[%s6895_s5 + $0x2f0] sm:$0xff] }
 0x358   : > { %v4370_v4 = vpack.c.bf16 %v3618_v1, %v3616_v63  ;;  %4321 = vmatprep.subr.bf16.mxu1 %v4320_v0  ;;  %v3654_v63 = vld [vmem:[%s6895_s5 + $0x3a0] sm:$0xff]  ;;  %v3656_v0 = vld [vmem:[%s6895_s5 + $0x3b0] sm:$0xff]  ;;  %v3659_v1 = vld [vmem:[%s6895_s5 + $0x3c8] sm:$0xff] }
 0x359   : > { %4323 = vmatpush1.bf16.msra.mxu1 %v4322_v5  ;;  %v4402_v3 = vpack.c.bf16 %v3656_v0, %v3654_v63  ;;  %v3658_v5 = vld [vmem:[%s6895_s5 + $0x3c0] sm:$0xff]  ;;  %v1411_v63 = vld [vmem:[%s6894_s4 + $0x8] sm:$0xff]  ;;  %v1412_v0 = vld [vmem:[%s6894_s4 + $0x10] sm:$0xff] }
 0x35a   : > { %4339 = vmatpush1.bf16.msra.mxu0 %v4338_v6  ;;  %v3635_v6 = vld [vmem:[%s6895_s5 + $0x308] sm:$0xff] }
 0x35b   : > { %4341 = vmatprep.subr.bf16.mxu0 %v4340_v7  ;;  %v3637_v7 = vld [vmem:[%s6895_s5 + $0x318] sm:$0xff] }
 0x35c   : > { %v4380_v8 = vpack.c.bf16 %v3637_v7, %v3635_v6  ;;  %v3660_v6 = vld [vmem:[%s6895_s5 + $0x3d0] sm:$0xff]  ;;  %v3663_v7 = vld [vmem:[%s6895_s5 + $0x3e8] sm:$0xff] }
 0x35d   : > { %v4406_v9 = vpack.c.bf16 %v3660_v6, %v3658_v5  ;;  %v3695_v5 = vld [vmem:[%s6895_s5 + $0x498] sm:$0xff] }
 0x35e   : > { %4343 = vmatpush1.bf16.msra.mxu0 %v4342_v12  ;;  %v1258_v12 = vld [vmem:[%s6893_s3] sm:$0x3] }
 0x35f   : > { %4345 = vmatprep.subr.bf16.mxu0 %v4344_v13  ;;  %v1266_v13 = vsub.s32 1, %v5940_v10  ;;  %v1263_v14 = vrot.slane %v1258_v12, %v1262_v11 }
 0x361   : > { %v1267_v16 = vrot.slane %v1258_v12, %v1266_v13 }
 0x362   : > { %4347 = vmatpush1.bf16.msra.mxu0 %v4346_v18 }
 0x363   : > { %4349 = vmatprep.subr.bf16.mxu0 %v4348_v19 }
 0x366   : > { %4351 = vmatpush1.bf16.msra.mxu0 %v4350_v23 }
 0x367   : > { %4353 = vmatprep.subr.bf16.mxu0 %v4352_v24  ;;  %v3639_v24 = vld [vmem:[%s6895_s5 + $0x328] sm:$0xff] }
 0x36a   : > { %4355 = vmatpush1.bf16.msra.mxu0 %v4354_v29 }
 0x36b   : > { %4357 = vmatprep.subr.bf16.mxu0 %v4356_v30 }
 0x36e   : > { %4359 = vmatpush1.bf16.msra.mxu0 %v4358_v35 }
 0x36f   : > { %4361 = vmatprep.subr.bf16.mxu0 %v4360_v36  ;;  %v4386_v36 = vpack.c.bf16 %v3640_v33, %v3638_v32  ;;  %v3676_v32 = vld [vmem:[%s6895_s5 + $0x450] sm:$0xff]  ;;  %v3679_v33 = vld [vmem:[%s6895_s5 + $0x468] sm:$0xff] }
 0x372   : > { %4363 = vmatpush1.bf16.msra.mxu0 %v4362_v46  ;;  %v3642_v46 = vld [vmem:[%s6895_s5 + $0x340] sm:$0xff] }
 0x373   : > { %4365 = vmatprep.subr.bf16.mxu0 %v4364_v41  ;;  %v3649_v41 = vld [vmem:[%s6895_s5 + $0x378] sm:$0xff]  ;;  %v4390_v42 = vpack.c.bf16 %v3644_v39, %v3642_v46 }
 0x374   : > { %v4392_v44 = vpack.c.bf16 %v3649_v41, %v3647_v40 }
 0x376   : > { %4367 = vmatpush1.bf16.msra.mxu0 %v4366_v51  ;;  %v4396_v51 = vpack.c.bf16 %v3653_v49, %v3651_v48 }
 0x377   : > { %4369 = vmatprep.subr.bf16.mxu0 %v4368_v60  ;;  %v3657_v60 = vld [vmem:[%s6895_s5 + $0x3b8] sm:$0xff] }
 0x378   : > { %v4400_v62 = vpack.c.bf16 %v3657_v60, %v3655_v59  ;;  %v3623_v59 = vld [vmem:[%s6894_s4 + $0x28] sm:$0xff]  ;;  %v3624_v60 = vld [vmem:[%s6894_s4 + $0x30] sm:$0xff] }
 0x37a   : > { %4371 = vmatpush1.bf16.msra.mxu0 %v4370_v4  ;;  %v4404_v4 = vpack.c.bf16 %v3661_v2, %v3659_v1  ;;  %v1413_v1 = vld [vmem:[%s6894_s4 + $0x18] sm:$0xff] }
 0x37b   : > { %4381 = vmatprep.subr.bf16.mxu0 %v4380_v8  ;;  %v3665_v8 = vld [vmem:[%s6895_s5 + $0x3f8] sm:$0xff] }
 0x37c   : > { %v4408_v12 = vpack.c.bf16 %v3665_v8, %v3663_v7 }
 0x420   : > { %v1243_v15 = vpop.f32.mrb[2].mxu0 }
 0x421   : > { %v4648_v17 = vadd.f32 %v1243_v15, %v5425_v52  ;;  %v1245_v18 = vpop.f32.mrb[3].mxu0  ;;  %v3641_v52 = vld [vmem:[%s6895_s5 + $0x338] sm:$0xff]  ;;  %v3664_v15 = vld [vmem:[%s6895_s5 + $0x3f0] sm:$0xff] }
 0x422   : > { %v4649_v19 = vadd.f32 %v1245_v18, %v5427_v54  ;;  %v4384_v31 = vpack.c.bf16 %v3641_v52, %v3639_v24  ;;  %v3670_v52 = vld [vmem:[%s6895_s5 + $0x420] sm:$0xff] }
 0x423   : > { %v1270_v20 = vadd.f32 %v4648_v17, %v1263_v14  ;;  %v3669_v17 = vld [vmem:[%s6895_s5 + $0x418] sm:$0xff] }
 0x424   : > { %v1271_v22 = vadd.f32 %v4649_v19, %v1267_v16  ;;  %v1249_v23 = vpop.f32.mrb[4].mxu0 }
 0x425   : > { %v4650_v54 = vadd.f32 %v1249_v23, %v5429_v55  ;;  %v1251_v25 = vpop.f32.mrb[5].mxu0  ;;  %v5969_v29 = vmax.f32 %v1270_v20, 0.0  ;;  %v3666_v20 = vld [vmem:[%s6895_s5 + $0x400] sm:$0xff] }
 0x426   : > { %v5966_v26 = vmax.f32 %v1271_v22, 0.0  ;;  %v4651_v27 = vadd.f32 %v1251_v25, %v5431_v56  ;;  %v3643_v56 = vld [vmem:[%s6895_s5 + $0x348] sm:$0xff]  ;;  %v3673_v22 = vld [vmem:[%s6895_s5 + $0x438] sm:$0xff]  ;;  %v4414_v23 = vpack.c.bf16 %v3668_v21, %v3666_v20  ;;  %v3696_v21 = vld [vmem:[%s6895_s5 + $0x4a0] sm:$0xff] }
 0x427   : > { %v1272_v30 = vadd.f32 %v4650_v54, %v1263_v14  ;;  %v4388_v38 = vpack.c.bf16 %v3645_v34, %v3643_v56  ;;  %v3662_v14 = vld [vmem:[%s6895_s5 + $0x3e0] sm:$0xff]  ;;  %v4416_v24 = vpack.c.bf16 %v3673_v22, %v3671_v43  ;;  %v3672_v54 = vld [vmem:[%s6895_s5 + $0x430] sm:$0xff]  ;;  %v3675_v25 = vld [vmem:[%s6895_s5 + $0x448] sm:$0xff] }
 0x428   : > { %v1273_v55 = vadd.f32 %v4651_v27, %v1267_v16  ;;  %3570 = vmatprep.mubr.msk.f32.mxu1 %vm1326_vm1, %v5966_v26  ;;  %3620 = vmatprep.mubr.msk.f32.mxu0 %vm1326_vm1, %v5966_v26  ;;  %v3667_v16 = vld [vmem:[%s6895_s5 + $0x408] sm:$0xff]  ;;  %v4410_v18 = vpack.c.bf16 %v3664_v15, %v3662_v14  ;;  %v3677_v27 = vld [vmem:[%s6895_s5 + $0x458] sm:$0xff]  ;;  %v3692_v14 = vld [vmem:[%s6895_s5 + $0x480] sm:$0xff] }
 0x429   : > { %1398 = vmatmul.mubr.f32.vlgmr.msra.gmra.mrb[8].mxu1 %v5969_v29  ;;  %1528 = vmatmul.mubr.f32.vlgmr.msra.gmra.mrb[8].mxu0 %v5969_v29  ;;  %v5991_v37 = vmax.f32 %v1272_v30, 0.0  ;;  %v4412_v19 = vpack.c.bf16 %v3669_v17, %v3667_v16  ;;  %v4420_v30 = vpack.c.bf16 %v3677_v27, %v3675_v25  ;;  %v3694_v15 = vld [vmem:[%s6895_s5 + $0x490] sm:$0xff]  ;;  %v3697_v16 = vld [vmem:[%s6895_s5 + $0x4a8] sm:$0xff]  ;;  %v3699_v17 = vld [vmem:[%s6895_s5 + $0x4b8] sm:$0xff] }
 0x42a   : > { %v5989_v35 = vmax.f32 %v1273_v55, 0.0  ;;  %4383 = vmatpush1.bf16.msra.mxu0 %v4382_v28  ;;  %v4418_v28 = vpack.c.bf16 %v3672_v54, %v3670_v52  ;;  %v3681_v55 = vld [vmem:[%s6895_s5 + $0x478] sm:$0xff]  ;;  %v4436_v20 = vpack.c.bf16 %v3699_v17, %v3697_v16  ;;  %v3698_v43 = vld [vmem:[%s6895_s5 + $0x4b0] sm:$0xff]  ;;  %v3701_v22 = vld [vmem:[%s6895_s5 + $0x4c8] sm:$0xff] }
 0x42b   : > { %4385 = vmatprep.subr.bf16.mxu0 %v4384_v31  ;;  %v3674_v31 = vld [vmem:[%s6895_s5 + $0x440] sm:$0xff]  ;;  %v4424_v34 = vpack.c.bf16 %v3681_v55, %v3679_v33  ;;  %v4438_v52 = vpack.c.bf16 %v3698_v43, %v3696_v21  ;;  %v3702_v27 = vld [vmem:[%s6895_s5 + $0x4d0] sm:$0xff]  ;;  %v3733_v17 = vld [vmem:[%s6895_s5 + $0x5c8] sm:$0xff] }
 0x42c   : > { %3571 = vmatprep.mubr.msk.f32.mxu1 %vm1326_vm1, %v5989_v35  ;;  %3621 = vmatprep.mubr.msk.f32.mxu0 %vm1326_vm1, %v5989_v35  ;;  %v4422_v56 = vpack.c.bf16 %v3676_v32, %v3674_v31  ;;  %v3700_v25 = vld [vmem:[%s6895_s5 + $0x4c0] sm:$0xff]  ;;  %v3686_v31 = vld [vmem:[%s6894_s4 + $0x50] sm:$0xff] }
 0x42d   : > { %1404 = vmatmul.mubr.f32.gmra.mrb[10].mxu1 %v5991_v37  ;;  %1534 = vmatmul.mubr.f32.gmra.mrb[10].mxu0 %v5991_v37  ;;  %v4442_v32 = vpack.c.bf16 %v3702_v27, %v3700_v25  ;;  %v3704_v55 = vld [vmem:[%s6895_s5 + $0x4e0] sm:$0xff]  ;;  %v3730_v16 = vld [vmem:[%s6895_s5 + $0x5b0] sm:$0xff] }
 0x42e   : > { %4387 = vmatpush1.bf16.msra.mxu0 %v4386_v36  ;;  %3682 = vmatprep.mubr.msk.f32.mxu0 %vm1326_vm1, %v5966_v26  ;;  %v3678_v36 = vld [vmem:[%s6895_s5 + $0x460] sm:$0xff]  ;;  %v3734_v43 = vld [vmem:[%s6895_s5 + $0x5d0] sm:$0xff] }
 0x42f   : > { %4389 = vmatprep.subr.bf16.mxu0 %v4388_v38  ;;  %1622 = vmatprep.mubr.f32.mxu1 %v4742_v53  ;;  %v3680_v38 = vld [vmem:[%s6895_s5 + $0x470] sm:$0xff]  ;;  %v3732_v21 = vld [vmem:[%s6895_s5 + $0x5c0] sm:$0xff] }
 0x430   : > { %v4426_v46 = vpack.c.bf16 %v3680_v38, %v3678_v36  ;;  %v3711_v36 = vld [vmem:[%s6895_s5 + $0x518] sm:$0xff]  ;;  %v3738_v25 = vld [vmem:[%s6895_s5 + $0x5f0] sm:$0xff] }
 0x431   : > { %v3687_v38 = vld [vmem:[%s6894_s4 + $0x58] sm:$0xff] }
 0x432   : > { %4391 = vmatpush1.bf16.msra.mxu0 %v4390_v42 }
 0x433   : > { %4393 = vmatprep.subr.bf16.mxu0 %v4392_v44 }
 0x436   : > { %4395 = vmatpush1.bf16.msra.mxu0 %v4394_v50 }
 0x437   : > { %4397 = vmatprep.subr.bf16.mxu0 %v4396_v51 }
 0x43a   : > { %4399 = vmatpush1.bf16.msra.mxu0 %v4398_v61  ;;  %v3625_v61 = vld [vmem:[%s6894_s4 + $0x38] sm:$0xff] }
 0x43b   : > { %4401 = vmatprep.subr.bf16.mxu0 %v4400_v62  ;;  %v1410_v62 = vld [vmem:[%s6894_s4] sm:$0xff] }
 0x43e   : > { %4403 = vmatpush1.bf16.msra.mxu0 %v4402_v3 }
 0x43f   : > { %4405 = vmatprep.subr.bf16.mxu0 %v4404_v4  ;;  %v3693_v4 = vld [vmem:[%s6895_s5 + $0x488] sm:$0xff] }
 0x442   : > { %4407 = vmatpush1.bf16.msra.mxu0 %v4406_v9 }
 0x443   : > { %4409 = vmatprep.subr.bf16.mxu0 %v4408_v12  ;;  %v4432_v12 = vpack.c.bf16 %v3695_v5, %v3693_v4 }
 0x446   : > { %4411 = vmatpush1.bf16.msra.mxu0 %v4410_v18  ;;  %v3684_v18 = vld [vmem:[%s6894_s4 + $0x40] sm:$0xff] }
 0x447   : > { %4413 = vmatprep.subr.bf16.mxu0 %v4412_v19  ;;  %v4434_v19 = vpack.c.bf16 %v3694_v15, %v3692_v14  ;;  %v3728_v15 = vld [vmem:[%s6895_s5 + $0x5a0] sm:$0xff] }
 0x44a   : > { %4415 = vmatpush1.bf16.msra.mxu0 %v4414_v23  ;;  %v3703_v23 = vld [vmem:[%s6895_s5 + $0x4d8] sm:$0xff] }
 0x44b   : > { %4417 = vmatprep.subr.bf16.mxu0 %v4416_v24  ;;  %v3685_v24 = vld [vmem:[%s6894_s4 + $0x48] sm:$0xff]  ;;  %v4440_v54 = vpack.c.bf16 %v3703_v23, %v3701_v22  ;;  %v3739_v23 = vld [vmem:[%s6895_s5 + $0x5f8] sm:$0xff] }
 0x44c   : > { %v3737_v22 = vld [vmem:[%s6895_s5 + $0x5e8] sm:$0xff] }
 0x44e   : > { %4419 = vmatpush1.bf16.msra.mxu0 %v4418_v28  ;;  %v3705_v28 = vld [vmem:[%s6895_s5 + $0x4e8] sm:$0xff] }
 0x44f   : > { %4421 = vmatprep.subr.bf16.mxu0 %v4420_v30  ;;  %v3707_v30 = vld [vmem:[%s6895_s5 + $0x4f8] sm:$0xff] }
 0x450   : > { %v4444_v33 = vpack.c.bf16 %v3707_v30, %v3705_v28  ;;  %v2256_v28 = vld [vmem:[%s6898_s8] sm:$0xff]  ;;  %v2257_v30 = vld [vmem:[%s6898_s8 + $0x8] sm:$0xff] }
 0x452   : > { %4423 = vmatpush1.bf16.msra.mxu0 %v4422_v56  ;;  %v3706_v56 = vld [vmem:[%s6895_s5 + $0x4f0] sm:$0xff] }
 0x453   : > { %4425 = vmatprep.subr.bf16.mxu0 %v4424_v34  ;;  %v3709_v34 = vld [vmem:[%s6895_s5 + $0x508] sm:$0xff] }
 0x456   : > { %4427 = vmatpush1.bf16.msra.mxu0 %v4426_v46  ;;  %v4446_v46 = vpack.c.bf16 %v3706_v56, %v3704_v55  ;;  %v2261_v55 = vld [vmem:[%s6898_s8 + $0x28] sm:$0xff] }
 0x459   : > { %1862 = vmatmul.mubr.f32.vlgmr.msra.gmra.mrb[12].mxu0 %v5969_v29 }
 0x45a   : > { %3683 = vmatprep.mubr.msk.f32.mxu0 %vm1326_vm1, %v5989_v35 }
 0x45d   : > { %1868 = vmatmul.mubr.f32.gmra.mrb[14].mxu0 %v5991_v37 }
 0x4fc   : > { %v1399_v39 = vpop.f32.mrb[8].mxu1  ;;  %v1529_v40 = vpop.f32.mrb[8].mxu0 }
 0x4fd   : > { %v1401_v41 = vpop.f32.mrb[9].mxu1  ;;  %v1531_v42 = vpop.f32.mrb[9].mxu0 }
 0x500   : > { %v1405_v44 = vpop.f32.mrb[10].mxu1  ;;  %v1535_v45 = vpop.f32.mrb[10].mxu0 }
 0x501   : > { %v4378_v47 = vpack.c.bf16 %v1405_v44, %v1399_v39  ;;  %v4374_v48 = vpack.c.bf16 %v1535_v45, %v1529_v40  ;;  %v1407_v49 = vpop.f32.mrb[11].mxu1  ;;  %v1537_v50 = vpop.f32.mrb[11].mxu0  ;;  %v4448_v39 = vpack.c.bf16 %v3711_v36, %v3709_v34  ;;  %v3708_v40 = vld [vmem:[%s6895_s5 + $0x500] sm:$0xff]  ;;  %v3715_v44 = vld [vmem:[%s6895_s5 + $0x538] sm:$0xff]  ;;  %v2262_v34 = vld [vmem:[%s6898_s8 + $0x30] sm:$0xff] }
 0x502   : > { %v4376_v51 = vpack.c.bf16 %v1407_v49, %v1401_v41  ;;  %v4372_v57 = vpack.c.bf16 %v1537_v50, %v1531_v42  ;;  %v3710_v41 = vld [vmem:[%s6895_s5 + $0x510] sm:$0xff]  ;;  %v3713_v42 = vld [vmem:[%s6895_s5 + $0x528] sm:$0xff]  ;;  %v2263_v36 = vld [vmem:[%s6898_s8 + $0x38] sm:$0xff] }
 0x503   : > { %v4450_v45 = vpack.c.bf16 %v3710_v41, %v3708_v40  ;;  %v3714_v49 = vld [vmem:[%s6895_s5 + $0x530] sm:$0xff]  ;;  %v3717_v50 = vld [vmem:[%s6895_s5 + $0x548] sm:$0xff] }
 0x504   : > { %4373 = vmatprep.subr.bf16.mxu1 %v4372_v57  ;;  %v2266_v41 = vld [vmem:[%s6898_s8 + $0x50] sm:$0xff] }
 0x505   : > { %4375 = vmatpush1.bf16.msra.mxu1 %v4374_v48  ;;  %v3712_v48 = vld [vmem:[%s6895_s5 + $0x520] sm:$0xff] }
 0x506   : > { %4377 = vmatprep.subr.bf16.mxu1 %v4376_v51  ;;  %v3719_v51 = vld [vmem:[%s6895_s5 + $0x558] sm:$0xff] }
 0x507   : > { %v4456_v57 = vpack.c.bf16 %v3719_v51, %v3717_v50  ;;  %v2271_v50 = vld [vmem:[%s6898_s8 + $0x78] sm:$0xff] }
 0x508   : > { %3626 = vmatmul.mubr.msk.f32.vlgmr.msra.gmra.mrb[12].mxu1 %vm1545_vm2, %v3622_v58  ;;  %v3716_v58 = vld [vmem:[%s6895_s5 + $0x540] sm:$0xff] }
 0x509   : > { %4379 = vmatpush1.bf16.msra.mxu1 %v4378_v47  ;;  %1628 = vmatprep.mubr.f32.mxu1 %v4742_v53  ;;  %v4452_v47 = vpack.c.bf16 %v3715_v44, %v3713_v42  ;;  %v2267_v42 = vld [vmem:[%s6898_s8 + $0x58] sm:$0xff] }
 0x50a   : > { %v4500_v44 = vpack.c.bf16 %v2267_v42, %v2266_v41  ;;  %v2228_v42 = vld [vmem:[%s6896_s6] sm:$0x3] }
 0x50c   : > { %3627 = vmatmul.mubr.msk.f32.gmra.mrb[14].mxu1 %vm1545_vm2, %v3623_v59  ;;  %v3718_v59 = vld [vmem:[%s6895_s5 + $0x550] sm:$0xff] }
 0x50d   : > { %1634 = vmatprep.mubr.f32.mxu1 %v4742_v53 }
 0x510   : > { %3628 = vmatmul.mubr.msk.f32.gmra.mrb[16].mxu1 %vm1545_vm2, %v3624_v60  ;;  %v3721_v60 = vld [vmem:[%s6895_s5 + $0x568] sm:$0xff] }
 0x511   : > { %1640 = vmatprep.mubr.f32.mxu1 %v4742_v53 }
 0x514   : > { %3629 = vmatmul.mubr.msk.f32.gmra.mrb[18].mxu1 %vm1545_vm2, %v3625_v61  ;;  %v3723_v61 = vld [vmem:[%s6895_s5 + $0x578] sm:$0xff] }
 0x515   : > { %1723 = vmatprep.mubr.f32.mxu1 %v4742_v53 }
 0x518   : > { %3630 = vmatmul.mubr.msk.f32.vlgmr.msra.gmra.mrb[12].mxu1 %vm1545_vm2, %v1410_v62  ;;  %v4458_v62 = vpack.c.bf16 %v3718_v59, %v3716_v58 }
 0x519   : > { %1729 = vmatprep.mubr.f32.mxu1 %v4742_v53 }
 0x51c   : > { %3631 = vmatmul.mubr.msk.f32.gmra.mrb[14].mxu1 %vm1545_vm2, %v1411_v63  ;;  %v4460_v63 = vpack.c.bf16 %v3723_v61, %v3721_v60 }
 0x51d   : > { %1735 = vmatprep.mubr.f32.mxu1 %v4742_v53 }
 0x520   : > { %3632 = vmatmul.mubr.msk.f32.gmra.mrb[16].mxu1 %vm1545_vm2, %v1412_v0  ;;  %v3720_v0 = vld [vmem:[%s6895_s5 + $0x560] sm:$0xff] }
 0x521   : > { %1741 = vmatprep.mubr.f32.mxu1 %v4742_v53 }
 0x524   : > { %3633 = vmatmul.mubr.msk.f32.gmra.mrb[18].mxu1 %vm1545_vm2, %v1413_v1  ;;  %v3722_v1 = vld [vmem:[%s6895_s5 + $0x570] sm:$0xff] }
 0x525   : > { %1955 = vmatprep.mubr.f32.mxu1 %v4742_v53  ;;  %v4462_v4 = vpack.c.bf16 %v3722_v1, %v3720_v0  ;;  %v3754_v1 = vld [vmem:[%s6898_s8 + $0xb0] sm:$0xff] }
 0x52c   : > { %v1863_v2 = vpop.f32.mrb[12].mxu0 }
 0x52d   : > { %v1865_v3 = vpop.f32.mrb[13].mxu0 }
 0x530   : > { %v1869_v6 = vpop.f32.mrb[14].mxu0 }
 0x531   : > { %v4430_v7 = vpack.c.bf16 %v1869_v6, %v1863_v2  ;;  %v1871_v8 = vpop.f32.mrb[15].mxu0  ;;  %v3725_v2 = vld [vmem:[%s6895_s5 + $0x588] sm:$0xff]  ;;  %v3724_v6 = vld [vmem:[%s6895_s5 + $0x580] sm:$0xff] }
 0x532   : > { %v4428_v9 = vpack.c.bf16 %v1871_v8, %v1865_v3  ;;  %v3727_v3 = vld [vmem:[%s6895_s5 + $0x598] sm:$0xff]  ;;  %v3729_v8 = vld [vmem:[%s6895_s5 + $0x5a8] sm:$0xff] }
 0x533   : > { %v4464_v5 = vpack.c.bf16 %v3727_v3, %v3725_v2  ;;  %v3755_v2 = vld [vmem:[%s6898_s8 + $0xb8] sm:$0xff]  ;;  %v3742_v3 = vld [vmem:[%s6894_s4 + $0x60] sm:$0xff] }
 0x534   : > { %4429 = vmatprep.subr.bf16.mxu1 %v4428_v9  ;;  %v3731_v9 = vld [vmem:[%s6895_s5 + $0x5b8] sm:$0xff] }
 0x535   : > { %4431 = vmatpush1.bf16.msra.mxu1 %v4430_v7  ;;  %v3726_v7 = vld [vmem:[%s6895_s5 + $0x590] sm:$0xff]  ;;  %v4468_v14 = vpack.c.bf16 %v3731_v9, %v3729_v8 }
 0x536   : > { %4433 = vmatprep.subr.bf16.mxu1 %v4432_v12  ;;  %v4466_v12 = vpack.c.bf16 %v3726_v7, %v3724_v6  ;;  %v3757_v6 = vld [vmem:[%s6898_s8 + $0xc8] sm:$0xff]  ;;  %v3758_v9 = vld [vmem:[%s6898_s8 + $0xd0] sm:$0xff] }
 0x537   : > { %v3743_v7 = vld [vmem:[%s6894_s4 + $0x68] sm:$0xff] }
 0x538   : > { %3688 = vmatmul.mubr.msk.f32.vlgmr.msra.gmra.mrb[12].mxu1 %vm1545_vm2, %v3684_v18  ;;  %v3735_v18 = vld [vmem:[%s6895_s5 + $0x5d8] sm:$0xff] }
 0x539   : > { %4435 = vmatpush1.bf16.msra.mxu1 %v4434_v19  ;;  %1961 = vmatprep.mubr.f32.mxu1 %v4742_v53  ;;  %v4470_v19 = vpack.c.bf16 %v3730_v16, %v3728_v15  ;;  %v3760_v16 = vld [vmem:[%s6898_s8 + $0xe0] sm:$0xff] }
 0x53a   : > { %4437 = vmatprep.subr.bf16.mxu1 %v4436_v20  ;;  %v4472_v20 = vpack.c.bf16 %v3735_v18, %v3733_v17  ;;  %v3761_v17 = vld [vmem:[%s6898_s8 + $0xe8] sm:$0xff]  ;;  %v3745_v18 = vld [vmem:[%s6894_s4 + $0x78] sm:$0xff] }
 0x53c   : > { %3689 = vmatmul.mubr.msk.f32.gmra.mrb[14].mxu1 %vm1545_vm2, %v3685_v24  ;;  %v4474_v24 = vpack.c.bf16 %v3734_v43, %v3732_v21  ;;  %v3763_v21 = vld [vmem:[%s6898_s8 + $0xf8] sm:$0xff]  ;;  %v3764_v43 = vld [vmem:[%s6898_s8 + $0x100] sm:$0xff] }
 0x53d   : > { %4439 = vmatpush1.bf16.msra.mxu1 %v4438_v52  ;;  %1967 = vmatprep.mubr.f32.mxu1 %v4742_v53  ;;  %v4476_v52 = vpack.c.bf16 %v3739_v23, %v3737_v22  ;;  %v3765_v22 = vld [vmem:[%s6898_s8 + $0x108] sm:$0xff] }
 0x53e   : > { %4441 = vmatprep.subr.bf16.mxu1 %v4440_v54  ;;  %v3736_v54 = vld [vmem:[%s6895_s5 + $0x5e0] sm:$0xff]  ;;  %v4533_v23 = vpack.c.bf16 %v3765_v22, %v3764_v43 }
 0x53f   : > { %v4478_v27 = vpack.c.bf16 %v3738_v25, %v3736_v54  ;;  %v3768_v25 = vld [vmem:[%s6898_s8 + $0x120] sm:$0xff] }
 0x540   : > { %3690 = vmatmul.mubr.msk.f32.gmra.mrb[16].mxu1 %vm1545_vm2, %v3686_v31  ;;  %v4743_v31 = vmov 0.0|0.0  }
 0x541   : > { %4443 = vmatpush1.bf16.msra.mxu1 %v4442_v32  ;;  %1973 = vmatprep.mubr.f32.mxu1 %v4742_v53  ;;  %v4485_v32 = vpack.c.bf16 %v2257_v30, %v2256_v28  ;;  %v3770_v30 = vld [vmem:[%s6898_s8 + $0x130] sm:$0xff] }
 0x542   : > { %4445 = vmatprep.subr.bf16.mxu1 %v4444_v33  ;;  %4484 = vmatprep.subr.bf16.mxu0 %v4743_v31  ;;  %v2260_v33 = vld [vmem:[%s6898_s8 + $0x20] sm:$0xff] }
 0x543   : > { %4486 = vmatpush1.bf16.msra.mxu0 %v4485_v32  ;;  %v4491_v56 = vpack.c.bf16 %v2261_v55, %v2260_v33  ;;  %v3771_v32 = vld [vmem:[%s6898_s8 + $0x138] sm:$0xff]  ;;  %v3772_v33 = vld [vmem:[%s6898_s8 + $0x140] sm:$0xff] }
 0x544   : > { %3691 = vmatmul.mubr.msk.f32.gmra.mrb[18].mxu1 %vm1545_vm2, %v3687_v38  ;;  %4487 = vmatprep.subr.bf16.mxu0 %v4743_v31  ;;  %v4494_v38 = vpack.c.bf16 %v2263_v36, %v2262_v34  ;;  %v2276_v36 = vld [vmem:[%s6898_s8 + $0xa0] sm:$0xff] }
 0x545   : > { %4447 = vmatpush1.bf16.msra.mxu1 %v4446_v46  ;;  %3740 = vmatprep.mubr.msk.f32.mxu1 %vm1326_vm1, %v5966_v26  ;;  %v4454_v26 = vpack.c.bf16 %v3714_v49, %v3712_v48  ;;  %v2264_v46 = vld [vmem:[%s6898_s8 + $0x40] sm:$0xff]  ;;  %v2270_v49 = vld [vmem:[%s6898_s8 + $0x70] sm:$0xff] }
 0x546   : > { %4449 = vmatprep.subr.bf16.mxu1 %v4448_v39  ;;  %v2265_v39 = vld [vmem:[%s6898_s8 + $0x48] sm:$0xff]  ;;  %v4506_v51 = vpack.c.bf16 %v2271_v50, %v2270_v49 }
 0x547   : > { %v4497_v40 = vpack.c.bf16 %v2265_v39, %v2264_v46  ;;  %v3774_v46 = vld [vmem:[%s6898_s8 + $0x150] sm:$0xff] }
 0x549   : > { %4451 = vmatpush1.bf16.msra.mxu1 %v4450_v45  ;;  %v2268_v45 = vld [vmem:[%s6898_s8 + $0x60] sm:$0xff] }
 0x54a   : > { %4453 = vmatprep.subr.bf16.mxu1 %v4452_v47  ;;  %v2269_v47 = vld [vmem:[%s6898_s8 + $0x68] sm:$0xff] }
 0x54b   : > { %v4503_v48 = vpack.c.bf16 %v2269_v47, %v2268_v45  ;;  %v2237_v45 = vrot.slane %v2228_v42, %v1266_v13 }
 0x54d   : > { %4455 = vmatpush1.bf16.msra.mxu1 %v4454_v26  ;;  %v2272_v26 = vld [vmem:[%s6898_s8 + $0x80] sm:$0xff] }
 0x54e   : > { %4457 = vmatprep.subr.bf16.mxu1 %v4456_v57  ;;  %v2273_v57 = vld [vmem:[%s6898_s8 + $0x88] sm:$0xff] }
 0x54f   : > { %v4509_v58 = vpack.c.bf16 %v2273_v57, %v2272_v26 }
 0x551   : > { %4459 = vmatpush1.bf16.msra.mxu1 %v4458_v62 }
 0x552   : > { %4461 = vmatprep.subr.bf16.mxu1 %v4460_v63 }
 0x555   : > { %4463 = vmatpush1.bf16.msra.mxu1 %v4462_v4  ;;  %v4518_v4 = vpack.c.bf16 %v3755_v2, %v3754_v1 }
 0x556   : > { %4465 = vmatprep.subr.bf16.mxu1 %v4464_v5  ;;  %v3756_v5 = vld [vmem:[%s6898_s8 + $0xc0] sm:$0xff] }
 0x557   : > { %v4521_v8 = vpack.c.bf16 %v3757_v6, %v3756_v5 }
 0x559   : > { %4467 = vmatpush1.bf16.msra.mxu1 %v4466_v12  ;;  %v3759_v12 = vld [vmem:[%s6898_s8 + $0xd8] sm:$0xff] }
 0x55a   : > { %4469 = vmatprep.subr.bf16.mxu1 %v4468_v14  ;;  %v3744_v14 = vld [vmem:[%s6894_s4 + $0x70] sm:$0xff]  ;;  %v4524_v15 = vpack.c.bf16 %v3759_v12, %v3758_v9 }
 0x55d   : > { %4471 = vmatpush1.bf16.msra.mxu1 %v4470_v19  ;;  %v4527_v19 = vpack.c.bf16 %v3761_v17, %v3760_v16 }
 0x55e   : > { %4473 = vmatprep.subr.bf16.mxu1 %v4472_v20  ;;  %v3762_v20 = vld [vmem:[%s6898_s8 + $0xf0] sm:$0xff] }
 0x561   : > { %4475 = vmatpush1.bf16.msra.mxu1 %v4474_v24  ;;  %v3766_v24 = vld [vmem:[%s6898_s8 + $0x110] sm:$0xff] }
 0x562   : > { %4477 = vmatprep.subr.bf16.mxu1 %v4476_v52  ;;  %v3767_v52 = vld [vmem:[%s6898_s8 + $0x118] sm:$0xff] }
 0x563   : > { %v4536_v54 = vpack.c.bf16 %v3767_v52, %v3766_v24 }
 0x565   : > { %4479 = vmatpush1.bf16.msra.mxu1 %v4478_v27  ;;  %v3769_v27 = vld [vmem:[%s6898_s8 + $0x128] sm:$0xff] }
 0x566   : > { %v4539_v28 = vpack.c.bf16 %v3769_v27, %v3768_v25 }
 0x568   : > { %2102 = vmatmul.mubr.f32.vlgmr.msra.gmra.mrb[20].mxu1 %v5969_v29  ;;  %v2258_v29 = vld [vmem:[%s6898_s8 + $0x10] sm:$0xff] }
 0x569   : > { %3741 = vmatprep.mubr.msk.f32.mxu1 %vm1326_vm1, %v5989_v35  ;;  %v2259_v35 = vld [vmem:[%s6898_s8 + $0x18] sm:$0xff] }
 0x56c   : > { %2108 = vmatmul.mubr.f32.gmra.mrb[22].mxu1 %v5991_v37  ;;  %v4488_v37 = vpack.c.bf16 %v2259_v35, %v2258_v29  ;;  %v4542_v29 = vpack.c.bf16 %v3771_v32, %v3770_v30  ;;  %v2274_v35 = vld [vmem:[%s6898_s8 + $0x90] sm:$0xff]  ;;  %v3804_v30 = vld [vmem:[%s6898_s8 + $0x160] sm:$0xff]  ;;  %v3805_v32 = vld [vmem:[%s6898_s8 + $0x168] sm:$0xff] }
 0x56d   : > { %2195 = vmatprep.mubr.f32.mxu1 %v4742_v53 }
 0x56e   : > { %4489 = vmatpush1.bf16.msra.mxu0 %v4488_v37  ;;  %v2275_v37 = vld [vmem:[%s6898_s8 + $0x98] sm:$0xff] }
 0x56f   : > { %4490 = vmatprep.subr.bf16.mxu0 %v4743_v31  ;;  %v4512_v55 = vpack.c.bf16 %v2275_v37, %v2274_v35  ;;  %v4567_v35 = vpack.c.bf16 %v3805_v32, %v3804_v30  ;;  %v3782_v37 = vld [vmem:[%s6897_s7 + $0x50] sm:$0xff] }
 0x572   : > { %4492 = vmatpush1.bf16.msra.mxu0 %v4491_v56  ;;  %v3773_v56 = vld [vmem:[%s6898_s8 + $0x148] sm:$0xff] }
 0x573   : > { %4493 = vmatprep.subr.bf16.mxu0 %v4743_v31  ;;  %v4545_v34 = vpack.c.bf16 %v3773_v56, %v3772_v33  ;;  %v3806_v33 = vld [vmem:[%s6898_s8 + $0x170] sm:$0xff]  ;;  %v3783_v56 = vld [vmem:[%s6897_s7 + $0x58] sm:$0xff] }
 0x576   : > { %4495 = vmatpush1.bf16.msra.mxu0 %v4494_v38  ;;  %v2277_v38 = vld [vmem:[%s6898_s8 + $0xa8] sm:$0xff] }
 0x577   : > { %4496 = vmatprep.subr.bf16.mxu0 %v4743_v31  ;;  %v4515_v39 = vpack.c.bf16 %v2277_v38, %v2276_v36  ;;  %v3784_v36 = vld [vmem:[%s6897_s7 + $0x60] sm:$0xff] }
 0x578   : > { %v3808_v38 = vld [vmem:[%s6898_s8 + $0x180] sm:$0xff] }
 0x57a   : > { %4498 = vmatpush1.bf16.msra.mxu0 %v4497_v40  ;;  %v3775_v40 = vld [vmem:[%s6898_s8 + $0x158] sm:$0xff] }
 0x57b   : > { %4499 = vmatprep.subr.bf16.mxu0 %v4743_v31  ;;  %v4548_v41 = vpack.c.bf16 %v3775_v40, %v3774_v46  ;;  %v3809_v46 = vld [vmem:[%s6898_s8 + $0x188] sm:$0xff] }
 0x57c   : > { %v4573_v40 = vpack.c.bf16 %v3809_v46, %v3808_v38 }
 0x57e   : > { %4501 = vmatpush1.bf16.msra.mxu0 %v4500_v44  ;;  %v2233_v44 = vrot.slane %v2228_v42, %v1262_v11  ;;  %v3810_v42 = vld [vmem:[%s6898_s8 + $0x190] sm:$0xff] }
 0x57f   : > { %4502 = vmatprep.subr.bf16.mxu0 %v4743_v31 }
 0x582   : > { %4504 = vmatpush1.bf16.msra.mxu0 %v4503_v48 }
 0x583   : > { %4505 = vmatprep.subr.bf16.mxu0 %v4743_v31 }
 0x586   : > { %4507 = vmatpush1.bf16.msra.mxu0 %v4506_v51 }
 0x587   : > { %4508 = vmatprep.subr.bf16.mxu0 %v4743_v31 }
 0x58a   : > { %4510 = vmatpush1.bf16.msra.mxu0 %v4509_v58 }
 0x58b   : > { %4511 = vmatprep.subr.bf16.mxu0 %v4743_v31 }
 0x58e   : > { %4513 = vmatpush1.bf16.msra.mxu0 %v4512_v55  ;;  %v3807_v55 = vld [vmem:[%s6898_s8 + $0x178] sm:$0xff] }
 0x58f   : > { %4514 = vmatprep.subr.bf16.mxu0 %v4743_v31 }
 0x592   : > { %4516 = vmatpush1.bf16.msra.mxu0 %v4515_v39  ;;  %v3785_v39 = vld [vmem:[%s6897_s7 + $0x68] sm:$0xff] }
 0x63b   : > { %v2103_v59 = vpop.f32.mrb[20].mxu1 }
 0x63c   : > { %v2105_v60 = vpop.f32.mrb[21].mxu1 }
 0x63f   : > { %v2109_v61 = vpop.f32.mrb[22].mxu1 }
 0x640   : > { %v4482_v62 = vpack.c.bf16 %v2109_v61, %v2103_v59  ;;  %v2111_v63 = vpop.f32.mrb[23].mxu1 }
 0x641   : > { %v4480_v0 = vpack.c.bf16 %v2111_v63, %v2105_v60 }
 0x643   : > { %4481 = vmatprep.subr.bf16.mxu1 %v4480_v0 }
 0x644   : > { %4483 = vmatpush1.bf16.msra.mxu1 %v4482_v62 }
 0x645   : > { %4517 = vmatprep.subr.bf16.mxu1 %v4743_v31 }
 0x647   : > { %3746 = vmatmul.mubr.msk.f32.vlgmr.msra.gmra.mrb[12].mxu1 %vm1545_vm2, %v3742_v3 }
 0x648   : > { %2201 = vmatprep.mubr.f32.mxu1 %v4742_v53  ;;  %4519 = vmatpush1.bf16.msra.mxu1 %v4518_v4 }
 0x649   : > { %4520 = vmatprep.subr.bf16.mxu1 %v4743_v31 }
 0x64b   : > { %3747 = vmatmul.mubr.msk.f32.gmra.mrb[14].mxu1 %vm1545_vm2, %v3743_v7 }
 0x64c   : > { %2207 = vmatprep.mubr.f32.mxu1 %v4742_v53  ;;  %4522 = vmatpush1.bf16.msra.mxu1 %v4521_v8  ;;  %v3780_v8 = vld [vmem:[%s6897_s7 + $0x40] sm:$0xff] }
 0x64d   : > { %4523 = vmatprep.subr.bf16.mxu1 %v4743_v31 }
 0x64f   : > { %3748 = vmatmul.mubr.msk.f32.gmra.mrb[16].mxu1 %vm1545_vm2, %v3744_v14 }
 0x650   : > { %2213 = vmatprep.mubr.f32.mxu1 %v4742_v53  ;;  %4525 = vmatpush1.bf16.msra.mxu1 %v4524_v15  ;;  %v4530_v53 = vpack.c.bf16 %v3763_v21, %v3762_v20 }
 0x651   : > { %4526 = vmatprep.subr.bf16.mxu1 %v4743_v31 }
 0x653   : > { %3749 = vmatmul.mubr.msk.f32.gmra.mrb[18].mxu1 %vm1545_vm2, %v3745_v18 }
 0x654   : > { %4528 = vmatpush1.bf16.msra.mxu1 %v4527_v19 }
 0x655   : > { %4529 = vmatprep.subr.bf16.mxu1 %v4743_v31 }
 0x658   : > { %4531 = vmatpush1.bf16.msra.mxu1 %v4530_v53 }
 0x659   : > { %4532 = vmatprep.subr.bf16.mxu1 %v4743_v31 }
 0x65c   : > { %4534 = vmatpush1.bf16.msra.mxu1 %v4533_v23 }
 0x65d   : > { %4535 = vmatprep.subr.bf16.mxu1 %v4743_v31 }
 0x660   : > { %4537 = vmatpush1.bf16.msra.mxu1 %v4536_v54 }
 0x661   : > { %4538 = vmatprep.subr.bf16.mxu1 %v4743_v31 }
 0x664   : > { %4540 = vmatpush1.bf16.msra.mxu1 %v4539_v28 }
 0x665   : > { %4541 = vmatprep.subr.bf16.mxu1 %v4743_v31 }
 0x668   : > { %4543 = vmatpush1.bf16.msra.mxu1 %v4542_v29  ;;  %v3781_v29 = vld [vmem:[%s6897_s7 + $0x48] sm:$0xff] }
 0x669   : > { %4544 = vmatprep.subr.bf16.mxu1 %v4743_v31 }
 0x66c   : > { %4546 = vmatpush1.bf16.msra.mxu1 %v4545_v34  ;;  %v4570_v34 = vpack.c.bf16 %v3807_v55, %v3806_v33 }
 0x66d   : > { %4547 = vmatprep.subr.bf16.mxu1 %v4743_v31 }
 0x670   : > { %4549 = vmatpush1.bf16.msra.mxu1 %v4548_v41  ;;  %v3786_v41 = vld [vmem:[%s6897_s7 + $0x70] sm:$0xff] }
 0x71a   : > { %v2197_v47 = vpop.f32.mrb[12].mxu1 }
 0x71b   : > { %v2240_v48 = vadd.f32 %v2233_v44, %v2197_v47  ;;  %v2199_v49 = vpop.f32.mrb[13].mxu1 }
 0x71c   : > { %v2241_v50 = vadd.f32 %v2237_v45, %v2199_v49  ;;  %v3813_v49 = vld [vmem:[%s6898_s8 + $0x1a8] sm:$0xff] }
 0x71d   : > { %v6512_v57 = vmax.f32 %v2240_v48, 0.0  ;;  %v3812_v48 = vld [vmem:[%s6898_s8 + $0x1a0] sm:$0xff] }
 0x71e   : > { %v6510_v51 = vmax.f32 %v2241_v50, 0.0  ;;  %v2203_v26 = vpop.f32.mrb[14].mxu1  ;;  %v4579_v50 = vpack.c.bf16 %v3813_v49, %v3812_v48  ;;  %v3833_v48 = vld [vmem:[%s6897_s7 + $0x98] sm:$0xff] }
 0x71f   : > { %v2242_v58 = vadd.f32 %v2233_v44, %v2203_v26  ;;  %v2205_v59 = vpop.f32.mrb[15].mxu1  ;;  %v3814_v26 = vld [vmem:[%s6898_s8 + $0x1b0] sm:$0xff] }
 0x720   : > { %v2243_v60 = vadd.f32 %v2237_v45, %v2205_v59  ;;  %3750 = vmatprep.mubr.msk.f32.mxu0 %vm2278_vm3, %v6510_v51  ;;  %3776 = vmatprep.mubr.msk.f32.mxu1 %vm2278_vm3, %v6510_v51 }
 0x721   : > { %2356 = vmatmul.mubr.f32.vlgmr.msra.gmra.mrb[16].mxu0 %v6512_v57  ;;  %2472 = vmatmul.mubr.f32.vlgmr.msra.gmra.mrb[24].mxu1 %v6512_v57  ;;  %v6522_v13 = vmax.f32 %v2242_v58, 0.0  ;;  %v3815_v58 = vld [vmem:[%s6898_s8 + $0x1b8] sm:$0xff] }
 0x722   : > { %v6520_v10 = vmax.f32 %v2243_v60, 0.0  ;;  %v2209_v11 = vpop.f32.mrb[16].mxu1  ;;  %v4582_v59 = vpack.c.bf16 %v3815_v58, %v3814_v26  ;;  %v3816_v60 = vld [vmem:[%s6898_s8 + $0x1c0] sm:$0xff]  ;;  %v3850_v26 = vld [vmem:[%s6898_s8 + $0x230] sm:$0xff]  ;;  %v3851_v58 = vld [vmem:[%s6898_s8 + $0x238] sm:$0xff] }
 0x723   : > { %v2244_v61 = vadd.f32 %v2233_v44, %v2209_v11  ;;  %v2211_v62 = vpop.f32.mrb[17].mxu1  ;;  %v3817_v11 = vld [vmem:[%s6898_s8 + $0x1c8] sm:$0xff] }
 0x724   : > { %v2245_v63 = vadd.f32 %v2237_v45, %v2211_v62  ;;  %3751 = vmatprep.mubr.msk.f32.mxu0 %vm2278_vm3, %v6520_v10  ;;  %3777 = vmatprep.mubr.msk.f32.mxu1 %vm2278_vm3, %v6520_v10  ;;  %v3818_v62 = vld [vmem:[%s6898_s8 + $0x1d0] sm:$0xff] }
 0x725   : > { %2361 = vmatmul.mubr.f32.gmra.mrb[18].mxu0 %v6522_v13  ;;  %2477 = vmatmul.mubr.f32.gmra.mrb[26].mxu1 %v6522_v13  ;;  %v6532_v2 = vmax.f32 %v2244_v61, 0.0  ;;  %v4585_v61 = vpack.c.bf16 %v3817_v11, %v3816_v60  ;;  %v4614_v60 = vpack.c.bf16 %v3851_v58, %v3850_v26  ;;  %v3836_v11 = vld [vmem:[%s6897_s7 + $0xb0] sm:$0xff] }
 0x726   : > { %v6530_v0 = vmax.f32 %v2245_v63, 0.0  ;;  %v2215_v1 = vpop.f32.mrb[18].mxu1  ;;  %v3819_v63 = vld [vmem:[%s6898_s8 + $0x1d8] sm:$0xff] }
 0x727   : > { %v2246_v3 = vadd.f32 %v2233_v44, %v2215_v1  ;;  %v2217_v4 = vpop.f32.mrb[19].mxu1  ;;  %v3811_v44 = vld [vmem:[%s6898_s8 + $0x198] sm:$0xff]  ;;  %v4588_v1 = vpack.c.bf16 %v3819_v63, %v3818_v62  ;;  %v3853_v62 = vld [vmem:[%s6898_s8 + $0x248] sm:$0xff] }
 0x728   : > { %v2247_v5 = vadd.f32 %v2237_v45, %v2217_v4  ;;  %3752 = vmatprep.mubr.msk.f32.mxu0 %vm2278_vm3, %v6530_v0  ;;  %3778 = vmatprep.mubr.msk.f32.mxu1 %vm2278_vm3, %v6530_v0  ;;  %v3787_v45 = vld [vmem:[%s6897_s7 + $0x78] sm:$0xff]  ;;  %v4576_v47 = vpack.c.bf16 %v3811_v44, %v3810_v42  ;;  %v3821_v4 = vld [vmem:[%s6898_s8 + $0x1e8] sm:$0xff]  ;;  %v3832_v44 = vld [vmem:[%s6897_s7 + $0x90] sm:$0xff] }
 0x729   : > { %2366 = vmatmul.mubr.f32.gmra.mrb[20].mxu0 %v6532_v2  ;;  %2482 = vmatmul.mubr.f32.gmra.mrb[28].mxu1 %v6532_v2  ;;  %v6542_v7 = vmax.f32 %v2246_v3, 0.0  ;;  %v3820_v3 = vld [vmem:[%s6898_s8 + $0x1e0] sm:$0xff]  ;;  %v3837_v63 = vld [vmem:[%s6897_s7 + $0xb8] sm:$0xff] }
 0x72a   : > { %v6540_v6 = vmax.f32 %v2247_v5, 0.0  ;;  %v4591_v5 = vpack.c.bf16 %v3821_v4, %v3820_v3  ;;  %v3854_v3 = vld [vmem:[%s6898_s8 + $0x250] sm:$0xff]  ;;  %v3855_v4 = vld [vmem:[%s6898_s8 + $0x258] sm:$0xff] }
 0x72c   : > { %3753 = vmatprep.mubr.msk.f32.mxu0 %vm2278_vm3, %v6540_v6  ;;  %3779 = vmatprep.mubr.msk.f32.mxu1 %vm2278_vm3, %v6540_v6 }
 0x72d   : > { %2371 = vmatmul.mubr.f32.gmra.mrb[22].mxu0 %v6542_v7  ;;  %2487 = vmatmul.mubr.f32.gmra.mrb[30].mxu1 %v6542_v7 }
 0x72e   : > { %3948 = vmatprep.mubr.msk.f32.mxu1 %vm2501_vm4, %v3780_v8  ;;  %v3822_v8 = vld [vmem:[%s6898_s8 + $0x1f0] sm:$0xff] }
 0x7f4   : > { %v2357_v9 = vpop.f32.mrb[16].mxu0  ;;  %v2473_v12 = vpop.f32.mrb[24].mxu1 }
 0x7f5   : > { %v2359_v14 = vpop.f32.mrb[17].mxu0  ;;  %v2475_v15 = vpop.f32.mrb[25].mxu1 }
 0x7f6   : > { %v3824_v14 = vld [vmem:[%s6898_s8 + $0x200] sm:$0xff]  ;;  %v3825_v15 = vld [vmem:[%s6898_s8 + $0x208] sm:$0xff] }
 0x7f8   : > { %v2362_v16 = vpop.f32.mrb[18].mxu0  ;;  %v2478_v17 = vpop.f32.mrb[26].mxu1 }
 0x7f9   : > { %v4558_v18 = vpack.c.bf16 %v2362_v16, %v2357_v9  ;;  %v4550_v19 = vpack.c.bf16 %v2478_v17, %v2473_v12  ;;  %v2364_v20 = vpop.f32.mrb[19].mxu0  ;;  %v2480_v21 = vpop.f32.mrb[27].mxu1  ;;  %v3823_v9 = vld [vmem:[%s6898_s8 + $0x1f8] sm:$0xff]  ;;  %v4597_v16 = vpack.c.bf16 %v3825_v15, %v3824_v14  ;;  %v2376_v17 = vld [vmem:[%s6897_s7] sm:$0xff]  ;;  %v3858_v14 = vld [vmem:[%s6898_s8 + $0x270] sm:$0xff] }
 0x7fa   : > { %v4594_v12 = vpack.c.bf16 %v3823_v9, %v3822_v8  ;;  %3968 = vmatprep.mubr.msk.f32.mxu0 %vm2501_vm4, %v2376_v17  ;;  %v2379_v20 = vld [vmem:[%s6897_s7 + $0x18] sm:$0xff]  ;;  %v2380_v21 = vld [vmem:[%s6897_s7 + $0x20] sm:$0xff]  ;;  %v3857_v9 = vld [vmem:[%s6898_s8 + $0x268] sm:$0xff] }
 0x7fb   : > { %4551 = vmatprep.subr.bf16.mxu1 %v4550_v19  ;;  %4559 = vmatprep.subr.bf16.mxu0 %v4558_v18  ;;  %v3856_v8 = vld [vmem:[%s6898_s8 + $0x260] sm:$0xff]  ;;  %v3861_v17 = vld [vmem:[%s6898_s8 + $0x288] sm:$0xff] }
 0x7fc   : > { %v2367_v53 = vpop.f32.mrb[20].mxu0  ;;  %v2483_v43 = vpop.f32.mrb[28].mxu1  ;;  %4553 = vmatpush3.bf16.msra.mxu1 %v4550_v19  ;;  %4561 = vmatpush3.bf16.msra.mxu0 %v4558_v18  ;;  %v2377_v18 = vld [vmem:[%s6897_s7 + $0x8] sm:$0xff]  ;;  %v2378_v19 = vld [vmem:[%s6897_s7 + $0x10] sm:$0xff] }
 0x7fd   : > { %v2369_v22 = vpop.f32.mrb[21].mxu0  ;;  %v2485_v23 = vpop.f32.mrb[29].mxu1 }
 0x7fe   : > { %v2383_v22 = vld [vmem:[%s6897_s7 + $0x38] sm:$0xff]  ;;  %v3830_v23 = vld [vmem:[%s6897_s7 + $0x80] sm:$0xff] }
 0x800   : > { %v2372_v24 = vpop.f32.mrb[22].mxu0  ;;  %v2488_v52 = vpop.f32.mrb[30].mxu1 }
 0x801   : > { %v4562_v54 = vpack.c.bf16 %v2372_v24, %v2367_v53  ;;  %v4554_v25 = vpack.c.bf16 %v2488_v52, %v2483_v43  ;;  %v2374_v27 = vpop.f32.mrb[23].mxu0  ;;  %v2490_v28 = vpop.f32.mrb[31].mxu1  ;;  %v2381_v53 = vld [vmem:[%s6897_s7 + $0x28] sm:$0xff]  ;;  %v2382_v43 = vld [vmem:[%s6897_s7 + $0x30] sm:$0xff] }
 0x803   : > { %4555 = vmatprep.subr.bf16.mxu1 %v4554_v25  ;;  %4563 = vmatprep.subr.bf16.mxu0 %v4562_v54 }
 0x804   : > { %4557 = vmatpush3.bf16.msra.mxu1 %v4554_v25  ;;  %4565 = vmatpush3.bf16.msra.mxu0 %v4562_v54 }
 0x805   : > { %4566 = vmatprep.subr.bf16.mxu1 %v4743_v31 }
 0x807   : > { %3949 = vmatmul.mubr.msk.f32.vlgmr.msra.gmra.mrb[32].mxu1 %vm2501_vm4, %v3781_v29  ;;  %3969 = vmatmul.mubr.msk.f32.vlgmr.msra.gmra.mrb[24].mxu0 %vm2501_vm4, %v2377_v18 }
 0x808   : > { %4568 = vmatpush1.bf16.msra.mxu1 %v4567_v35  ;;  %3951 = vmatprep.mubr.msk.f32.mxu1 %vm2501_vm4, %v3782_v37 }
 0x809   : > { %4569 = vmatprep.subr.bf16.mxu1 %v4743_v31  ;;  %3971 = vmatprep.mubr.msk.f32.mxu0 %vm2501_vm4, %v2378_v19  ;;  %v3862_v19 = vld [vmem:[%s6898_s8 + $0x290] sm:$0xff] }
 0x80b   : > { %3952 = vmatmul.mubr.msk.f32.gmra.mrb[34].mxu1 %vm2501_vm4, %v3783_v56  ;;  %3972 = vmatmul.mubr.msk.f32.gmra.mrb[26].mxu0 %vm2501_vm4, %v2379_v20  ;;  %v3863_v20 = vld [vmem:[%s6898_s8 + $0x298] sm:$0xff] }
 0x80c   : > { %4571 = vmatpush1.bf16.msra.mxu1 %v4570_v34  ;;  %3954 = vmatprep.mubr.msk.f32.mxu1 %vm2501_vm4, %v3784_v36 }
 0x80d   : > { %4572 = vmatprep.subr.bf16.mxu1 %v4743_v31  ;;  %3974 = vmatprep.mubr.msk.f32.mxu0 %vm2501_vm4, %v2380_v21  ;;  %v4632_v21 = vpack.c.bf16 %v3863_v20, %v3862_v19 }
 0x80f   : > { %3955 = vmatmul.mubr.msk.f32.gmra.mrb[36].mxu1 %vm2501_vm4, %v3785_v39  ;;  %3975 = vmatmul.mubr.msk.f32.gmra.mrb[28].mxu0 %vm2501_vm4, %v2381_v53  ;;  %v3846_v39 = vld [vmem:[%s6898_s8 + $0x210] sm:$0xff]  ;;  %v3864_v53 = vld [vmem:[%s6898_s8 + $0x2a0] sm:$0xff] }
 0x810   : > { %4574 = vmatpush1.bf16.msra.mxu1 %v4573_v40  ;;  %3957 = vmatprep.mubr.msk.f32.mxu1 %vm2501_vm4, %v3786_v41  ;;  %v3847_v40 = vld [vmem:[%s6898_s8 + $0x218] sm:$0xff]  ;;  %v3831_v41 = vld [vmem:[%s6897_s7 + $0x88] sm:$0xff] }
 0x811   : > { %4575 = vmatprep.subr.bf16.mxu1 %v4743_v31  ;;  %3977 = vmatprep.mubr.msk.f32.mxu0 %vm2501_vm4, %v2382_v43  ;;  %v4608_v42 = vpack.c.bf16 %v3847_v40, %v3846_v39  ;;  %v3865_v43 = vld [vmem:[%s6898_s8 + $0x2a8] sm:$0xff]  ;;  %v3878_v39 = vld [vmem:[%s6897_s7 + $0xf0] sm:$0xff]  ;;  %v3879_v40 = vld [vmem:[%s6897_s7 + $0xf8] sm:$0xff] }
 0x813   : > { %3958 = vmatmul.mubr.msk.f32.gmra.mrb[38].mxu1 %vm2501_vm4, %v3787_v45  ;;  %3978 = vmatmul.mubr.msk.f32.gmra.mrb[30].mxu0 %vm2501_vm4, %v2383_v22  ;;  %v3848_v45 = vld [vmem:[%s6898_s8 + $0x220] sm:$0xff]  ;;  %v4635_v22 = vpack.c.bf16 %v3865_v43, %v3864_v53 }
 0x814   : > { %4577 = vmatpush1.bf16.msra.mxu1 %v4576_v47  ;;  %3826 = vmatprep.mubr.msk.f32.mxu1 %vm2278_vm3, %v6510_v51  ;;  %v3849_v47 = vld [vmem:[%s6898_s8 + $0x228] sm:$0xff] }
 0x815   : > { %4578 = vmatprep.subr.bf16.mxu1 %v4743_v31  ;;  %3988 = vmatprep.mubr.msk.f32.mxu0 %vm2501_vm4, %v3830_v23  ;;  %v4611_v49 = vpack.c.bf16 %v3849_v47, %v3848_v45  ;;  %v3866_v23 = vld [vmem:[%s6898_s8 + $0x2b0] sm:$0xff] }
 0x818   : > { %4580 = vmatpush1.bf16.msra.mxu1 %v4579_v50  ;;  %v3834_v50 = vld [vmem:[%s6897_s7 + $0xa0] sm:$0xff] }
 0x819   : > { %4581 = vmatprep.subr.bf16.mxu1 %v4743_v31 }
 0x81c   : > { %4583 = vmatpush1.bf16.msra.mxu1 %v4582_v59  ;;  %v3835_v59 = vld [vmem:[%s6897_s7 + $0xa8] sm:$0xff] }
 0x81d   : > { %4584 = vmatprep.subr.bf16.mxu1 %v4743_v31 }
 0x820   : > { %4586 = vmatpush1.bf16.msra.mxu1 %v4585_v61  ;;  %v3852_v61 = vld [vmem:[%s6898_s8 + $0x240] sm:$0xff] }
 0x821   : > { %4587 = vmatprep.subr.bf16.mxu1 %v4743_v31 }
 0x824   : > { %4589 = vmatpush1.bf16.msra.mxu1 %v4588_v1  ;;  %v4617_v1 = vpack.c.bf16 %v3853_v62, %v3852_v61 }
 0x825   : > { %4590 = vmatprep.subr.bf16.mxu1 %v4743_v31 }
 0x828   : > { %4592 = vmatpush1.bf16.msra.mxu1 %v4591_v5  ;;  %v4620_v5 = vpack.c.bf16 %v3855_v4, %v3854_v3 }
 0x829   : > { %4593 = vmatprep.subr.bf16.mxu1 %v4743_v31 }
 0x82c   : > { %4595 = vmatpush1.bf16.msra.mxu1 %v4594_v12  ;;  %v4623_v12 = vpack.c.bf16 %v3857_v9, %v3856_v8 }
 0x82d   : > { %4596 = vmatprep.subr.bf16.mxu1 %v4743_v31 }
 0x830   : > { %4598 = vmatpush1.bf16.msra.mxu1 %v4597_v16  ;;  %v3860_v16 = vld [vmem:[%s6898_s8 + $0x280] sm:$0xff] }
 0x831   : > { %v4629_v18 = vpack.c.bf16 %v3861_v17, %v3860_v16 }
 0x833   : > { %2848 = vmatmul.mubr.f32.vlgmr.msra.gmra.mrb[40].mxu1 %v6512_v57 }
 0x834   : > { %3827 = vmatprep.mubr.msk.f32.mxu1 %vm2278_vm3, %v6520_v10 }
 0x837   : > { %2853 = vmatmul.mubr.f32.gmra.mrb[42].mxu1 %v6522_v13 }
 0x838   : > { %3828 = vmatprep.mubr.msk.f32.mxu1 %vm2278_vm3, %v6530_v0 }
 0x83b   : > { %2858 = vmatmul.mubr.f32.gmra.mrb[44].mxu1 %v6532_v2 }
 0x83c   : > { %3829 = vmatprep.mubr.msk.f32.mxu1 %vm2278_vm3, %v6540_v6 }
 0x83f   : > { %2863 = vmatmul.mubr.f32.gmra.mrb[46].mxu1 %v6542_v7 }
 0x8da   : > { %v6707_v24 = vpop.f32.mrb[32].mxu1 }
 0x8db   : > { %v6709_v52 = vpop.f32.mrb[33].mxu1 }
 0x8de   : > { %v6711_v54 = vpop.f32.mrb[34].mxu1 }
 0x8df   : > { %v6713_v25 = vpop.f32.mrb[35].mxu1 }
 0x8e2   : > { %v6715_v27 = vpop.f32.mrb[36].mxu1 }
 0x8e3   : > { %v6717_v28 = vpop.f32.mrb[37].mxu1 }
 0x8e6   : > { %v6719_v30 = vpop.f32.mrb[38].mxu1 }
 0x8e7   : > { %v6721_v32 = vpop.f32.mrb[39].mxu1 }
 0x906   : > { %v2849_v29 = vpop.f32.mrb[40].mxu1 }
 0x907   : > { %v2851_v35 = vpop.f32.mrb[41].mxu1 }
 0x90a   : > { %v2854_v37 = vpop.f32.mrb[42].mxu1 }
 0x90b   : > { %v4599_v33 = vpack.c.bf16 %v2854_v37, %v2849_v29  ;;  %v2856_v55 = vpop.f32.mrb[43].mxu1  ;;  %v3867_v29 = vld [vmem:[%s6898_s8 + $0x2b8] sm:$0xff] }
 0x90c   : > { %v4638_v35 = vpack.c.bf16 %v3867_v29, %v3866_v23 }
 0x90d   : > { %4600 = vmatprep.subr.bf16.mxu0 %v4599_v33 }
 0x90e   : > { %v2859_v56 = vpop.f32.mrb[44].mxu1  ;;  %4602 = vmatpush3.bf16.msra.mxu0 %v4599_v33 }
 0x90f   : > { %v2861_v34 = vpop.f32.mrb[45].mxu1 }
 0x910   : > { %v3874_v34 = vld [vmem:[%s6897_s7 + $0xd0] sm:$0xff] }
 0x912   : > { %v2864_v36 = vpop.f32.mrb[46].mxu1 }
 0x913   : > { %v4603_v38 = vpack.c.bf16 %v2864_v36, %v2859_v56  ;;  %v2866_v46 = vpop.f32.mrb[47].mxu1  ;;  %v3875_v36 = vld [vmem:[%s6897_s7 + $0xd8] sm:$0xff] }
 0x914   : > { %v3877_v46 = vld [vmem:[%s6897_s7 + $0xe8] sm:$0xff] }
 0x915   : > { %4604 = vmatprep.subr.bf16.mxu0 %v4603_v38 }
 0x916   : > { %4606 = vmatpush3.bf16.msra.mxu0 %v4603_v38  ;;  %v3876_v38 = vld [vmem:[%s6897_s7 + $0xe0] sm:$0xff] }
 0x917   : > { %4607 = vmatprep.subr.bf16.mxu0 %v4743_v31 }
 0x919   : > { %3989 = vmatmul.mubr.msk.f32.vlgmr.msra.gmra.mrb[24].mxu0 %vm2501_vm4, %v3831_v41 }
 0x91a   : > { %4609 = vmatpush1.bf16.msra.mxu0 %v4608_v42  ;;  %3991 = vmatprep.mubr.msk.f32.mxu0 %vm2501_vm4, %v3832_v44  ;;  %v3888_v42 = vld [vmem:[%s6899_s9] ss:$0 sm:$0xff] }
 0x91b   : > { %4610 = vmatprep.subr.bf16.mxu0 %v4743_v31 }
 0x91d   : > { %3992 = vmatmul.mubr.msk.f32.gmra.mrb[26].mxu0 %vm2501_vm4, %v3833_v48 }
 0x91e   : > { %4612 = vmatpush1.bf16.msra.mxu0 %v4611_v49  ;;  %3994 = vmatprep.mubr.msk.f32.mxu0 %vm2501_vm4, %v3834_v50 }
 0x91f   : > { %4613 = vmatprep.subr.bf16.mxu0 %v4743_v31 }
 0x921   : > { %3995 = vmatmul.mubr.msk.f32.gmra.mrb[28].mxu0 %vm2501_vm4, %v3835_v59 }
 0x922   : > { %4615 = vmatpush1.bf16.msra.mxu0 %v4614_v60  ;;  %3997 = vmatprep.mubr.msk.f32.mxu0 %vm2501_vm4, %v3836_v11 }
 0x923   : > { %4616 = vmatprep.subr.bf16.mxu0 %v4743_v31 }
 0x925   : > { %3998 = vmatmul.mubr.msk.f32.gmra.mrb[30].mxu0 %vm2501_vm4, %v3837_v63 }
 0x926   : > { %4618 = vmatpush1.bf16.msra.mxu0 %v4617_v1  ;;  %3868 = vmatprep.mubr.msk.f32.mxu0 %vm2278_vm3, %v6510_v51  ;;  %v3859_v51 = vld [vmem:[%s6898_s8 + $0x278] sm:$0xff] }
 0x927   : > { %4619 = vmatprep.subr.bf16.mxu0 %v4743_v31  ;;  %v4626_v15 = vpack.c.bf16 %v3859_v51, %v3858_v14 }
 0x92a   : > { %4621 = vmatpush1.bf16.msra.mxu0 %v4620_v5 }
 0x92b   : > { %4622 = vmatprep.subr.bf16.mxu0 %v4743_v31 }
 0x92e   : > { %4624 = vmatpush1.bf16.msra.mxu0 %v4623_v12 }
 0x92f   : > { %4625 = vmatprep.subr.bf16.mxu0 %v4743_v31 }
 0x932   : > { %4627 = vmatpush1.bf16.msra.mxu0 %v4626_v15 }
 0x933   : > { %4628 = vmatprep.subr.bf16.mxu0 %v4743_v31 }
 0x936   : > { %4630 = vmatpush1.bf16.msra.mxu0 %v4629_v18 }
 0x937   : > { %4631 = vmatprep.subr.bf16.mxu0 %v4743_v31 }
 0x93a   : > { %4633 = vmatpush1.bf16.msra.mxu0 %v4632_v21 }
 0x93b   : > { %4634 = vmatprep.subr.bf16.mxu0 %v4743_v31 }
 0x93e   : > { %4636 = vmatpush1.bf16.msra.mxu0 %v4635_v22 }
 0x93f   : > { %4637 = vmatprep.subr.bf16.mxu0 %v4743_v31  ;;  %v3872_v31 = vld [vmem:[%s6897_s7 + $0xc0] sm:$0xff] }
 0x942   : > { %4639 = vmatpush1.bf16.msra.mxu0 %v4638_v35 }
 0x945   : > { %3102 = vmatmul.mubr.f32.vlgmr.msra.gmra.mrb[32].mxu0 %v6512_v57 }
 0x946   : > { %3869 = vmatprep.mubr.msk.f32.mxu0 %vm2278_vm3, %v6520_v10 }
 0x949   : > { %3107 = vmatmul.mubr.f32.gmra.mrb[34].mxu0 %v6522_v13 }
 0x94a   : > { %3870 = vmatprep.mubr.msk.f32.mxu0 %vm2278_vm3, %v6530_v0 }
 0x94d   : > { %3112 = vmatmul.mubr.f32.gmra.mrb[36].mxu0 %v6532_v2 }
 0x94e   : > { %3871 = vmatprep.mubr.msk.f32.mxu0 %vm2278_vm3, %v6540_v6 }
 0x951   : > { %3117 = vmatmul.mubr.f32.gmra.mrb[38].mxu0 %v6542_v7  ;;  %v3873_v7 = vld [vmem:[%s6897_s7 + $0xc8] sm:$0xff] }
 0x952   : > { %4008 = vmatprep.mubr.msk.f32.mxu0 %vm2501_vm4, %v3872_v31 }
 0xa18   : > { %v3103_v57 = vpop.f32.mrb[32].mxu0 }
 0xa19   : > { %v3105_v10 = vpop.f32.mrb[33].mxu0 }
 0xa1c   : > { %v3108_v37 = vpop.f32.mrb[34].mxu0 }
 0xa1d   : > { %v4640_v13 = vpack.c.bf16 %v3108_v37, %v3103_v57  ;;  %v3110_v33 = vpop.f32.mrb[35].mxu0 }
 0xa1f   : > { %4641 = vmatprep.subr.bf16.mxu0 %v4640_v13 }
 0xa20   : > { %v3113_v0 = vpop.f32.mrb[36].mxu0  ;;  %4643 = vmatpush3.bf16.msra.mxu0 %v4640_v13 }
 0xa21   : > { %v3115_v2 = vpop.f32.mrb[37].mxu0 }
 0xa24   : > { %v3118_v55 = vpop.f32.mrb[38].mxu0 }
 0xa25   : > { %v4644_v56 = vpack.c.bf16 %v3118_v55, %v3113_v0  ;;  %v3120_v6 = vpop.f32.mrb[39].mxu0 }
 0xa27   : > { %4645 = vmatprep.subr.bf16.mxu0 %v4644_v56 }
 0xa28   : > { %4647 = vmatpush3.bf16.msra.mxu0 %v4644_v56 }
 0xa2b   : > { %4009 = vmatmul.mubr.msk.f32.vlgmr.msra.gmra.mrb[24].mxu0 %vm2501_vm4, %v3873_v7 }
 0xa2c   : > { %4011 = vmatprep.mubr.msk.f32.mxu0 %vm2501_vm4, %v3874_v34 }
 0xa2f   : > { %4012 = vmatmul.mubr.msk.f32.gmra.mrb[26].mxu0 %vm2501_vm4, %v3875_v36 }
 0xa30   : > { %4014 = vmatprep.mubr.msk.f32.mxu0 %vm2501_vm4, %v3876_v38 }
 0xa33   : > { %4015 = vmatmul.mubr.msk.f32.gmra.mrb[28].mxu0 %vm2501_vm4, %v3877_v46 }
 0xa34   : > { %4017 = vmatprep.mubr.msk.f32.mxu0 %vm2501_vm4, %v3878_v39 }
 0xa37   : > { %4018 = vmatmul.mubr.msk.f32.gmra.mrb[30].mxu0 %vm2501_vm4, %v3879_v40 }
 0xafe   : > { %v4010_v41 = vpop.f32.mrb[24].mxu0 }
 0xaff   : > { %v4652_v44 = vadd.f32 %v4010_v41, %v6707_v24  ;;  %v3221_v45 = vpop.f32.mrb[25].mxu0 }
 0xb00   : > { %v4653_v47 = vadd.f32 %v3221_v45, %v6709_v52 }
 0xb01   : > { %v3276_v48 = vadd.f32 %v4652_v44, %v3888_v42 }
 0xb02   : > { %v3275_v49 = vadd.f32 %v4653_v47, %v3888_v42  ;;  %v4013_v50 = vpop.f32.mrb[26].mxu0 }
 0xb03   : > { %4718 = vtanh.f32 %v3276_v48  ;;  %v4654_v26 = vadd.f32 %v4013_v50, %v6711_v54  ;;  %v3231_v58 = vpop.f32.mrb[27].mxu0 }
 0xb04   : > { %4720 = vtanh.f32 %v3275_v49  ;;  %v4655_v59 = vadd.f32 %v3231_v58, %v6713_v25 }
 0xb05   : > { %v3278_v60 = vadd.f32 %v4654_v26, %v3888_v42 }
 0xb06   : > { %v3277_v11 = vadd.f32 %v4655_v59, %v3888_v42  ;;  %v4016_v61 = vpop.f32.mrb[28].mxu0 }
 0xb07   : > { %4722 = vtanh.f32 %v3278_v60  ;;  %v4656_v24 = vadd.f32 %v4016_v61, %v6715_v27  ;;  %v3241_v62 = vpop.f32.mrb[29].mxu0 }
 0xb08   : > { %4724 = vtanh.f32 %v3277_v11  ;;  %v4657_v52 = vadd.f32 %v3241_v62, %v6717_v28 }
 0xb09   : > { %v3280_v63 = vadd.f32 %v4656_v24, %v3888_v42 }
 0xb0a   : > { %v3279_v1 = vadd.f32 %v4657_v52, %v3888_v42  ;;  %v4019_v3 = vpop.f32.mrb[30].mxu0 }
 0xb0b   : > { %4726 = vtanh.f32 %v3280_v63  ;;  %v4658_v54 = vadd.f32 %v4019_v3, %v6719_v30  ;;  %v3251_v25 = vpop.f32.mrb[31].mxu0 }
 0xb0c   : > { %4728 = vtanh.f32 %v3279_v1  ;;  %v4659_v4 = vadd.f32 %v3251_v25, %v6721_v32 }
 0xb0d   : > { %v4719_v27 = vpop.eup %4718  ;;  %v3282_v5 = vadd.f32 %v4658_v54, %v3888_v42 }
 0xb0e   : > { %v4721_v8 = vpop.eup %4720  ;;  %3292 = vst [vmem:[%s359_s30 + $0x8] sm:$0xff] %v4719_v27  ;;  %v3281_v9 = vadd.f32 %v4659_v4, %v3888_v42 }
 0xb0f   : > { %3291 = vst [vmem:[%s359_s30] sm:$0xff] %v4721_v8  ;;  %4730 = vtanh.f32 %v3282_v5 }
 0xb10   : > { %4732 = vtanh.f32 %v3281_v9 }
 0xb11   : > { %v4723_v28 = vpop.eup %4722 }
 0xb12   : > { %v4725_v12 = vpop.eup %4724  ;;  %3294 = vst [vmem:[%s359_s30 + $0x18] sm:$0xff] %v4723_v28 }
 0xb13   : > { %3293 = vst [vmem:[%s359_s30 + $0x10] sm:$0xff] %v4725_v12 }
 0xb15   : > { %v4727_v14 = vpop.eup %4726 }
 0xb16   : > { %v4729_v51 = vpop.eup %4728  ;;  %3296 = vst [vmem:[%s359_s30 + $0x28] sm:$0xff] %v4727_v14 }
 0xb17   : > { %3295 = vst [vmem:[%s359_s30 + $0x20] sm:$0xff] %v4729_v51 }
 0xb19   : > { %v4731_v30 = vpop.eup %4730 }
 0xb1a   : > { %v4733_v15 = vpop.eup %4732  ;;  %3298 = vst [vmem:[%s359_s30 + $0x38] sm:$0xff] %v4731_v30 }
 0xb1b   : > { %3297 = vst [vmem:[%s359_s30 + $0x30] sm:$0xff] %v4733_v15 }
 0xb1c PF: > { %s20_s13 = sadd.s32 1, %s4740_s13  }
 0xb1d   : > { %p17_p5 = scmp.ge.s32.totalorder %s20_s13, 4  }
 0xb1f   :  { %19 = sbr.rel (!%p17_p5) target bundleno = 1 (0x1), region = 108 }

</bundles_post_ra>
